<compile_context>
chip_gen: v7x
topology: tpu7x:2x2x1
jax: 0.10.0
libtpu: 0.0.40
codegen_flags: <defaults>
</compile_context>

<pallas_src>
import functools

import jax
import jax.numpy as jnp
from jax.experimental import pallas as pl
from jax.experimental.pallas import tpu as pltpu


# ----------------------------------------------------------------------------
# Kernel
# ----------------------------------------------------------------------------
def _encoder_kernel(x_ref, w1_ref, b1_ref, w2_ref, b2_ref, w3_ref, b3_ref,
                    o_ref, *, width, sample_rows, nb, ph, pw, cout):
    """Fused (conv3x3 -> ReLU -> maxpool3x3/s1) x 3 on flat activations.

    Activations are (rows, channels) f32 with row = s*sample_rows + ih*width
    + iw.  Each conv/pool shrinks the row count by 2*width+2; rows whose
    (ih, iw) fall outside a stage's valid region hold finite garbage that is
    never read by any valid row downstream (offsets only move forward and stay
    within the sample's row block for valid entries).
    """
    shift = 2 * width + 2
    offsets = [dh * width + dw for dh in range(3) for dw in range(3)]

    def conv_relu_vpu(zb, w_ref, b_ref):
        # zb: (M, cout), input already lane-broadcast to cout channels.
        m = zb.shape[0] - shift
        acc = jnp.zeros((m, cout), jnp.float32)
        for k, off in enumerate(offsets):
            acc = acc + zb[off:off + m, :] * w_ref[k]          # (1,cout) bcast
        return jnp.maximum(acc + b_ref[...], 0.0)

    def conv_relu_mxu(z, w_ref, b_ref):
        # z: (M, cin); w_ref: (9, cin, cout). 9 accumulating K=cin matmuls.
        m = z.shape[0] - shift
        acc = jnp.zeros((m, cout), jnp.float32)
        for k, off in enumerate(offsets):
            acc = acc + jnp.dot(z[off:off + m, :], w_ref[k],
                                preferred_element_type=jnp.float32)
        return jnp.maximum(acc + b_ref[...], 0.0)

    def maxpool(z):
        # Separable 3x3/s1 valid max pool: W-window max, then H-window max.
        m1 = z.shape[0] - 2
        mw = jnp.maximum(jnp.maximum(z[0:m1, :], z[1:m1 + 1, :]),
                         z[2:m1 + 2, :])
        m2 = m1 - 2 * width
        return jnp.maximum(jnp.maximum(mw[0:m2, :], mw[width:width + m2, :]),
                           mw[2 * width:2 * width + m2, :])

    # Stage 1 (Cin == 1): hoist the lane-broadcast once, then 9 VPU FMAs.
    x = x_ref[...]                                       # (nb*sample_rows, 1)
    xb = jnp.broadcast_to(x, (x.shape[0], cout)).astype(jnp.float32)
    h = maxpool(conv_relu_vpu(xb, w1_ref, b1_ref))
    # Stages 2/3: MXU path.
    h = maxpool(conv_relu_mxu(h, w2_ref, b2_ref))
    h = maxpool(conv_relu_mxu(h, w3_ref, b3_ref))

    # Gather the valid (ph, pw) rows of each sample into one dense
    # (nb*ph*pw, cout) slab (all source offsets are multiples of `width`,
    # hence 8-aligned) and store once.
    pieces = []
    for s in range(nb):
        base = s * sample_rows
        for ih in range(ph):
            start = base + ih * width
            pieces.append(h[start:start + pw, :])
    o_ref[...] = jnp.concatenate(pieces, axis=0).astype(o_ref.dtype)


# ----------------------------------------------------------------------------
# Wrappers
# ----------------------------------------------------------------------------
def encoder_forward(x_nhwc, params, *, block_n=None):
    """x_nhwc: (N, H, W, 1) f32 -> NHWC output (N, H-12, W-12, 30) f32."""
    (w1, b1), (w2, b2), (w3, b3) = params
    N, H, W, Cin = x_nhwc.shape
    assert Cin == 1, "Encoder expects a single input channel"
    Ph, Pw = H - 12, W - 12
    Cout = w1.shape[-1]

    if block_n is None:
        # Keep >=2 "parallel" grid steps (both v7x TensorCores busy); on
        # single-TC parts (v5e/v6e) pass block_n=N to fully amortize the
        # per-step overhead and maximize matmul M.
        block_n = N // 2 if (N >= 2 and N % 2 == 0) else 1
    assert N % block_n == 0

    # Flat row-major activations: row = n*H*W + ih*W + iw (free reshape).
    x_flat = x_nhwc.reshape(N * H * W, Cin).astype(jnp.float32)

    # Matmul-ready weights: (9, Cin, Cout), tap k = 3*dh + dw (row-major).
    w1k = w1.reshape(9, 1, Cout).astype(jnp.float32)
    w2k = w2.reshape(9, w2.shape[2], Cout).astype(jnp.float32)
    w3k = w3.reshape(9, w3.shape[2], Cout).astype(jnp.float32)
    b1k = b1.reshape(1, Cout).astype(jnp.float32)
    b2k = b2.reshape(1, Cout).astype(jnp.float32)
    b3k = b3.reshape(1, Cout).astype(jnp.float32)

    kernel = functools.partial(
        _encoder_kernel, width=W, sample_rows=H * W, nb=block_n,
        ph=Ph, pw=Pw, cout=Cout)

    out_flat = pl.pallas_call(
        kernel,
        out_shape=jax.ShapeDtypeStruct((N * Ph * Pw, Cout), jnp.float32),
        grid=(N // block_n,),
        in_specs=[
            pl.BlockSpec((block_n * H * W, Cin), lambda n: (n, 0)),
            pl.BlockSpec(w1k.shape, lambda n: (0, 0, 0)),
            pl.BlockSpec(b1k.shape, lambda n: (0, 0)),
            pl.BlockSpec(w2k.shape, lambda n: (0, 0, 0)),
            pl.BlockSpec(b2k.shape, lambda n: (0, 0)),
            pl.BlockSpec(w3k.shape, lambda n: (0, 0, 0)),
            pl.BlockSpec(b3k.shape, lambda n: (0, 0)),
        ],
        out_specs=pl.BlockSpec((block_n * Ph * Pw, Cout), lambda n: (n, 0)),
        compiler_params=pltpu.CompilerParams(
            dimension_semantics=("parallel",)),
    )(x_flat, w1k, b1k, w2k, b2k, w3k, b3k)

    return out_flat.reshape(N, Ph, Pw, Cout)


@jax.jit
def encoder_forward_nchw(x_nchw, params):
    """PyTorch-convention interface: NCHW in, NCHW out."""
    N, C, H, W = x_nchw.shape
    assert C == 1
    x_nhwc = x_nchw.reshape(N, H, W, 1)      # Cin==1: transpose == reshape
    out_nhwc = encoder_forward(x_nhwc, params)
    return jnp.transpose(out_nhwc, (0, 3, 1, 2))


def init_params(key):
    """Deterministic init mimicking PyTorch Conv2d default U(+-1/sqrt(fan_in))."""
    shapes = [(3, 3, 1, 30), (3, 3, 30, 30), (3, 3, 30, 30)]
    params = []
    for shp in shapes:
        key, kw, kb = jax.random.split(key, 3)
        fan_in = shp[0] * shp[1] * shp[2]
        bound = 1.0 / jnp.sqrt(fan_in)
        w = jax.random.uniform(kw, shp, jnp.float32, -bound, bound)
        b = jax.random.uniform(kb, (1, shp[3]), jnp.float32, -bound, bound)
        params.append((w, b))
    return params


# ----------------------------------------------------------------------------
# Plain-JAX f32 reference (PyTorch-equivalent) for the sanity check.
# ----------------------------------------------------------------------------
def _ref_stage(x, w, b):
    conv = jax.lax.conv_general_dilated(
        x, w, window_strides=(1, 1), padding="VALID",
        dimension_numbers=("NHWC", "HWIO", "NHWC"),
        preferred_element_type=jnp.float32,
    ) + b.reshape(1, 1, 1, -1)
    conv = jnp.maximum(conv, 0.0)
    return jax.lax.reduce_window(
        conv, -jnp.inf, jax.lax.max,
        window_dimensions=(1, 3, 3, 1), window_strides=(1, 1, 1, 1),
        padding="VALID",
    )


def _ref_forward_nhwc(x, params):
    h = x
    for w, b in params:
        h = _ref_stage(h, w, b)
    return h


if __name__ == "__main__":
    key = jax.random.PRNGKey(0)
    k_in, k_par = jax.random.split(key)

    # PyTorch-convention input: NCHW = (2, 1, 16, 16), single input channel.
    x_nchw = jax.random.normal(k_in, (2, 1, 16, 16), jnp.float32)
    params = init_params(k_par)

    out_nchw = jax.block_until_ready(encoder_forward_nchw(x_nchw, params))
    assert out_nchw.shape == (2, 30, 4, 4), out_nchw.shape

    x_nhwc = jnp.reshape(x_nchw, (2, 16, 16, 1))
    out_nhwc = jnp.transpose(out_nchw, (0, 2, 3, 1))
    ref = jax.block_until_ready(_ref_forward_nhwc(x_nhwc, params))
    max_err = float(jnp.max(jnp.abs(out_nhwc - ref)))
    assert jnp.allclose(out_nhwc, ref, atol=1e-3, rtol=1e-3), \
        f"mismatch vs f32 reference (max abs err {max_err})"

    print("KERNEL_OK")
</pallas_src>

<mosaic_0001>
module attributes {stable_mosaic.version = 11 : i64} {
  func.func @_encoder_kernel(%arg0: i32, %arg1: memref<256x1xf32, #tpu.memory_space<vmem>>, %arg2: memref<9x1x30xf32, #tpu.memory_space<vmem>>, %arg3: memref<1x30xf32, #tpu.memory_space<vmem>>, %arg4: memref<9x30x30xf32, #tpu.memory_space<vmem>>, %arg5: memref<1x30xf32, #tpu.memory_space<vmem>>, %arg6: memref<9x30x30xf32, #tpu.memory_space<vmem>>, %arg7: memref<1x30xf32, #tpu.memory_space<vmem>>, %arg8: memref<16x30xf32, #tpu.memory_space<vmem>>) attributes {dimension_semantics = [#tpu.dimension_semantics<parallel>], iteration_bounds = array<i64: 2>, scalar_prefetch = 0 : i64, scratch_operands = 0 : i64, tpu.core_type = #tpu.core_type<tc>, window_params = [{transform_indices = @transform_0, window_bounds = array<i64: 256, 1>}, {pipeline_mode = #tpu.pipeline_mode<synchronous>, transform_indices = @transform_1, window_bounds = array<i64: 9, 1, 30>}, {pipeline_mode = #tpu.pipeline_mode<synchronous>, transform_indices = @transform_2, window_bounds = array<i64: 1, 30>}, {pipeline_mode = #tpu.pipeline_mode<synchronous>, transform_indices = @transform_3, window_bounds = array<i64: 9, 30, 30>}, {pipeline_mode = #tpu.pipeline_mode<synchronous>, transform_indices = @transform_4, window_bounds = array<i64: 1, 30>}, {pipeline_mode = #tpu.pipeline_mode<synchronous>, transform_indices = @transform_5, window_bounds = array<i64: 9, 30, 30>}, {pipeline_mode = #tpu.pipeline_mode<synchronous>, transform_indices = @transform_6, window_bounds = array<i64: 1, 30>}, {transform_indices = @transform_7, window_bounds = array<i64: 16, 30>}]} {
    %c0 = arith.constant 0 : index
    %c0_0 = arith.constant 0 : index
    %0 = vector.load %arg1[%c0, %c0_0] : memref<256x1xf32, #tpu.memory_space<vmem>>, vector<256x1xf32>
    %1 = vector.shape_cast %0 : vector<256x1xf32> to vector<256x1xf32>
    %2 = vector.broadcast %1 : vector<256x1xf32> to vector<256x30xf32>
    %cst = arith.constant 0.000000e+00 : f32
    %3 = vector.broadcast %cst : f32 to vector<222x30xf32>
    %4 = vector.extract_strided_slice %2 {offsets = [0, 0], sizes = [222, 30], strides = [1, 1]} : vector<256x30xf32> to vector<222x30xf32>
    %c0_1 = arith.constant 0 : index
    %c0_2 = arith.constant 0 : index
    %c0_3 = arith.constant 0 : index
    %5 = vector.load %arg2[%c0_1, %c0_2, %c0_3] : memref<9x1x30xf32, #tpu.memory_space<vmem>>, vector<1x1x30xf32>
    %6 = vector.shape_cast %5 : vector<1x1x30xf32> to vector<1x30xf32>
    %7 = vector.broadcast %6 : vector<1x30xf32> to vector<222x30xf32>
    %8 = arith.mulf %4, %7 : vector<222x30xf32>
    %9 = arith.addf %3, %8 : vector<222x30xf32>
    %10 = vector.extract_strided_slice %2 {offsets = [1, 0], sizes = [222, 30], strides = [1, 1]} : vector<256x30xf32> to vector<222x30xf32>
    %c1 = arith.constant 1 : index
    %c0_4 = arith.constant 0 : index
    %c0_5 = arith.constant 0 : index
    %11 = vector.load %arg2[%c1, %c0_4, %c0_5] : memref<9x1x30xf32, #tpu.memory_space<vmem>>, vector<1x1x30xf32>
    %12 = vector.shape_cast %11 : vector<1x1x30xf32> to vector<1x30xf32>
    %13 = vector.broadcast %12 : vector<1x30xf32> to vector<222x30xf32>
    %14 = arith.mulf %10, %13 : vector<222x30xf32>
    %15 = arith.addf %9, %14 : vector<222x30xf32>
    %16 = vector.extract_strided_slice %2 {offsets = [2, 0], sizes = [222, 30], strides = [1, 1]} : vector<256x30xf32> to vector<222x30xf32>
    %c2 = arith.constant 2 : index
    %c0_6 = arith.constant 0 : index
    %c0_7 = arith.constant 0 : index
    %17 = vector.load %arg2[%c2, %c0_6, %c0_7] : memref<9x1x30xf32, #tpu.memory_space<vmem>>, vector<1x1x30xf32>
    %18 = vector.shape_cast %17 : vector<1x1x30xf32> to vector<1x30xf32>
    %19 = vector.broadcast %18 : vector<1x30xf32> to vector<222x30xf32>
    %20 = arith.mulf %16, %19 : vector<222x30xf32>
    %21 = arith.addf %15, %20 : vector<222x30xf32>
    %22 = vector.extract_strided_slice %2 {offsets = [16, 0], sizes = [222, 30], strides = [1, 1]} : vector<256x30xf32> to vector<222x30xf32>
    %c3 = arith.constant 3 : index
    %c0_8 = arith.constant 0 : index
    %c0_9 = arith.constant 0 : index
    %23 = vector.load %arg2[%c3, %c0_8, %c0_9] : memref<9x1x30xf32, #tpu.memory_space<vmem>>, vector<1x1x30xf32>
    %24 = vector.shape_cast %23 : vector<1x1x30xf32> to vector<1x30xf32>
    %25 = vector.broadcast %24 : vector<1x30xf32> to vector<222x30xf32>
    %26 = arith.mulf %22, %25 : vector<222x30xf32>
    %27 = arith.addf %21, %26 : vector<222x30xf32>
    %28 = vector.extract_strided_slice %2 {offsets = [17, 0], sizes = [222, 30], strides = [1, 1]} : vector<256x30xf32> to vector<222x30xf32>
    %c4 = arith.constant 4 : index
    %c0_10 = arith.constant 0 : index
    %c0_11 = arith.constant 0 : index
    %29 = vector.load %arg2[%c4, %c0_10, %c0_11] : memref<9x1x30xf32, #tpu.memory_space<vmem>>, vector<1x1x30xf32>
    %30 = vector.shape_cast %29 : vector<1x1x30xf32> to vector<1x30xf32>
    %31 = vector.broadcast %30 : vector<1x30xf32> to vector<222x30xf32>
    %32 = arith.mulf %28, %31 : vector<222x30xf32>
    %33 = arith.addf %27, %32 : vector<222x30xf32>
    %34 = vector.extract_strided_slice %2 {offsets = [18, 0], sizes = [222, 30], strides = [1, 1]} : vector<256x30xf32> to vector<222x30xf32>
    %c5 = arith.constant 5 : index
    %c0_12 = arith.constant 0 : index
    %c0_13 = arith.constant 0 : index
    %35 = vector.load %arg2[%c5, %c0_12, %c0_13] : memref<9x1x30xf32, #tpu.memory_space<vmem>>, vector<1x1x30xf32>
    %36 = vector.shape_cast %35 : vector<1x1x30xf32> to vector<1x30xf32>
    %37 = vector.broadcast %36 : vector<1x30xf32> to vector<222x30xf32>
    %38 = arith.mulf %34, %37 : vector<222x30xf32>
    %39 = arith.addf %33, %38 : vector<222x30xf32>
    %40 = vector.extract_strided_slice %2 {offsets = [32, 0], sizes = [222, 30], strides = [1, 1]} : vector<256x30xf32> to vector<222x30xf32>
    %c6 = arith.constant 6 : index
    %c0_14 = arith.constant 0 : index
    %c0_15 = arith.constant 0 : index
    %41 = vector.load %arg2[%c6, %c0_14, %c0_15] : memref<9x1x30xf32, #tpu.memory_space<vmem>>, vector<1x1x30xf32>
    %42 = vector.shape_cast %41 : vector<1x1x30xf32> to vector<1x30xf32>
    %43 = vector.broadcast %42 : vector<1x30xf32> to vector<222x30xf32>
    %44 = arith.mulf %40, %43 : vector<222x30xf32>
    %45 = arith.addf %39, %44 : vector<222x30xf32>
    %46 = vector.extract_strided_slice %2 {offsets = [33, 0], sizes = [222, 30], strides = [1, 1]} : vector<256x30xf32> to vector<222x30xf32>
    %c7 = arith.constant 7 : index
    %c0_16 = arith.constant 0 : index
    %c0_17 = arith.constant 0 : index
    %47 = vector.load %arg2[%c7, %c0_16, %c0_17] : memref<9x1x30xf32, #tpu.memory_space<vmem>>, vector<1x1x30xf32>
    %48 = vector.shape_cast %47 : vector<1x1x30xf32> to vector<1x30xf32>
    %49 = vector.broadcast %48 : vector<1x30xf32> to vector<222x30xf32>
    %50 = arith.mulf %46, %49 : vector<222x30xf32>
    %51 = arith.addf %45, %50 : vector<222x30xf32>
    %52 = vector.extract_strided_slice %2 {offsets = [34, 0], sizes = [222, 30], strides = [1, 1]} : vector<256x30xf32> to vector<222x30xf32>
    %c8 = arith.constant 8 : index
    %c0_18 = arith.constant 0 : index
    %c0_19 = arith.constant 0 : index
    %53 = vector.load %arg2[%c8, %c0_18, %c0_19] : memref<9x1x30xf32, #tpu.memory_space<vmem>>, vector<1x1x30xf32>
    %54 = vector.shape_cast %53 : vector<1x1x30xf32> to vector<1x30xf32>
    %55 = vector.broadcast %54 : vector<1x30xf32> to vector<222x30xf32>
    %56 = arith.mulf %52, %55 : vector<222x30xf32>
    %57 = arith.addf %51, %56 : vector<222x30xf32>
    %c0_20 = arith.constant 0 : index
    %c0_21 = arith.constant 0 : index
    %58 = vector.load %arg3[%c0_20, %c0_21] : memref<1x30xf32, #tpu.memory_space<vmem>>, vector<1x30xf32>
    %59 = vector.broadcast %58 : vector<1x30xf32> to vector<222x30xf32>
    %60 = arith.addf %57, %59 : vector<222x30xf32>
    %cst_22 = arith.constant 0.000000e+00 : f32
    %61 = vector.broadcast %cst_22 : f32 to vector<222x30xf32>
    %62 = arith.maximumf %60, %61 : vector<222x30xf32>
    %63 = vector.extract_strided_slice %62 {offsets = [0, 0], sizes = [220, 30], strides = [1, 1]} : vector<222x30xf32> to vector<220x30xf32>
    %64 = vector.extract_strided_slice %62 {offsets = [1, 0], sizes = [220, 30], strides = [1, 1]} : vector<222x30xf32> to vector<220x30xf32>
    %65 = arith.maximumf %63, %64 : vector<220x30xf32>
    %66 = vector.extract_strided_slice %62 {offsets = [2, 0], sizes = [220, 30], strides = [1, 1]} : vector<222x30xf32> to vector<220x30xf32>
    %67 = arith.maximumf %65, %66 : vector<220x30xf32>
    %68 = vector.extract_strided_slice %67 {offsets = [0, 0], sizes = [188, 30], strides = [1, 1]} : vector<220x30xf32> to vector<188x30xf32>
    %69 = vector.extract_strided_slice %67 {offsets = [16, 0], sizes = [188, 30], strides = [1, 1]} : vector<220x30xf32> to vector<188x30xf32>
    %70 = arith.maximumf %68, %69 : vector<188x30xf32>
    %71 = vector.extract_strided_slice %67 {offsets = [32, 0], sizes = [188, 30], strides = [1, 1]} : vector<220x30xf32> to vector<188x30xf32>
    %72 = arith.maximumf %70, %71 : vector<188x30xf32>
    %cst_23 = arith.constant 0.000000e+00 : f32
    %73 = vector.broadcast %cst_23 : f32 to vector<154x30xf32>
    %74 = vector.extract_strided_slice %72 {offsets = [0, 0], sizes = [154, 30], strides = [1, 1]} : vector<188x30xf32> to vector<154x30xf32>
    %c0_24 = arith.constant 0 : index
    %c0_25 = arith.constant 0 : index
    %c0_26 = arith.constant 0 : index
    %75 = vector.load %arg4[%c0_24, %c0_25, %c0_26] : memref<9x30x30xf32, #tpu.memory_space<vmem>>, vector<1x30x30xf32>
    %76 = vector.shape_cast %75 : vector<1x30x30xf32> to vector<30x30xf32>
    %cst_27 = arith.constant dense<0.000000e+00> : vector<154x30xf32>
    %77 = tpu.matmul %74, %76, %cst_27 {dimension_numbers = #tpu.dot_dimension_numbers<[1], [0], [0], [1], [0, 0, 1, 1], [], []>} : vector<154x30xf32>, vector<30x30xf32>, vector<154x30xf32> -> vector<154x30xf32>
    %78 = arith.addf %73, %77 : vector<154x30xf32>
    %79 = vector.extract_strided_slice %72 {offsets = [1, 0], sizes = [154, 30], strides = [1, 1]} : vector<188x30xf32> to vector<154x30xf32>
    %c1_28 = arith.constant 1 : index
    %c0_29 = arith.constant 0 : index
    %c0_30 = arith.constant 0 : index
    %80 = vector.load %arg4[%c1_28, %c0_29, %c0_30] : memref<9x30x30xf32, #tpu.memory_space<vmem>>, vector<1x30x30xf32>
    %81 = vector.shape_cast %80 : vector<1x30x30xf32> to vector<30x30xf32>
    %cst_31 = arith.constant dense<0.000000e+00> : vector<154x30xf32>
    %82 = tpu.matmul %79, %81, %cst_31 {dimension_numbers = #tpu.dot_dimension_numbers<[1], [0], [0], [1], [0, 0, 1, 1], [], []>} : vector<154x30xf32>, vector<30x30xf32>, vector<154x30xf32> -> vector<154x30xf32>
    %83 = arith.addf %78, %82 : vector<154x30xf32>
    %84 = vector.extract_strided_slice %72 {offsets = [2, 0], sizes = [154, 30], strides = [1, 1]} : vector<188x30xf32> to vector<154x30xf32>
    %c2_32 = arith.constant 2 : index
    %c0_33 = arith.constant 0 : index
    %c0_34 = arith.constant 0 : index
    %85 = vector.load %arg4[%c2_32, %c0_33, %c0_34] : memref<9x30x30xf32, #tpu.memory_space<vmem>>, vector<1x30x30xf32>
    %86 = vector.shape_cast %85 : vector<1x30x30xf32> to vector<30x30xf32>
    %cst_35 = arith.constant dense<0.000000e+00> : vector<154x30xf32>
    %87 = tpu.matmul %84, %86, %cst_35 {dimension_numbers = #tpu.dot_dimension_numbers<[1], [0], [0], [1], [0, 0, 1, 1], [], []>} : vector<154x30xf32>, vector<30x30xf32>, vector<154x30xf32> -> vector<154x30xf32>
    %88 = arith.addf %83, %87 : vector<154x30xf32>
    %89 = vector.extract_strided_slice %72 {offsets = [16, 0], sizes = [154, 30], strides = [1, 1]} : vector<188x30xf32> to vector<154x30xf32>
    %c3_36 = arith.constant 3 : index
    %c0_37 = arith.constant 0 : index
    %c0_38 = arith.constant 0 : index
    %90 = vector.load %arg4[%c3_36, %c0_37, %c0_38] : memref<9x30x30xf32, #tpu.memory_space<vmem>>, vector<1x30x30xf32>
    %91 = vector.shape_cast %90 : vector<1x30x30xf32> to vector<30x30xf32>
    %cst_39 = arith.constant dense<0.000000e+00> : vector<154x30xf32>
    %92 = tpu.matmul %89, %91, %cst_39 {dimension_numbers = #tpu.dot_dimension_numbers<[1], [0], [0], [1], [0, 0, 1, 1], [], []>} : vector<154x30xf32>, vector<30x30xf32>, vector<154x30xf32> -> vector<154x30xf32>
    %93 = arith.addf %88, %92 : vector<154x30xf32>
    %94 = vector.extract_strided_slice %72 {offsets = [17, 0], sizes = [154, 30], strides = [1, 1]} : vector<188x30xf32> to vector<154x30xf32>
    %c4_40 = arith.constant 4 : index
    %c0_41 = arith.constant 0 : index
    %c0_42 = arith.constant 0 : index
    %95 = vector.load %arg4[%c4_40, %c0_41, %c0_42] : memref<9x30x30xf32, #tpu.memory_space<vmem>>, vector<1x30x30xf32>
    %96 = vector.shape_cast %95 : vector<1x30x30xf32> to vector<30x30xf32>
    %cst_43 = arith.constant dense<0.000000e+00> : vector<154x30xf32>
    %97 = tpu.matmul %94, %96, %cst_43 {dimension_numbers = #tpu.dot_dimension_numbers<[1], [0], [0], [1], [0, 0, 1, 1], [], []>} : vector<154x30xf32>, vector<30x30xf32>, vector<154x30xf32> -> vector<154x30xf32>
    %98 = arith.addf %93, %97 : vector<154x30xf32>
    %99 = vector.extract_strided_slice %72 {offsets = [18, 0], sizes = [154, 30], strides = [1, 1]} : vector<188x30xf32> to vector<154x30xf32>
    %c5_44 = arith.constant 5 : index
    %c0_45 = arith.constant 0 : index
    %c0_46 = arith.constant 0 : index
    %100 = vector.load %arg4[%c5_44, %c0_45, %c0_46] : memref<9x30x30xf32, #tpu.memory_space<vmem>>, vector<1x30x30xf32>
    %101 = vector.shape_cast %100 : vector<1x30x30xf32> to vector<30x30xf32>
    %cst_47 = arith.constant dense<0.000000e+00> : vector<154x30xf32>
    %102 = tpu.matmul %99, %101, %cst_47 {dimension_numbers = #tpu.dot_dimension_numbers<[1], [0], [0], [1], [0, 0, 1, 1], [], []>} : vector<154x30xf32>, vector<30x30xf32>, vector<154x30xf32> -> vector<154x30xf32>
    %103 = arith.addf %98, %102 : vector<154x30xf32>
    %104 = vector.extract_strided_slice %72 {offsets = [32, 0], sizes = [154, 30], strides = [1, 1]} : vector<188x30xf32> to vector<154x30xf32>
    %c6_48 = arith.constant 6 : index
    %c0_49 = arith.constant 0 : index
    %c0_50 = arith.constant 0 : index
    %105 = vector.load %arg4[%c6_48, %c0_49, %c0_50] : memref<9x30x30xf32, #tpu.memory_space<vmem>>, vector<1x30x30xf32>
    %106 = vector.shape_cast %105 : vector<1x30x30xf32> to vector<30x30xf32>
    %cst_51 = arith.constant dense<0.000000e+00> : vector<154x30xf32>
    %107 = tpu.matmul %104, %106, %cst_51 {dimension_numbers = #tpu.dot_dimension_numbers<[1], [0], [0], [1], [0, 0, 1, 1], [], []>} : vector<154x30xf32>, vector<30x30xf32>, vector<154x30xf32> -> vector<154x30xf32>
    %108 = arith.addf %103, %107 : vector<154x30xf32>
    %109 = vector.extract_strided_slice %72 {offsets = [33, 0], sizes = [154, 30], strides = [1, 1]} : vector<188x30xf32> to vector<154x30xf32>
    %c7_52 = arith.constant 7 : index
    %c0_53 = arith.constant 0 : index
    %c0_54 = arith.constant 0 : index
    %110 = vector.load %arg4[%c7_52, %c0_53, %c0_54] : memref<9x30x30xf32, #tpu.memory_space<vmem>>, vector<1x30x30xf32>
    %111 = vector.shape_cast %110 : vector<1x30x30xf32> to vector<30x30xf32>
    %cst_55 = arith.constant dense<0.000000e+00> : vector<154x30xf32>
    %112 = tpu.matmul %109, %111, %cst_55 {dimension_numbers = #tpu.dot_dimension_numbers<[1], [0], [0], [1], [0, 0, 1, 1], [], []>} : vector<154x30xf32>, vector<30x30xf32>, vector<154x30xf32> -> vector<154x30xf32>
    %113 = arith.addf %108, %112 : vector<154x30xf32>
    %114 = vector.extract_strided_slice %72 {offsets = [34, 0], sizes = [154, 30], strides = [1, 1]} : vector<188x30xf32> to vector<154x30xf32>
    %c8_56 = arith.constant 8 : index
    %c0_57 = arith.constant 0 : index
    %c0_58 = arith.constant 0 : index
    %115 = vector.load %arg4[%c8_56, %c0_57, %c0_58] : memref<9x30x30xf32, #tpu.memory_space<vmem>>, vector<1x30x30xf32>
    %116 = vector.shape_cast %115 : vector<1x30x30xf32> to vector<30x30xf32>
    %cst_59 = arith.constant dense<0.000000e+00> : vector<154x30xf32>
    %117 = tpu.matmul %114, %116, %cst_59 {dimension_numbers = #tpu.dot_dimension_numbers<[1], [0], [0], [1], [0, 0, 1, 1], [], []>} : vector<154x30xf32>, vector<30x30xf32>, vector<154x30xf32> -> vector<154x30xf32>
    %118 = arith.addf %113, %117 : vector<154x30xf32>
    %c0_60 = arith.constant 0 : index
    %c0_61 = arith.constant 0 : index
    %119 = vector.load %arg5[%c0_60, %c0_61] : memref<1x30xf32, #tpu.memory_space<vmem>>, vector<1x30xf32>
    %120 = vector.broadcast %119 : vector<1x30xf32> to vector<154x30xf32>
    %121 = arith.addf %118, %120 : vector<154x30xf32>
    %cst_62 = arith.constant 0.000000e+00 : f32
    %122 = vector.broadcast %cst_62 : f32 to vector<154x30xf32>
    %123 = arith.maximumf %121, %122 : vector<154x30xf32>
    %124 = vector.extract_strided_slice %123 {offsets = [0, 0], sizes = [152, 30], strides = [1, 1]} : vector<154x30xf32> to vector<152x30xf32>
    %125 = vector.extract_strided_slice %123 {offsets = [1, 0], sizes = [152, 30], strides = [1, 1]} : vector<154x30xf32> to vector<152x30xf32>
    %126 = arith.maximumf %124, %125 : vector<152x30xf32>
    %127 = vector.extract_strided_slice %123 {offsets = [2, 0], sizes = [152, 30], strides = [1, 1]} : vector<154x30xf32> to vector<152x30xf32>
    %128 = arith.maximumf %126, %127 : vector<152x30xf32>
    %129 = vector.extract_strided_slice %128 {offsets = [0, 0], sizes = [120, 30], strides = [1, 1]} : vector<152x30xf32> to vector<120x30xf32>
    %130 = vector.extract_strided_slice %128 {offsets = [16, 0], sizes = [120, 30], strides = [1, 1]} : vector<152x30xf32> to vector<120x30xf32>
    %131 = arith.maximumf %129, %130 : vector<120x30xf32>
    %132 = vector.extract_strided_slice %128 {offsets = [32, 0], sizes = [120, 30], strides = [1, 1]} : vector<152x30xf32> to vector<120x30xf32>
    %133 = arith.maximumf %131, %132 : vector<120x30xf32>
    %cst_63 = arith.constant 0.000000e+00 : f32
    %134 = vector.broadcast %cst_63 : f32 to vector<86x30xf32>
    %135 = vector.extract_strided_slice %133 {offsets = [0, 0], sizes = [86, 30], strides = [1, 1]} : vector<120x30xf32> to vector<86x30xf32>
    %c0_64 = arith.constant 0 : index
    %c0_65 = arith.constant 0 : index
    %c0_66 = arith.constant 0 : index
    %136 = vector.load %arg6[%c0_64, %c0_65, %c0_66] : memref<9x30x30xf32, #tpu.memory_space<vmem>>, vector<1x30x30xf32>
    %137 = vector.shape_cast %136 : vector<1x30x30xf32> to vector<30x30xf32>
    %cst_67 = arith.constant dense<0.000000e+00> : vector<86x30xf32>
    %138 = tpu.matmul %135, %137, %cst_67 {dimension_numbers = #tpu.dot_dimension_numbers<[1], [0], [0], [1], [0, 0, 1, 1], [], []>} : vector<86x30xf32>, vector<30x30xf32>, vector<86x30xf32> -> vector<86x30xf32>
    %139 = arith.addf %134, %138 : vector<86x30xf32>
    %140 = vector.extract_strided_slice %133 {offsets = [1, 0], sizes = [86, 30], strides = [1, 1]} : vector<120x30xf32> to vector<86x30xf32>
    %c1_68 = arith.constant 1 : index
    %c0_69 = arith.constant 0 : index
    %c0_70 = arith.constant 0 : index
    %141 = vector.load %arg6[%c1_68, %c0_69, %c0_70] : memref<9x30x30xf32, #tpu.memory_space<vmem>>, vector<1x30x30xf32>
    %142 = vector.shape_cast %141 : vector<1x30x30xf32> to vector<30x30xf32>
    %cst_71 = arith.constant dense<0.000000e+00> : vector<86x30xf32>
    %143 = tpu.matmul %140, %142, %cst_71 {dimension_numbers = #tpu.dot_dimension_numbers<[1], [0], [0], [1], [0, 0, 1, 1], [], []>} : vector<86x30xf32>, vector<30x30xf32>, vector<86x30xf32> -> vector<86x30xf32>
    %144 = arith.addf %139, %143 : vector<86x30xf32>
    %145 = vector.extract_strided_slice %133 {offsets = [2, 0], sizes = [86, 30], strides = [1, 1]} : vector<120x30xf32> to vector<86x30xf32>
    %c2_72 = arith.constant 2 : index
    %c0_73 = arith.constant 0 : index
    %c0_74 = arith.constant 0 : index
    %146 = vector.load %arg6[%c2_72, %c0_73, %c0_74] : memref<9x30x30xf32, #tpu.memory_space<vmem>>, vector<1x30x30xf32>
    %147 = vector.shape_cast %146 : vector<1x30x30xf32> to vector<30x30xf32>
    %cst_75 = arith.constant dense<0.000000e+00> : vector<86x30xf32>
    %148 = tpu.matmul %145, %147, %cst_75 {dimension_numbers = #tpu.dot_dimension_numbers<[1], [0], [0], [1], [0, 0, 1, 1], [], []>} : vector<86x30xf32>, vector<30x30xf32>, vector<86x30xf32> -> vector<86x30xf32>
    %149 = arith.addf %144, %148 : vector<86x30xf32>
    %150 = vector.extract_strided_slice %133 {offsets = [16, 0], sizes = [86, 30], strides = [1, 1]} : vector<120x30xf32> to vector<86x30xf32>
    %c3_76 = arith.constant 3 : index
    %c0_77 = arith.constant 0 : index
    %c0_78 = arith.constant 0 : index
    %151 = vector.load %arg6[%c3_76, %c0_77, %c0_78] : memref<9x30x30xf32, #tpu.memory_space<vmem>>, vector<1x30x30xf32>
    %152 = vector.shape_cast %151 : vector<1x30x30xf32> to vector<30x30xf32>
    %cst_79 = arith.constant dense<0.000000e+00> : vector<86x30xf32>
    %153 = tpu.matmul %150, %152, %cst_79 {dimension_numbers = #tpu.dot_dimension_numbers<[1], [0], [0], [1], [0, 0, 1, 1], [], []>} : vector<86x30xf32>, vector<30x30xf32>, vector<86x30xf32> -> vector<86x30xf32>
    %154 = arith.addf %149, %153 : vector<86x30xf32>
    %155 = vector.extract_strided_slice %133 {offsets = [17, 0], sizes = [86, 30], strides = [1, 1]} : vector<120x30xf32> to vector<86x30xf32>
    %c4_80 = arith.constant 4 : index
    %c0_81 = arith.constant 0 : index
    %c0_82 = arith.constant 0 : index
    %156 = vector.load %arg6[%c4_80, %c0_81, %c0_82] : memref<9x30x30xf32, #tpu.memory_space<vmem>>, vector<1x30x30xf32>
    %157 = vector.shape_cast %156 : vector<1x30x30xf32> to vector<30x30xf32>
    %cst_83 = arith.constant dense<0.000000e+00> : vector<86x30xf32>
    %158 = tpu.matmul %155, %157, %cst_83 {dimension_numbers = #tpu.dot_dimension_numbers<[1], [0], [0], [1], [0, 0, 1, 1], [], []>} : vector<86x30xf32>, vector<30x30xf32>, vector<86x30xf32> -> vector<86x30xf32>
    %159 = arith.addf %154, %158 : vector<86x30xf32>
    %160 = vector.extract_strided_slice %133 {offsets = [18, 0], sizes = [86, 30], strides = [1, 1]} : vector<120x30xf32> to vector<86x30xf32>
    %c5_84 = arith.constant 5 : index
    %c0_85 = arith.constant 0 : index
    %c0_86 = arith.constant 0 : index
    %161 = vector.load %arg6[%c5_84, %c0_85, %c0_86] : memref<9x30x30xf32, #tpu.memory_space<vmem>>, vector<1x30x30xf32>
    %162 = vector.shape_cast %161 : vector<1x30x30xf32> to vector<30x30xf32>
    %cst_87 = arith.constant dense<0.000000e+00> : vector<86x30xf32>
    %163 = tpu.matmul %160, %162, %cst_87 {dimension_numbers = #tpu.dot_dimension_numbers<[1], [0], [0], [1], [0, 0, 1, 1], [], []>} : vector<86x30xf32>, vector<30x30xf32>, vector<86x30xf32> -> vector<86x30xf32>
    %164 = arith.addf %159, %163 : vector<86x30xf32>
    %165 = vector.extract_strided_slice %133 {offsets = [32, 0], sizes = [86, 30], strides = [1, 1]} : vector<120x30xf32> to vector<86x30xf32>
    %c6_88 = arith.constant 6 : index
    %c0_89 = arith.constant 0 : index
    %c0_90 = arith.constant 0 : index
    %166 = vector.load %arg6[%c6_88, %c0_89, %c0_90] : memref<9x30x30xf32, #tpu.memory_space<vmem>>, vector<1x30x30xf32>
    %167 = vector.shape_cast %166 : vector<1x30x30xf32> to vector<30x30xf32>
    %cst_91 = arith.constant dense<0.000000e+00> : vector<86x30xf32>
    %168 = tpu.matmul %165, %167, %cst_91 {dimension_numbers = #tpu.dot_dimension_numbers<[1], [0], [0], [1], [0, 0, 1, 1], [], []>} : vector<86x30xf32>, vector<30x30xf32>, vector<86x30xf32> -> vector<86x30xf32>
    %169 = arith.addf %164, %168 : vector<86x30xf32>
    %170 = vector.extract_strided_slice %133 {offsets = [33, 0], sizes = [86, 30], strides = [1, 1]} : vector<120x30xf32> to vector<86x30xf32>
    %c7_92 = arith.constant 7 : index
    %c0_93 = arith.constant 0 : index
    %c0_94 = arith.constant 0 : index
    %171 = vector.load %arg6[%c7_92, %c0_93, %c0_94] : memref<9x30x30xf32, #tpu.memory_space<vmem>>, vector<1x30x30xf32>
    %172 = vector.shape_cast %171 : vector<1x30x30xf32> to vector<30x30xf32>
    %cst_95 = arith.constant dense<0.000000e+00> : vector<86x30xf32>
    %173 = tpu.matmul %170, %172, %cst_95 {dimension_numbers = #tpu.dot_dimension_numbers<[1], [0], [0], [1], [0, 0, 1, 1], [], []>} : vector<86x30xf32>, vector<30x30xf32>, vector<86x30xf32> -> vector<86x30xf32>
    %174 = arith.addf %169, %173 : vector<86x30xf32>
    %175 = vector.extract_strided_slice %133 {offsets = [34, 0], sizes = [86, 30], strides = [1, 1]} : vector<120x30xf32> to vector<86x30xf32>
    %c8_96 = arith.constant 8 : index
    %c0_97 = arith.constant 0 : index
    %c0_98 = arith.constant 0 : index
    %176 = vector.load %arg6[%c8_96, %c0_97, %c0_98] : memref<9x30x30xf32, #tpu.memory_space<vmem>>, vector<1x30x30xf32>
    %177 = vector.shape_cast %176 : vector<1x30x30xf32> to vector<30x30xf32>
    %cst_99 = arith.constant dense<0.000000e+00> : vector<86x30xf32>
    %178 = tpu.matmul %175, %177, %cst_99 {dimension_numbers = #tpu.dot_dimension_numbers<[1], [0], [0], [1], [0, 0, 1, 1], [], []>} : vector<86x30xf32>, vector<30x30xf32>, vector<86x30xf32> -> vector<86x30xf32>
    %179 = arith.addf %174, %178 : vector<86x30xf32>
    %c0_100 = arith.constant 0 : index
    %c0_101 = arith.constant 0 : index
    %180 = vector.load %arg7[%c0_100, %c0_101] : memref<1x30xf32, #tpu.memory_space<vmem>>, vector<1x30xf32>
    %181 = vector.broadcast %180 : vector<1x30xf32> to vector<86x30xf32>
    %182 = arith.addf %179, %181 : vector<86x30xf32>
    %cst_102 = arith.constant 0.000000e+00 : f32
    %183 = vector.broadcast %cst_102 : f32 to vector<86x30xf32>
    %184 = arith.maximumf %182, %183 : vector<86x30xf32>
    %185 = vector.extract_strided_slice %184 {offsets = [0, 0], sizes = [84, 30], strides = [1, 1]} : vector<86x30xf32> to vector<84x30xf32>
    %186 = vector.extract_strided_slice %184 {offsets = [1, 0], sizes = [84, 30], strides = [1, 1]} : vector<86x30xf32> to vector<84x30xf32>
    %187 = arith.maximumf %185, %186 : vector<84x30xf32>
    %188 = vector.extract_strided_slice %184 {offsets = [2, 0], sizes = [84, 30], strides = [1, 1]} : vector<86x30xf32> to vector<84x30xf32>
    %189 = arith.maximumf %187, %188 : vector<84x30xf32>
    %190 = vector.extract_strided_slice %189 {offsets = [0, 0], sizes = [52, 30], strides = [1, 1]} : vector<84x30xf32> to vector<52x30xf32>
    %191 = vector.extract_strided_slice %189 {offsets = [16, 0], sizes = [52, 30], strides = [1, 1]} : vector<84x30xf32> to vector<52x30xf32>
    %192 = arith.maximumf %190, %191 : vector<52x30xf32>
    %193 = vector.extract_strided_slice %189 {offsets = [32, 0], sizes = [52, 30], strides = [1, 1]} : vector<84x30xf32> to vector<52x30xf32>
    %194 = arith.maximumf %192, %193 : vector<52x30xf32>
    %195 = vector.extract_strided_slice %194 {offsets = [0, 0], sizes = [4, 30], strides = [1, 1]} : vector<52x30xf32> to vector<4x30xf32>
    %196 = vector.extract_strided_slice %194 {offsets = [16, 0], sizes = [4, 30], strides = [1, 1]} : vector<52x30xf32> to vector<4x30xf32>
    %197 = vector.extract_strided_slice %194 {offsets = [32, 0], sizes = [4, 30], strides = [1, 1]} : vector<52x30xf32> to vector<4x30xf32>
    %198 = vector.extract_strided_slice %194 {offsets = [48, 0], sizes = [4, 30], strides = [1, 1]} : vector<52x30xf32> to vector<4x30xf32>
    %199 = tpu.concatenate %195, %196, %197, %198 in 0 : vector<4x30xf32>, vector<4x30xf32>, vector<4x30xf32>, vector<4x30xf32> -> vector<16x30xf32>
    %c0_103 = arith.constant 0 : index
    %c0_104 = arith.constant 0 : index
    %200 = vector.load %arg8[%c0_103, %c0_104] : memref<16x30xf32, #tpu.memory_space<vmem>>, vector<16x30xf32>
    tpu.vector_store %arg8[%c0_103, %c0_104], %199 {strides = array<i32>} : memref<16x30xf32, #tpu.memory_space<vmem>>, vector<16x30xf32>,
    return
  }
  func.func @transform_0(%arg0: i32) -> (i32, i32) {
    %c0_i32 = arith.constant 0 : i32
    %c0_i32_0 = arith.constant 0 : i32
    return %arg0, %c0_i32 : i32, i32
  }
  func.func @transform_1(%arg0: i32) -> (i32, i32, i32) {
    %c0_i32 = arith.constant 0 : i32
    %c0_i32_0 = arith.constant 0 : i32
    %c0_i32_1 = arith.constant 0 : i32
    %c0_i32_2 = arith.constant 0 : i32
    return %c0_i32, %c0_i32_0, %c0_i32_1 : i32, i32, i32
  }
  func.func @transform_2(%arg0: i32) -> (i32, i32) {
    %c0_i32 = arith.constant 0 : i32
    %c0_i32_0 = arith.constant 0 : i32
    %c0_i32_1 = arith.constant 0 : i32
    return %c0_i32, %c0_i32_0 : i32, i32
  }
  func.func @transform_3(%arg0: i32) -> (i32, i32, i32) {
    %c0_i32 = arith.constant 0 : i32
    %c0_i32_0 = arith.constant 0 : i32
    %c0_i32_1 = arith.constant 0 : i32
    %c0_i32_2 = arith.constant 0 : i32
    return %c0_i32, %c0_i32_0, %c0_i32_1 : i32, i32, i32
  }
  func.func @transform_4(%arg0: i32) -> (i32, i32) {
    %c0_i32 = arith.constant 0 : i32
    %c0_i32_0 = arith.constant 0 : i32
    %c0_i32_1 = arith.constant 0 : i32
    return %c0_i32, %c0_i32_0 : i32, i32
  }
  func.func @transform_5(%arg0: i32) -> (i32, i32, i32) {
    %c0_i32 = arith.constant 0 : i32
    %c0_i32_0 = arith.constant 0 : i32
    %c0_i32_1 = arith.constant 0 : i32
    %c0_i32_2 = arith.constant 0 : i32
    return %c0_i32, %c0_i32_0, %c0_i32_1 : i32, i32, i32
  }
  func.func @transform_6(%arg0: i32) -> (i32, i32) {
    %c0_i32 = arith.constant 0 : i32
    %c0_i32_0 = arith.constant 0 : i32
    %c0_i32_1 = arith.constant 0 : i32
    return %c0_i32, %c0_i32_0 : i32, i32
  }
  func.func @transform_7(%arg0: i32) -> (i32, i32) {
    %c0_i32 = arith.constant 0 : i32
    %c0_i32_0 = arith.constant 0 : i32
    return %arg0, %c0_i32 : i32, i32
  }
}

</mosaic_0001>

<bundles_post_ra>
// kernel: encoder_forward_nchw.1
= control target key start
LH: loop header
LB: loop body
LE: loop exit
PB: predicated region body
PF: predicated region fallthrough
CT: control target
= control target key end

     0   :  { %12 = vsyncpa [#allocation3], 0  ;;  %s11237_s0 = inlined_call_operand.vmem [shape: f32[512,1], index: 0, kind: input, shape index: {}]   ;;  %s11238_s1 = inlined_call_operand.vmem [shape: f32[9,1,30], index: 1, kind: input, shape index: {}]   ;;  %s11239_s2 = inlined_call_operand.vmem [shape: f32[1,30], index: 2, kind: input, shape index: {}]   ;;  %s11240_s3 = inlined_call_operand.vmem [shape: f32[9,30,30], index: 3, kind: input, shape index: {}]   ;;  %s11241_s4 = inlined_call_operand.vmem [shape: f32[1,30], index: 4, kind: input, shape index: {}]   ;;  %s11242_s5 = inlined_call_operand.hbm [shape: f32[9,30,30], index: 5, kind: input, shape index: {}]   ;;  %s11243_s6 = inlined_call_operand.vmem [shape: f32[1,30], index: 6, kind: input, shape index: {}]   ;;  %s11244_s7 = inlined_call_operand.hbm [shape: f32[32,30], index: 7, kind: output, shape index: {}]  }
   0x1   :  { %13 = vsyncpa [#allocation4], 0 }
   0x2   :  { %15 = vsyncpa [#allocation4 + $0x1], 0  ;;  %s7872_s24 = smov 0   ;;  %s7874_s25 = smov 0  }
   0x3   :  { %s7876_s26 = smov 0   ;;  %s7878_s27 = smov 0  }
   0x4 LB: > { %s7893_s28 = sadd.s32 4294967295, %s7819_s27   ;;  %s5911_s29 = sadd.s32 4294967294, %s7819_s27   ;;  %s7819_s27 = sphi %s7878_s27, %s11583_s27   ;;  %s7815_s26 = sphi %s7876_s26, %s11582_s26   ;;  %s7811_s25 = sphi %s7874_s25, %s11581_s25   ;;  %s7807_s24 = sphi %s7872_s24, %s11580_s24  }
   0x5   : > { %s7897_s30 = sadd.s32 1, %s7819_s27   ;;  %s180_s8 = sadd.s32 1, %s7815_s26 }
   0x6   : > { %s177_s9 = ssub.s32 %s7819_s27, %s7897_s30  ;;  %p190_p0 = scmp.ne.s32.totalorder %s7815_s26, %s7811_s25 }
   0x7   : > { %p178_p1 = scmp.eq.s32.totalorder %s177_s9, 0  ;;  %p191_p2 = scmp.eq.s32.totalorder %s7893_s28, 1 }
   0x8   : > { %p196_p3 = scmp.ne.s32.totalorder %s7811_s25, %s7807_s24  ;;  %p197_p4 = scmp.eq.s32.totalorder %s5911_s29, 1 }
   0x9   : > { %s7908_s10 = scalar_select %p178_p1, %s7815_s26, %s180_s8  }
   0xa   : > { %p7910_p5 = por %p191_p2, %p190_p0  ;;  %p7914_p6 = por %p197_p4, %p196_p3 }
   0xb   : > { %p5912_p7 = scmp.ge.s32.totalorder %s7819_s27, 1  ;;  %p204_p8 = scmp.lt.s32.totalorder %s7819_s27, 3 }
   0xc   : > { %s11330_s11 = scalar_select %p7910_p5, 1, 0 }
   0xd   : > { %s11331_s12 = scalar_select %p7914_p6, 1, 0 }
   0xe   : > { %p11245_p9 = scmp.eq.s32.totalorder %s7893_s28, 0  ;;  %p7921_p10 = pnand %p5912_p7, %p204_p8 }
   0xf   : > { %s7821_s14 = smov [#allocation2]   ;;  %s7725_s19 = scalar_lea.hbm %s11242_s5, 4608 }
  0x10   : > { %s11332_s13 = scalar_select %p7921_p10, 1, 0 }
  0x11   : > { %s228_s15 = sshll.u32 %s7821_s14, 4  ;;  %p7660_p11 = pneg %p7921_p10  ;;  %s229_s15 = int_to_ptr.vmem [resolvable:$true] %s228_s15 }
  0x12   : > { %p7726_p13 = scmp.ne.s32.totalorder %s11242_s5, %s7725_s19  ;;  %p7732_p3 = scmp.lt.u32.totalorder %s7725_s19, %s11242_s5 }
  0x13   : > { %p7929_p12 = pnand %p11245_p9, %p7660_p11 }
  0x15   : > { %p7727_p0 = pneg %p7929_p12 }
  0x17   : > { %p7728_p1 = pnand %p7727_p0, %p7726_p13 }
  0x19   : > { %p7729_p2 = pneg %p7728_p1 }
  0x1b   : > { %p7734_p4 = pnand %p7732_p3, %p7729_p2 }
  0x1d   : > { %7737 = shalt.err (!%p7734_p4)
}
  0x1e   : > { %s7738_s29 = scalar_lea.vmem %s229_s15, 4608  ;;  %p7746_p9 = scmp.lt.s32.totalorder %s229_s15, %s229_s15 }
  0x1f   : > { %p7739_p7 = scmp.ne.s32.totalorder %s229_s15, %s7738_s29  ;;  %p7747_p6 = scmp.lt.s32.totalorder %s7738_s29, %s7738_s29 }
  0x21   : > { %p7741_p8 = pnand %p7739_p7, %p7727_p0  ;;  %p7748_p5 = por %p7747_p6, %p7746_p9 }
  0x23   : > { %p7742_p11 = pneg %p7741_p8 }
  0x25   : > { %p7749_p10 = pnand %p7748_p5, %p7742_p11 }
  0x27   : > { %7752 = shalt.err (!%p7749_p10)
}
  0x28   : > { %s7822_s8 = smov 128   ;;  %s7823_s9 = smov 8  }
  0x29   : > { %7663 = dma.hbm_to_vmem [thread:$0]  (!%p7929_p12), %s11242_s5, 4608, %s229_s15, [#allocation3], %s7822_s8, %s7822_s8, %s7823_s9  }
  0x2a   : > { %p11334_p13 = scmp.ne.s32.totalorder %s11332_s13, 0 }
  0x2c   : > { %256 = sbr.rel (%p11334_p13) target bundleno = 1657 (0x679), region = 48 }
  0x33   : > { %p11335_p1 = scmp.eq.s32.totalorder %s7893_s28, 0 }
  0x35   : > { %7798 = dma.done.wait (%p11335_p1), [#allocation3], 4608   ;;  %p11336_p0 = pmov %p11335_p1 }
  0x36   : > { %s5918_s18 = sshll.u32 %s7893_s28, 5  ;;  %v7824_v0 = vmov 0   ;;  %v7996_v35 = vld [vmem:[%s11238_s1 + $0x1] ss:$0 sm:$0xff]  ;;  %v8001_v36 = vld [vmem:[%s11238_s1 + $0x2] ss:$0 sm:$0xff] }
  0x37   : > { %7800 = vsyncadd (%p11336_p0), [#allocation3], 4294962688  ;;  %7714 = vset.pattern.permute.xlu1 %v7824_v0  ;;  %7713 = vset.pattern.permute.xlu0 %v7824_v0  ;;  %p289_p5 = scmp.lt.s32.totalorder %s5918_s18, 63  ;;  %v8006_v37 = vld [vmem:[%s11238_s1 + $0x4] ss:$0 sm:$0xff]  ;;  %vm770_vm0 = vcmask 1045504  }
  0x38   : > { %v8011_v38 = vld [vmem:[%s11238_s1 + $0x5] ss:$0 sm:$0xff]  ;;  %v8017_v42 = vld [vmem:[%s11238_s1] ss:$0 sm:$0xff]  ;;  %vm594_vm1 = vcmask 1046528   ;;  %vm7825_vm2 = vmmov 1  }
  0x39   : > { %s11585_s18 = smov (!%p289_p5, %s5918_s18), 63  ;;  %vm9042_vm3 = vmpackc.low %vm770_vm0, %vm7825_vm2  ;;  %vm2159_vm4 = vcmask 244736   ;;  %vm7827_vm5 = vmmov 0   ;;  %s285_s29 = sand.u32 1, %s7811_s25   ;;  %vm5818_vm6 = vcmask 1043456  }
  0x3a   : > { %s5919_s16 = sshll.u32 %s11585_s18, 3  ;;  %s5917_s8 = sshll.u32 %s285_s29, 4 }
  0x3b   : > { %s7959_s15 = scalar_lea.vmem %s11237_s0, %s5919_s16  ;;  %s287_s9 = scalar_lea.vmem [#allocation5], %s5917_s8 }
  0x3c   : > { %v297_v1 = vld [vmem:[%s7959_s15 + $0x10] sm:$0xff]  ;;  %v295_v2 = vld [vmem:[%s7959_s15] sm:$0xff]  ;;  %v298_v3 = vld [vmem:[%s7959_s15 + $0x18] sm:$0xff]  ;;  %s6274_s14 = sshll.u32 %s7893_s28, 8  ;;  %s5837_s17 = sshll.u32 %s287_s9, 4  ;;  %s11190_s17 = int_to_ptr.vmem [resolvable:$true] %s5837_s17 }
  0x3d   : > { %339 = vperm.xlu1 %7714, %v297_v1   ;;  %329 = vperm.xlu0 %7713, %v295_v2   ;;  %v296_v4 = vld [vmem:[%s7959_s15 + $0x8] sm:$0xff]  ;;  %v299_v6 = vld [vmem:[%s7959_s15 + $0x20] sm:$0xff]  ;;  %v302_v7 = vld [vmem:[%s7959_s15 + $0x38] sm:$0xff]  ;;  %s11188_s19 = scalar_lea.hbm %s11244_s7, %s6274_s14  ;;  %s11196_s20 = scalar_lea.sflag [#allocation4], %s285_s29 }
  0x3e   : > { %v300_v5 = vld [vmem:[%s7959_s15 + $0x28] sm:$0xff]  ;;  %v301_v8 = vld [vmem:[%s7959_s15 + $0x30] sm:$0xff]  ;;  %v303_v10 = vld [vmem:[%s7959_s15 + $0x40] sm:$0xff]  ;;  %s7753_s28 = scalar_lea.vmem %s11190_s17, 256  ;;  %p11578_p9 = scmp.ne.s32.totalorder %s11330_s11, 0 }
  0x3f   : > { %v304_v9 = vld [vmem:[%s7959_s15 + $0x48] sm:$0xff]  ;;  %v306_v11 = vld [vmem:[%s7959_s15 + $0x58] sm:$0xff]  ;;  %v305_v12 = vld [vmem:[%s7959_s15 + $0x50] sm:$0xff]  ;;  %p7754_p6 = scmp.ne.s32.totalorder %s11190_s17, %s7753_s28 }
  0x40   : > { %v308_v13 = vld [vmem:[%s7959_s15 + $0x68] sm:$0xff]  ;;  %v307_v14 = vld [vmem:[%s7959_s15 + $0x60] sm:$0xff]  ;;  %v310_v15 = vld [vmem:[%s7959_s15 + $0x78] sm:$0xff] }
  0x41   : > { %344 = vperm.xlu1 %7714, %v298_v3   ;;  %334 = vperm.xlu0 %7713, %v296_v4   ;;  %v309_v16 = vld [vmem:[%s7959_s15 + $0x70] sm:$0xff]  ;;  %v312_v17 = vld [vmem:[%s7959_s15 + $0x88] sm:$0xff]  ;;  %v311_v18 = vld [vmem:[%s7959_s15 + $0x80] sm:$0xff]  ;;  %p7755_p10 = pnand %p7754_p6, %p11578_p9 }
  0x42   : > { %v314_v19 = vld [vmem:[%s7959_s15 + $0x98] sm:$0xff]  ;;  %v313_v20 = vld [vmem:[%s7959_s15 + $0x90] sm:$0xff]  ;;  %v316_v21 = vld [vmem:[%s7959_s15 + $0xa8] sm:$0xff] }
  0x43   : > { %v315_v22 = vld [vmem:[%s7959_s15 + $0xa0] sm:$0xff]  ;;  %v318_v23 = vld [vmem:[%s7959_s15 + $0xb8] sm:$0xff]  ;;  %v317_v24 = vld [vmem:[%s7959_s15 + $0xb0] sm:$0xff]  ;;  %p7756_p12 = pneg %p7755_p10 }
  0x44   : > { %v320_v25 = vld [vmem:[%s7959_s15 + $0xc8] sm:$0xff]  ;;  %v319_v26 = vld [vmem:[%s7959_s15 + $0xc0] sm:$0xff]  ;;  %v322_v27 = vld [vmem:[%s7959_s15 + $0xd8] sm:$0xff] }
  0x45   : > { %354 = vperm.xlu1 %7714, %v300_v5   ;;  %349 = vperm.xlu0 %7713, %v299_v6   ;;  %v321_v28 = vld [vmem:[%s7959_s15 + $0xd0] sm:$0xff]  ;;  %v324_v29 = vld [vmem:[%s7959_s15 + $0xe8] sm:$0xff]  ;;  %v323_v30 = vld [vmem:[%s7959_s15 + $0xe0] sm:$0xff] }
  0x46   : > { %v326_v31 = vld [vmem:[%s7959_s15 + $0xf8] sm:$0xff]  ;;  %v325_v32 = vld [vmem:[%s7959_s15 + $0xf0] sm:$0xff]  ;;  %v8045_v3 = vld [vmem:[%s11238_s1 + $0x3] ss:$0 sm:$0xff]  ;;  %s7829_s15 = smov [#allocation5]  }
  0x47   : > { %s7757_s13 = sshll.u32 %s7829_s15, 4  ;;  %s7758_s13 = int_to_ptr.vmem [resolvable:$false] %s7757_s13 }
  0x48   : > { %s7759_s21 = scalar_lea.vmem %s7758_s13, 512  ;;  %p7760_p2 = scmp.lt.s32.totalorder %s11190_s17, %s7758_s13 }
  0x49   : > { %364 = vperm.xlu1 %7714, %v302_v7   ;;  %359 = vperm.xlu0 %7713, %v301_v8   ;;  %p7761_p3 = scmp.lt.s32.totalorder %s7759_s21, %s7753_s28 }
  0x4b   : > { %p7762_p4 = por %p7761_p3, %p7760_p2 }
  0x4d   : > { %374 = vperm.xlu1 %7714, %v304_v9   ;;  %369 = vperm.xlu0 %7713, %v303_v10   ;;  %p7763_p7 = pnand %p7762_p4, %p7756_p12 }
  0x51   : > { %384 = vperm.xlu1 %7714, %v306_v11   ;;  %379 = vperm.xlu0 %7713, %v305_v12  }
  0x55   : > { %394 = vperm.xlu1 %7714, %v308_v13   ;;  %389 = vperm.xlu0 %7713, %v307_v14  }
  0x59   : > { %404 = vperm.xlu1 %7714, %v310_v15   ;;  %399 = vperm.xlu0 %7713, %v309_v16  }
  0x5d   : > { %414 = vperm.xlu1 %7714, %v312_v17   ;;  %409 = vperm.xlu0 %7713, %v311_v18  }
  0x61   : > { %424 = vperm.xlu1 %7714, %v314_v19   ;;  %419 = vperm.xlu0 %7713, %v313_v20  }
  0x65   : > { %434 = vperm.xlu1 %7714, %v316_v21   ;;  %429 = vperm.xlu0 %7713, %v315_v22  }
  0x69   : > { %444 = vperm.xlu1 %7714, %v318_v23   ;;  %439 = vperm.xlu0 %7713, %v317_v24  }
  0x6d   : > { %454 = vperm.xlu1 %7714, %v320_v25   ;;  %449 = vperm.xlu0 %7713, %v319_v26   ;;  %v8073_v26 = vld [vmem:[%s11238_s1 + $0x7] ss:$0 sm:$0xff] }
  0x71   : > { %464 = vperm.xlu1 %7714, %v322_v27   ;;  %459 = vperm.xlu0 %7713, %v321_v28  }
  0x75   : > { %889 = vperm.xlu1 %7714, %v324_v29   ;;  %884 = vperm.xlu0 %7713, %v323_v30   ;;  %v8082_v29 = vld [vmem:[%s11238_s1 + $0x6] ss:$0 sm:$0xff]  ;;  %v8087_v30 = vld [vmem:[%s11238_s1 + $0x8] ss:$0 sm:$0xff] }
  0x79   : > { %1313 = vperm.xlu1 %7714, %v326_v31   ;;  %1308 = vperm.xlu0 %7713, %v325_v32  }
  0xbc   : > { %v340_v33 = vpop.permute.xlu1 %339  ;;  %v330_v34 = vpop.permute.xlu0 %329 }
  0xbd   : > { %v540_v39 = vmul.f32 %v7996_v35, %v340_v33  ;;  %v716_v43 = vmul.f32 %v8001_v36, %v340_v33  ;;  %v538_v44 = vmul.f32 %v7996_v35, %v330_v34  ;;  %v964_v46 = vmul.f32 %v8006_v37, %v340_v33 }
  0xbe   : > { %v1139_v47 = vmul.f32 %v8011_v38, %v340_v33  ;;  %v714_v48 = vmul.f32 %v8001_v36, %v330_v34  ;;  %v476_v54 = vmul.f32 %v8017_v42, %v340_v33  ;;  %v474_v55 = vmul.f32 %v8017_v42, %v330_v34 }
  0xbf   : > { %v598_v49 = vrot.slane %v540_v39, 1  ;;  %v774_v58 = vrot.slane %v716_v43, 2  ;;  %v595_v59 = vrot.slane %v538_v44, 1  ;;  %v1020_v62 = vrot.slane %v964_v46, 1 }
  0xc0   : > { %v345_v40 = vpop.permute.xlu1 %344  ;;  %v335_v41 = vpop.permute.xlu0 %334  ;;  %v1195_v63 = vrot.slane %v1139_v47, 2  ;;  %v771_v0 = vrot.slane %v714_v48, 2  ;;  %v900_v14 = vmul.f32 %v8045_v3, %v340_v33 }
  0xc1   : > { %v8022_v45 = vmul.f32 %v7996_v35, %v345_v40  ;;  %v8029_v51 = vmul.f32 %v8001_v36, %v345_v40  ;;  %v8032_v52 = vmul.f32 %v8006_v37, %v345_v40  ;;  %v539_v53 = vmul.f32 %v7996_v35, %v335_v41 }
  0xc2   : > { %v8038_v56 = vmul.f32 %v8011_v38, %v345_v40  ;;  %v715_v57 = vmul.f32 %v8001_v36, %v335_v41  ;;  %v475_v10 = vmul.f32 %v8017_v42, %v335_v41  ;;  %v477_v19 = vmul.f32 %v8017_v42, %v345_v40 }
  0xc3   : > { %v600_v50 = vrot.slane %v8022_v45, 1  ;;  %v596_v61 = vrot.slane %v539_v53, 1  ;;  %v776_v4 = vrot.slane %v8029_v51, 2  ;;  %v1021_v5 = vrot.slane %v8032_v52, 1 }
  0xc4   : > { %v772_v1 = vrot.slane %v715_v57, 2  ;;  %v355_v2 = vpop.permute.xlu1 %354  ;;  %v11248_v8 = vrot.slane %v8038_v56, 2  ;;  %v350_v18 = vpop.permute.xlu0 %349  ;;  %v901_v21 = vmul.f32 %v8045_v3, %v345_v40 }
  0xc5   : > { %v601_v60 = vsel %vm594_vm1, %v598_v49, %v600_v50  ;;  %v597_v6 = vsel %vm594_vm1, %v595_v59, %v596_v61  ;;  %v599_v7 = vsel %vm594_vm1, %v596_v61, %v598_v49  ;;  %v8055_v13 = vmul.f32 %v7996_v35, %v355_v2 }
  0xc6   : > { %v680_v9 = vadd.f32 %v601_v60, %v476_v54  ;;  %v678_v11 = vadd.f32 %v597_v6, %v474_v55  ;;  %v773_v12 = vsel %vm770_vm0, %v771_v0, %v772_v1  ;;  %v679_v15 = vadd.f32 %v599_v7, %v475_v10 }
  0xc7   : > { %v8059_v17 = vmul.f32 %v8001_v36, %v355_v2  ;;  %v777_v20 = vsel %vm770_vm0, %v774_v58, %v776_v4  ;;  %v1022_v22 = vsel %vm594_vm1, %v1020_v62, %v1021_v5  ;;  %v1197_v24 = vsel %vm770_vm0, %v1195_v63, %v11248_v8 }
  0xc8   : > { %v854_v16 = vadd.f32 %v773_v12, %v678_v11  ;;  %v856_v23 = vadd.f32 %v777_v20, %v680_v9  ;;  %v8076_v27 = vmul.f32 %v8017_v42, %v355_v2  ;;  %v775_v28 = vsel %vm770_vm0, %v772_v1, %v774_v58  ;;  %v365_v58 = vpop.permute.xlu1 %364  ;;  %v360_v10 = vpop.permute.xlu0 %359 }
  0xc9   : > { %v604_v31 = vrot.slane %v8055_v13, 1  ;;  %v542_v32 = vmul.f32 %v7996_v35, %v350_v18  ;;  %v718_v33 = vmul.f32 %v8001_v36, %v350_v18  ;;  %v855_v34 = vadd.f32 %v775_v28, %v679_v15 }
  0xca   : > { %v928_v25 = vadd.f32 %v900_v14, %v854_v16  ;;  %v780_v39 = vrot.slane %v8059_v17, 2  ;;  %v8094_v40 = vmul.f32 %v8006_v37, %v355_v2  ;;  %v966_v41 = vmul.f32 %v8006_v37, %v350_v18 }
  0xcb   : > { %v8098_v43 = vmul.f32 %v8045_v3, %v355_v2  ;;  %v8101_v44 = vmul.f32 %v8011_v38, %v355_v2  ;;  %v8104_v45 = vmul.f32 %v8073_v26, %v355_v2  ;;  %v602_v46 = vrot.slane %v542_v32, 1 }
  0xcc   : > { %v1103_v47 = vadd.f32 %v1022_v22, %v928_v25  ;;  %v8107_v48 = vmul.f32 %v8082_v29, %v355_v2  ;;  %v8110_v49 = vmul.f32 %v8087_v30, %v355_v2  ;;  %v902_v51 = vmul.f32 %v8045_v3, %v350_v18 }
  0xcd   : > { %11337 = vst [vmem:[#allocation8_spill] sm:$0xff] %v8104_v45  ;;  %v603_v53 = vsel %vm594_vm1, %v600_v50, %v602_v46  ;;  %v778_v54 = vrot.slane %v718_v33, 2  ;;  %v8115_v55 = vmul.f32 %v8011_v38, %v350_v18  ;;  %v8118_v57 = vmul.f32 %v8073_v26, %v350_v18 }
  0xce   : > { %11338 = vst [vmem:[#allocation9_spill] sm:$0xff] %v8107_v48  ;;  %11339 = vst [vmem:[#allocation10_spill] sm:$0xff] %v8110_v49  ;;  %v8120_v59 = vadd.f32 %v901_v21, %v855_v34  ;;  %v1025_v60 = vrot.slane %v8094_v40, 1  ;;  %v478_v61 = vmul.f32 %v8017_v42, %v350_v18  ;;  %v1023_v62 = vrot.slane %v966_v41, 1 }
  0xcf   : > { %11340 = vst [vmem:[#allocation11_spill] sm:$0xff] %v8118_v57  ;;  %v605_v50 = vsel %vm594_vm1, %v602_v46, %v604_v31  ;;  %v930_v1 = vadd.f32 %v902_v51, %v856_v23  ;;  %v681_v6 = vadd.f32 %v603_v53, %v477_v19  ;;  %v8129_v7 = vmul.f32 %v8082_v29, %v350_v18 }
  0xd0   : > { %v8132_v9 = vmul.f32 %v7996_v35, %v365_v58  ;;  %v8134_v11 = vadd.f32 %v1197_v24, %v1103_v47  ;;  %v779_v12 = vsel %vm770_vm0, %v776_v4, %v778_v54  ;;  %v682_v15 = vadd.f32 %v605_v50, %v478_v61 }
  0xd1   : > { %11341 = vst [vmem:[#allocation12_spill] sm:$0xff] %v8129_v7  ;;  %v1026_v16 = vsel %vm594_vm1, %v1023_v62, %v1025_v60  ;;  %v8141_v19 = vmul.f32 %v8087_v30, %v350_v18  ;;  %v8144_v20 = vmul.f32 %v8006_v37, %v365_v58  ;;  %v8149_v21 = vsel %vm594_vm1, %v1021_v5, %v1023_v62 }
  0xd2   : > { %11342 = vst [vmem:[#allocation13_spill] sm:$0xff] %v8134_v11  ;;  %v8151_v22 = vadd.f32 %v1026_v16, %v930_v1  ;;  %v8154_v4 = vmul.f32 %v8017_v42, %v365_v58  ;;  %v544_v23 = vmul.f32 %v7996_v35, %v360_v10  ;;  %v8157_v24 = vadd.f32 %v779_v12, %v681_v6 }
  0xd3   : > { %11343 = vst [vmem:[#allocation14_spill] sm:$0xff] %v8141_v19  ;;  %v608_v18 = vrot.slane %v8132_v9, 1  ;;  %v8161_v25 = vmul.f32 %v8001_v36, %v365_v58  ;;  %v720_v28 = vmul.f32 %v8001_v36, %v360_v10  ;;  %v8165_v52 = vmul.f32 %v8045_v3, %v365_v58 }
  0xd4   : > { %v781_v5 = vsel %vm770_vm0, %v778_v54, %v780_v39  ;;  %v606_v32 = vrot.slane %v544_v23, 1  ;;  %v968_v33 = vmul.f32 %v8006_v37, %v360_v10  ;;  %v11249_v40 = vrot.slane %v8144_v20, 1 }
  0xd5   : > { %v8174_v41 = vmul.f32 %v8011_v38, %v365_v58  ;;  %v858_v46 = vadd.f32 %v781_v5, %v682_v15  ;;  %v8177_v47 = vmul.f32 %v8073_v26, %v365_v58  ;;  %v8180_v51 = vmul.f32 %v8087_v30, %v365_v58 }
  0xd6   : > { %v607_v53 = vsel %vm594_vm1, %v604_v31, %v606_v32  ;;  %v904_v54 = vmul.f32 %v8045_v3, %v360_v10  ;;  %v609_v61 = vsel %vm594_vm1, %v606_v32, %v608_v18  ;;  %v782_v62 = vrot.slane %v720_v28, 2  ;;  %v375_v31 = vpop.permute.xlu1 %374 }
  0xd7   : > { %11344 = vst [vmem:[#allocation15_spill] sm:$0xff] %v8177_v47  ;;  %11345 = vst [vmem:[#allocation16_spill] sm:$0xff] %v8180_v51  ;;  %v1027_v50 = vrot.slane %v968_v33, 1  ;;  %v8186_v1 = vmul.f32 %v8011_v38, %v360_v10  ;;  %v480_v6 = vmul.f32 %v8017_v42, %v360_v10  ;;  %v683_v9 = vadd.f32 %v607_v53, %v8076_v27 }
  0xd8   : > { %v8191_v12 = vmul.f32 %v8073_v26, %v360_v10  ;;  %v8194_v15 = vmul.f32 %v8087_v30, %v360_v10  ;;  %v784_v16 = vrot.slane %v8161_v25, 2  ;;  %v11258_v23 = vrot.slane %v8174_v41, 2 }
  0xd9   : > { %11346 = vst [vmem:[#allocation17_spill] sm:$0xff] %v8186_v1  ;;  %v8199_v28 = vmul.f32 %v8082_v29, %v365_v58  ;;  %v932_v5 = vadd.f32 %v904_v54, %v858_v46  ;;  %v684_v27 = vadd.f32 %v609_v61, %v480_v6  ;;  %v8204_v53 = vmul.f32 %v8082_v29, %v360_v10  ;;  %v370_v46 = vpop.permute.xlu0 %369 }
  0xda   : > { %11347 = vst [vmem:[#allocation18_spill] sm:$0xff] %v8191_v12  ;;  %11348 = vst [vmem:[#allocation19_spill] sm:$0xff] %v8194_v15  ;;  %v783_v34 = vsel %vm770_vm0, %v780_v39, %v782_v62  ;;  %v8210_v25 = vsel %vm594_vm1, %v1025_v60, %v1027_v50  ;;  %v11257_v2 = vrot.slane %v8186_v1, 2  ;;  %v8214_v58 = vmul.f32 %v7996_v35, %v375_v31  ;;  %v385_v19 = vpop.permute.xlu1 %384 }
  0xdb   : > { %11349 = vst [vmem:[#allocation20_spill] sm:$0xff] %v8199_v28  ;;  %11350 = vst [vmem:[#allocation21_spill] sm:$0xff] %v8204_v53  ;;  %v859_v54 = vadd.f32 %v783_v34, %v683_v9  ;;  %v1030_v61 = vsel %vm594_vm1, %v1027_v50, %v11249_v40  ;;  %v8222_v39 = vmul.f32 %v8017_v42, %v375_v31 }
  0xdc   : > { %v1107_v6 = vadd.f32 %v1030_v61, %v932_v5  ;;  %v8225_v60 = vmul.f32 %v8001_v36, %v375_v31  ;;  %v8228_v33 = vmul.f32 %v8006_v37, %v375_v31  ;;  %v8231_v34 = vmul.f32 %v8045_v3, %v375_v31 }
  0xdd   : > { %v8234_v9 = vmul.f32 %v8011_v38, %v375_v31  ;;  %v546_v50 = vmul.f32 %v7996_v35, %v370_v46  ;;  %v722_v17 = vmul.f32 %v8001_v36, %v370_v46  ;;  %v8240_v61 = vmul.f32 %v8082_v29, %v375_v31 }
  0xde   : > { %v785_v32 = vsel %vm770_vm0, %v782_v62, %v784_v16  ;;  %v970_v10 = vmul.f32 %v8006_v37, %v370_v46  ;;  %v8245_v14 = vmul.f32 %v8073_v26, %v375_v31  ;;  %v1145_v8 = vmul.f32 %v8011_v38, %v370_v46 }
  0xdf   : > { %11351 = vst [vmem:[#allocation22_spill] sm:$0xff] %v8240_v61  ;;  %v860_v0 = vadd.f32 %v785_v32, %v684_v27  ;;  %v610_v63 = vrot.slane %v546_v50, 1  ;;  %v8251_v5 = vmul.f32 %v8087_v30, %v375_v31  ;;  %v1205_v62 = vsel %vm770_vm0, %v11257_v2, %v11258_v23 }
  0xe0   : > { %11352 = vst [vmem:[#allocation23_spill] sm:$0xff] %v8245_v14  ;;  %v786_v15 = vrot.slane %v722_v17, 2  ;;  %v906_v32 = vmul.f32 %v8045_v3, %v370_v46  ;;  %v1031_v27 = vrot.slane %v970_v10, 1  ;;  %v933_v13 = vadd.f32 %v8165_v52, %v859_v54 }
  0xe1   : > { %11353 = vst [vmem:[#allocation24_spill] sm:$0xff] %v8251_v5  ;;  %v611_v51 = vsel %vm594_vm1, %v608_v18, %v610_v63  ;;  %v1282_v40 = vadd.f32 %v1205_v62, %v1107_v6  ;;  %v8263_v31 = vmul.f32 %v8073_v26, %v370_v46  ;;  %v11355_v49 = vrot.slane %v8214_v58, 1 }
  0xe2   : > { %v685_v2 = vadd.f32 %v611_v51, %v8154_v4  ;;  %v934_v18 = vadd.f32 %v906_v32, %v860_v0  ;;  %v1206_v17 = vrot.slane %v1145_v8, 2  ;;  %v482_v10 = vmul.f32 %v8017_v42, %v370_v46  ;;  %v380_v32 = vpop.permute.xlu0 %379 }
  0xe3   : > { %11354 = vst [vmem:[#allocation25_spill] sm:$0xff] %v8263_v31  ;;  %v613_v28 = vsel %vm594_vm1, %v610_v63, %v11355_v49  ;;  %v1328_v50 = vmul.f32 %v8082_v29, %v370_v46  ;;  %v8273_v52 = vmul.f32 %v8087_v30, %v370_v46  ;;  %v787_v6 = vsel %vm770_vm0, %v784_v16, %v786_v15 }
  0xe4   : > { %v11357_v62 = vrot.slane %v8144_v20, 1  ;;  %v8281_v63 = vmul.f32 %v7996_v35, %v385_v19  ;;  %v686_v8 = vadd.f32 %v613_v28, %v482_v10  ;;  %v11358_v0 = vrot.slane %v8228_v33, 1 }
  0xe5   : > { %11356 = vst [vmem:[#allocation26_spill] sm:$0xff] %v8273_v52  ;;  %v8288_v46 = vadd.f32 %v1328_v50, %v1282_v40  ;;  %v861_v54 = vadd.f32 %v787_v6, %v685_v2  ;;  %v11361_v16 = vrot.slane %v8174_v41, 2  ;;  %v8298_v10 = vmul.f32 %v8017_v42, %v385_v19 }
  0xe6   : > { %v1032_v49 = vsel %vm594_vm1, %v11357_v62, %v1031_v27  ;;  %v1034_v4 = vsel %vm594_vm1, %v1031_v27, %v11358_v0  ;;  %v8304_v40 = vmul.f32 %v8045_v3, %v385_v19  ;;  %v8308_v41 = vmul.f32 %v8006_v37, %v385_v19 }
  0xe7   : > { %v8286_v51 = vadd.f32 %v1032_v49, %v933_v13  ;;  %11360 = vst [vmem:[#allocation28_spill] sm:$0xff] %v8288_v46  ;;  %v1109_v23 = vadd.f32 %v1034_v4, %v934_v18  ;;  %v8293_v20 = vsel %vm770_vm0, %v11361_v16, %v1206_v17  ;;  %v8301_v13 = vmul.f32 %v8001_v36, %v385_v19 }
  0xe8   : > { %11362 = vst [vmem:[#allocation29_spill] sm:$0xff] %v8293_v20  ;;  %v8311_v27 = vmul.f32 %v8011_v38, %v385_v19  ;;  %v548_v50 = vmul.f32 %v7996_v35, %v380_v32  ;;  %v8315_v18 = vmul.f32 %v8082_v29, %v385_v19  ;;  %v11363_v6 = vrot.slane %v8225_v60, 2 }
  0xe9   : > { %11359 = vst [vmem:[#allocation27_spill] sm:$0xff] %v8286_v51  ;;  %v724_v0 = vmul.f32 %v8001_v36, %v380_v32  ;;  %v972_v4 = vmul.f32 %v8006_v37, %v380_v32  ;;  %v8323_v16 = vmul.f32 %v8073_v26, %v385_v19  ;;  %v1147_v2 = vmul.f32 %v8011_v38, %v380_v32 }
  0xea   : > { %v789_v49 = vsel %vm770_vm0, %v786_v15, %v11363_v6  ;;  %v614_v62 = vrot.slane %v548_v50, 1  ;;  %v8328_v52 = vmul.f32 %v8087_v30, %v385_v19  ;;  %v935_v46 = vadd.f32 %v8231_v34, %v861_v54  ;;  %v8343_v34 = vpop.permute.xlu1 %394 }
  0xeb   : > { %11364 = vst [vmem:[#allocation30_spill] sm:$0xff] %v8323_v16  ;;  %v862_v28 = vadd.f32 %v789_v49, %v686_v8  ;;  %v1035_v14 = vrot.slane %v972_v4, 1  ;;  %v11366_v6 = vrot.slane %v8234_v9, 2  ;;  %v11367_v47 = vrot.slane %v8214_v58, 1 }
  0xec   : > { %11365 = vst [vmem:[#allocation31_spill] sm:$0xff] %v8328_v52  ;;  %v908_v50 = vmul.f32 %v8045_v3, %v380_v32  ;;  %v484_v5 = vmul.f32 %v8017_v42, %v380_v32  ;;  %v790_v19 = vrot.slane %v724_v0, 2  ;;  %v8341_v12 = vmul.f32 %v8073_v26, %v380_v32 }
  0xed   : > { %v1209_v31 = vsel %vm770_vm0, %v1206_v17, %v11366_v6  ;;  %v615_v8 = vsel %vm594_vm1, %v11367_v47, %v614_v62  ;;  %v11369_v54 = vrot.slane %v8281_v63, 1  ;;  %v11370_v58 = vrot.slane %v8228_v33, 1 }
  0xee   : > { %v1284_v49 = vadd.f32 %v1209_v31, %v1109_v23  ;;  %11368 = vst [vmem:[#allocation32_spill] sm:$0xff] %v8341_v12  ;;  %v936_v17 = vadd.f32 %v908_v50, %v862_v28  ;;  %v1210_v6 = vrot.slane %v1147_v2, 2  ;;  %v687_v23 = vadd.f32 %v615_v8, %v8222_v39 }
  0xef   : > { %v617_v4 = vsel %vm594_vm1, %v614_v62, %v11369_v54  ;;  %v1036_v47 = vsel %vm594_vm1, %v11370_v58, %v1035_v14  ;;  %v1330_v0 = vmul.f32 %v8082_v29, %v380_v32  ;;  %v8354_v15 = vmul.f32 %v8087_v30, %v380_v32 }
  0xf0   : > { %v1110_v31 = vadd.f32 %v1036_v47, %v935_v46  ;;  %v11278_v57 = vrot.slane %v8311_v27, 2  ;;  %v8361_v33 = vmul.f32 %v7996_v35, %v8343_v34  ;;  %v688_v28 = vadd.f32 %v617_v4, %v484_v5 }
  0xf1   : > { %11371 = vst [vmem:[#allocation33_spill] sm:$0xff] %v8354_v15  ;;  %v11372_v2 = vrot.slane %v8225_v60, 2  ;;  %v11373_v46 = vrot.slane %v8308_v41, 1  ;;  %v8369_v8 = vadd.f32 %v1330_v0, %v1284_v49  ;;  %v11375_v54 = vrot.slane %v8234_v9, 2  ;;  %v390_v60 = vpop.permute.xlu0 %389 }
  0xf2   : > { %v8377_v5 = vmul.f32 %v8073_v26, %v8343_v34  ;;  %v8387_v9 = vmul.f32 %v8001_v36, %v8343_v34  ;;  %v11376_v0 = vrot.slane %v8301_v13, 2  ;;  %v974_v62 = vmul.f32 %v8006_v37, %v390_v60 }
  0xf3   : > { %v791_v39 = vsel %vm770_vm0, %v11372_v2, %v790_v19  ;;  %v1038_v32 = vsel %vm594_vm1, %v1035_v14, %v11373_v46  ;;  %11374 = vst [vmem:[#allocation34_spill] sm:$0xff] %v8369_v8  ;;  %v1211_v58 = vsel %vm770_vm0, %v11375_v54, %v1210_v6  ;;  %v8382_v14 = vmul.f32 %v8017_v42, %v8343_v34 }
  0xf4   : > { %v1111_v50 = vadd.f32 %v1038_v32, %v936_v17  ;;  %v863_v4 = vadd.f32 %v791_v39, %v687_v23  ;;  %v1285_v2 = vadd.f32 %v1211_v58, %v1110_v31  ;;  %v8391_v17 = vmul.f32 %v8045_v3, %v8343_v34 }
  0xf5   : > { %v8395_v23 = vmul.f32 %v8006_v37, %v8343_v34  ;;  %v8399_v31 = vmul.f32 %v8087_v30, %v8343_v34  ;;  %v793_v39 = vsel %vm770_vm0, %v790_v19, %v11376_v0  ;;  %v1213_v46 = vsel %vm770_vm0, %v1210_v6, %v11278_v57 }
  0xf6   : > { %v550_v32 = vmul.f32 %v7996_v35, %v390_v60  ;;  %v1286_v58 = vadd.f32 %v1213_v46, %v1111_v50  ;;  %v1396_v47 = vmul.f32 %v8073_v26, %v390_v60  ;;  %v864_v45 = vadd.f32 %v793_v39, %v688_v28 }
  0xf7   : > { %v726_v15 = vmul.f32 %v8001_v36, %v390_v60  ;;  %v1149_v8 = vmul.f32 %v8011_v38, %v390_v60  ;;  %v1039_v19 = vrot.slane %v974_v62, 1  ;;  %v1332_v0 = vmul.f32 %v8082_v29, %v390_v60 }
  0xf8   : > { %v618_v49 = vrot.slane %v550_v32, 1  ;;  %v1459_v12 = vrot.slane %v1396_v47, 1  ;;  %v1571_v6 = vmul.f32 %v8087_v30, %v390_v60  ;;  %v937_v57 = vadd.f32 %v8304_v40, %v863_v4 }
  0xf9   : > { %v1359_v50 = vadd.f32 %v8315_v18, %v1285_v2  ;;  %v11377_v46 = vrot.slane %v8281_v63, 1  ;;  %v910_v28 = vmul.f32 %v8045_v3, %v390_v60  ;;  %v8424_v62 = vmul.f32 %v8011_v38, %v8343_v34 }
  0xfa   : > { %v1360_v32 = vadd.f32 %v1332_v0, %v1286_v58  ;;  %v11378_v61 = vrot.slane %v8361_v33, 1  ;;  %v794_v18 = vrot.slane %v726_v15, 2  ;;  %v1214_v63 = vrot.slane %v1149_v8, 2  ;;  %v405_v15 = vpop.permute.xlu1 %404 }
  0xfb   : > { %v619_v54 = vsel %vm594_vm1, %v11377_v46, %v618_v49  ;;  %v938_v4 = vadd.f32 %v910_v28, %v864_v45  ;;  %v11379_v46 = vrot.slane %v8308_v41, 1  ;;  %v11380_v53 = vrot.slane %v8323_v16, 1 }
  0xfc   : > { %v621_v40 = vsel %vm594_vm1, %v618_v49, %v11378_v61  ;;  %v689_v2 = vadd.f32 %v619_v54, %v8298_v10  ;;  %v1634_v7 = vrot.slane %v1571_v6, 2  ;;  %v486_v58 = vmul.f32 %v8017_v42, %v390_v60 }
  0xfd   : > { %v1040_v39 = vsel %vm594_vm1, %v11379_v46, %v1039_v19  ;;  %v1460_v48 = vsel %vm594_vm1, %v11380_v53, %v1459_v12  ;;  %v11381_v47 = vrot.slane %v8377_v5, 1  ;;  %v11280_v10 = vrot.slane %v8387_v9, 2 }
  0xfe   : > { %v1112_v0 = vadd.f32 %v1040_v39, %v937_v57  ;;  %v1534_v45 = vadd.f32 %v1460_v48, %v1359_v50  ;;  %v1333_v41 = vmul.f32 %v8082_v29, %v8343_v34  ;;  %v11382_v8 = vrot.slane %v8395_v23, 1 }
  0xff   : > { %v1462_v61 = vsel %vm594_vm1, %v1459_v12, %v11381_v47  ;;  %v11279_v54 = vrot.slane %v8424_v62, 2  ;;  %v690_v60 = vadd.f32 %v621_v40, %v486_v58  ;;  %v11383_v57 = vrot.slane %v8301_v13, 2  ;;  %v400_v47 = vpop.permute.xlu0 %399 }
 0x100   : > { %v1042_v49 = vsel %vm594_vm1, %v1039_v19, %v11382_v8  ;;  %v1535_v53 = vadd.f32 %v1462_v61, %v1360_v32  ;;  %v11384_v50 = vrot.slane %v8311_v27, 2  ;;  %v11385_v34 = vrot.slane %v8328_v52, 2 }
 0x101   : > { %v795_v6 = vsel %vm770_vm0, %v11383_v57, %v794_v18  ;;  %v1113_v12 = vadd.f32 %v1042_v49, %v938_v4  ;;  %v8458_v19 = vmul.f32 %v7996_v35, %v405_v15  ;;  %v11386_v40 = vrot.slane %v8399_v31, 2 }
 0x102   : > { %v865_v48 = vadd.f32 %v795_v6, %v689_v2  ;;  %v1215_v28 = vsel %vm770_vm0, %v11384_v50, %v1214_v63  ;;  %v1635_v39 = vsel %vm770_vm0, %v11385_v34, %v1634_v7  ;;  %v8466_v4 = vmul.f32 %v8017_v42, %v405_v15 }
 0x103   : > { %v1287_v32 = vadd.f32 %v1215_v28, %v1112_v0  ;;  %v1637_v13 = vsel %vm770_vm0, %v1634_v7, %v11386_v40  ;;  %v8463_v46 = vadd.f32 %v1635_v39, %v1534_v45  ;;  %v8469_v2 = vmul.f32 %v8001_v36, %v405_v15 }
 0x104   : > { %v1710_v27 = vadd.f32 %v1637_v13, %v1535_v53  ;;  %v8472_v58 = vmul.f32 %v8045_v3, %v405_v15  ;;  %v8475_v61 = vmul.f32 %v8006_v37, %v405_v15  ;;  %v8478_v0 = vmul.f32 %v8011_v38, %v405_v15 }
 0x105   : > { %11387 = vst [vmem:[#allocation35_spill] sm:$0xff] %v8463_v46  ;;  %v8481_v7 = vmul.f32 %v8073_v26, %v405_v15  ;;  %v1217_v45 = vsel %vm770_vm0, %v1214_v63, %v11279_v54  ;;  %v552_v8 = vmul.f32 %v7996_v35, %v400_v47  ;;  %v8489_v53 = vmul.f32 %v8082_v29, %v405_v15 }
 0x106   : > { %v1288_v57 = vadd.f32 %v1217_v45, %v1113_v12  ;;  %v976_v6 = vmul.f32 %v8006_v37, %v400_v47  ;;  %v8493_v50 = vmul.f32 %v8087_v30, %v405_v15  ;;  %v797_v28 = vsel %vm770_vm0, %v794_v18, %v11280_v10 }
 0x107   : > { %v622_v34 = vrot.slane %v552_v8, 1  ;;  %v1398_v63 = vmul.f32 %v8073_v26, %v400_v47  ;;  %v866_v40 = vadd.f32 %v797_v28, %v690_v60  ;;  %v8501_v13 = vmul.f32 %v8001_v36, %v400_v47 }
 0x108   : > { %v1334_v12 = vmul.f32 %v8082_v29, %v400_v47  ;;  %v1151_v54 = vmul.f32 %v8011_v38, %v400_v47  ;;  %v1573_v49 = vmul.f32 %v8087_v30, %v400_v47  ;;  %v1361_v18 = vadd.f32 %v1333_v41, %v1287_v32 }
 0x109   : > { %v912_v8 = vmul.f32 %v8045_v3, %v400_v47  ;;  %v1043_v10 = vrot.slane %v976_v6, 1  ;;  %v11284_v60 = vrot.slane %v8493_v50, 2  ;;  %v939_v28 = vadd.f32 %v8391_v17, %v865_v48  ;;  %v415_v6 = vpop.permute.xlu1 %414 }
 0x10a   : > { %v1362_v46 = vadd.f32 %v1334_v12, %v1288_v57  ;;  %v11388_v39 = vrot.slane %v8361_v33, 1  ;;  %v1463_v45 = vrot.slane %v1398_v63, 1  ;;  %v488_v15 = vmul.f32 %v8017_v42, %v400_v47  ;;  %v8528_v47 = vld [vmem:[%s11239_s2] ss:$0 sm:$0xff] }
 0x10b   : > { %v11389_v16 = vrot.slane %v8458_v19, 1  ;;  %v798_v41 = vrot.slane %v8501_v13, 2  ;;  %v940_v32 = vadd.f32 %v912_v8, %v866_v40  ;;  %v1218_v57 = vrot.slane %v1151_v54, 2 }
 0x10c   : > { %v623_v52 = vsel %vm594_vm1, %v11388_v39, %v622_v34  ;;  %v11390_v12 = vrot.slane %v8377_v5, 1  ;;  %v11391_v33 = vrot.slane %v8481_v7, 1  ;;  %v1638_v63 = vrot.slane %v1573_v49, 2 }
 0x10d   : > { %v625_v11 = vsel %vm594_vm1, %v622_v34, %v11389_v16  ;;  %v691_v16 = vadd.f32 %v623_v52, %v8382_v14  ;;  %v11392_v34 = vrot.slane %v8395_v23, 1  ;;  %v8535_v40 = vadd.f32 %v8528_v47, %v1710_v27 }
 0x10e   : > { %v1464_v17 = vsel %vm594_vm1, %v11390_v12, %v1463_v45  ;;  %v1466_v48 = vsel %vm594_vm1, %v1463_v45, %v11391_v33  ;;  %v11394_v13 = vrot.slane %v8475_v61, 1  ;;  %v8541_v8 = vmul.f32 %v7996_v35, %v415_v6 }
 0x10f   : > { %v1044_v54 = vsel %vm594_vm1, %v11392_v34, %v1043_v10  ;;  %v1536_v39 = vadd.f32 %v1464_v17, %v1361_v18  ;;  %v1537_v5 = vadd.f32 %v1466_v48, %v1362_v46  ;;  %11393 = vst [vmem:[#allocation36_spill] sm:$0xff] %v8535_v40  ;;  %v11283_v12 = vrot.slane %v8478_v0, 2 }
 0x110   : > { %v1046_v49 = vsel %vm594_vm1, %v1043_v10, %v11394_v13  ;;  %v1114_v45 = vadd.f32 %v1044_v54, %v939_v28  ;;  %v692_v52 = vadd.f32 %v625_v11, %v488_v15  ;;  %v11395_v14 = vrot.slane %v8387_v9, 2 }
 0x111   : > { %v1115_v18 = vadd.f32 %v1046_v49, %v940_v32  ;;  %v11396_v46 = vrot.slane %v8399_v31, 2  ;;  %v1641_v10 = vsel %vm770_vm0, %v1638_v63, %v11284_v60  ;;  %v8554_v28 = vmul.f32 %v8001_v36, %v415_v6  ;;  %v410_v31 = vpop.permute.xlu0 %409 }
 0x112   : > { %v799_v23 = vsel %vm770_vm0, %v11395_v14, %v798_v41  ;;  %v8557_v17 = vmul.f32 %v8006_v37, %v415_v6  ;;  %v11397_v9 = vrot.slane %v8424_v62, 2  ;;  %v1712_v33 = vadd.f32 %v1641_v10, %v1537_v5 }
 0x113   : > { %v1639_v27 = vsel %vm770_vm0, %v11396_v46, %v1638_v63  ;;  %v867_v11 = vadd.f32 %v799_v23, %v691_v16  ;;  %v8563_v34 = vmul.f32 %v8017_v42, %v415_v6  ;;  %v8567_v54 = vmul.f32 %v8045_v3, %v415_v6 }
 0x114   : > { %v1219_v15 = vsel %vm770_vm0, %v11397_v9, %v1218_v57  ;;  %v1711_v32 = vadd.f32 %v1639_v27, %v1536_v39  ;;  %v8570_v13 = vmul.f32 %v8011_v38, %v415_v6  ;;  %v8573_v16 = vmul.f32 %v8082_v29, %v415_v6 }
 0x115   : > { %v1289_v48 = vadd.f32 %v1219_v15, %v1114_v45  ;;  %v8576_v62 = vmul.f32 %v8073_v26, %v415_v6  ;;  %v1221_v39 = vsel %vm770_vm0, %v1218_v57, %v11283_v12  ;;  %v554_v14 = vmul.f32 %v7996_v35, %v410_v31 }
 0x116   : > { %v1290_v45 = vadd.f32 %v1221_v39, %v1115_v18  ;;  %v1746_v23 = vadd.f32 %v8528_v47, %v1711_v32  ;;  %v1747_v46 = vadd.f32 %v8528_v47, %v1712_v33  ;;  %v8587_v27 = vmul.f32 %v8087_v30, %v415_v6 }
 0x117   : > { %v978_v10 = vmul.f32 %v8006_v37, %v410_v31  ;;  %v11398_v9 = vrot.slane %v8469_v2, 2  ;;  %v626_v15 = vrot.slane %v554_v14, 1  ;;  %v1336_v5 = vmul.f32 %v8082_v29, %v410_v31 }
 0x118   : > { %v1400_v18 = vmul.f32 %v8073_v26, %v410_v31  ;;  %v1363_v32 = vadd.f32 %v8489_v53, %v1289_v48  ;;  %v730_v33 = vmul.f32 %v8001_v36, %v410_v31  ;;  %v1575_v6 = vmul.f32 %v8087_v30, %v410_v31 }
 0x119   : > { %v801_v57 = vsel %vm770_vm0, %v798_v41, %v11398_v9  ;;  %v1047_v12 = vrot.slane %v978_v10, 1  ;;  %v1153_v49 = vmul.f32 %v8011_v38, %v410_v31  ;;  %v1364_v60 = vadd.f32 %v1336_v5, %v1290_v45 }
 0x11a   : > { %v1467_v63 = vrot.slane %v1400_v18, 1  ;;  %v868_v9 = vadd.f32 %v801_v57, %v692_v52  ;;  %v941_v40 = vadd.f32 %v8472_v58, %v867_v11  ;;  %v8603_v1 = vmax.f32 %v1746_v23, 0.0  ;;  %v425_v58 = vpop.permute.xlu1 %424 }
 0x11b   : > { %v11400_v53 = vrot.slane %v8458_v19, 1  ;;  %v914_v39 = vmul.f32 %v8045_v3, %v410_v31  ;;  %v11401_v10 = vrot.slane %v8481_v7, 1  ;;  %v802_v45 = vrot.slane %v730_v33, 2 }
 0x11c   : > { %11399 = vst [vmem:[#allocation37_spill] sm:$0xff] %v8603_v1  ;;  %v11402_v18 = vrot.slane %v8576_v62, 1  ;;  %v1642_v57 = vrot.slane %v1575_v6, 2  ;;  %v11403_v11 = vrot.slane %v8541_v8, 1  ;;  %v11404_v23 = vrot.slane %v8475_v61, 1 }
 0x11d   : > { %v627_v48 = vsel %vm594_vm1, %v11400_v53, %v626_v15  ;;  %v1468_v5 = vsel %vm594_vm1, %v11401_v10, %v1467_v63  ;;  %v1222_v14 = vrot.slane %v1153_v49, 2  ;;  %v490_v10 = vmul.f32 %v8017_v42, %v410_v31 }
 0x11e   : > { %v1470_v41 = vsel %vm594_vm1, %v1467_v63, %v11402_v18  ;;  %v1538_v52 = vadd.f32 %v1468_v5, %v1363_v32  ;;  %v629_v19 = vsel %vm594_vm1, %v626_v15, %v11403_v11  ;;  %v1048_v53 = vsel %vm594_vm1, %v11404_v23, %v1047_v12 }
 0x11f   : > { %v1539_v7 = vadd.f32 %v1470_v41, %v1364_v60  ;;  %v693_v33 = vadd.f32 %v627_v48, %v8466_v4  ;;  %v942_v1 = vadd.f32 %v914_v39, %v868_v9  ;;  %v1116_v20 = vadd.f32 %v1048_v53, %v941_v40 }
 0x120   : > { %v8623_v63 = vmax.f32 %v1747_v46, 0.0  ;;  %v11406_v32 = vrot.slane %v8493_v50, 2  ;;  %v8629_v15 = vmul.f32 %v7996_v35, %v425_v58  ;;  %v8632_v61 = vmul.f32 %v8001_v36, %v425_v58 }
 0x121   : > { %v694_v49 = vadd.f32 %v629_v19, %v490_v10  ;;  %v11407_v60 = vrot.slane %v8469_v2, 2  ;;  %v11408_v4 = vrot.slane %v8587_v27, 2  ;;  %v11409_v50 = vrot.slane %v8557_v17, 1  ;;  %v420_v2 = vpop.permute.xlu0 %419 }
 0x122   : > { %11405 = vst [vmem:[#allocation38_spill] sm:$0xff] %v8623_v63  ;;  %v1643_v6 = vsel %vm770_vm0, %v11406_v32, %v1642_v57  ;;  %v11410_v41 = vrot.slane %v8478_v0, 2  ;;  %v8647_v5 = vmul.f32 %v8006_v37, %v425_v58  ;;  %v8650_v23 = vmul.f32 %v8011_v38, %v425_v58 }
 0x123   : > { %v803_v31 = vsel %vm770_vm0, %v11407_v60, %v802_v45  ;;  %v1645_v40 = vsel %vm770_vm0, %v1642_v57, %v11408_v4  ;;  %v1713_v46 = vadd.f32 %v1643_v6, %v1538_v52  ;;  %v1050_v39 = vsel %vm594_vm1, %v1047_v12, %v11409_v50 }
 0x124   : > { %v1223_v9 = vsel %vm770_vm0, %v11410_v41, %v1222_v14  ;;  %v1714_v48 = vadd.f32 %v1645_v40, %v1539_v7  ;;  %v869_v18 = vadd.f32 %v803_v31, %v693_v33  ;;  %v1117_v11 = vadd.f32 %v1050_v39, %v942_v1 }
 0x125   : > { %v1291_v19 = vadd.f32 %v1223_v9, %v1116_v20  ;;  %v8653_v52 = vmul.f32 %v8017_v42, %v425_v58  ;;  %v8658_v57 = vmul.f32 %v8045_v3, %v425_v58  ;;  %v1748_v53 = vadd.f32 %v8528_v47, %v1713_v46 }
 0x126   : > { %v8662_v7 = vmul.f32 %v8082_v29, %v425_v58  ;;  %v8665_v1 = vmul.f32 %v8073_v26, %v425_v58  ;;  %v556_v20 = vmul.f32 %v7996_v35, %v420_v2  ;;  %v1749_v10 = vadd.f32 %v8528_v47, %v1714_v48 }
 0x127   : > { %v8671_v32 = vmul.f32 %v8087_v30, %v425_v58  ;;  %v980_v6 = vmul.f32 %v8006_v37, %v420_v2  ;;  %v11411_v31 = vrot.slane %v8570_v13, 2  ;;  %v1402_v46 = vmul.f32 %v8073_v26, %v420_v2 }
 0x128   : > { %v630_v40 = vrot.slane %v556_v20, 1  ;;  %v11412_v50 = vrot.slane %v8554_v28, 2  ;;  %v732_v9 = vmul.f32 %v8001_v36, %v420_v2  ;;  %v1155_v58 = vmul.f32 %v8011_v38, %v420_v2 }
 0x129   : > { %v1225_v4 = vsel %vm770_vm0, %v1222_v14, %v11411_v31  ;;  %v1051_v60 = vrot.slane %v980_v6, 1  ;;  %v1577_v33 = vmul.f32 %v8087_v30, %v420_v2  ;;  %v8686_v12 = vmax.f32 %v1748_v53, 0.0 }
 0x12a   : > { %v805_v39 = vsel %vm770_vm0, %v802_v45, %v11412_v50  ;;  %v1292_v41 = vadd.f32 %v1225_v4, %v1117_v11  ;;  %v943_v14 = vadd.f32 %v8567_v54, %v869_v18  ;;  %v1365_v20 = vadd.f32 %v8573_v16, %v1291_v19  ;;  %v435_v18 = vpop.permute.xlu1 %434 }
 0x12b   : > { %v870_v0 = vadd.f32 %v805_v39, %v694_v49  ;;  %11413 = vst [vmem:[#allocation39_spill] sm:$0xff] %v8686_v12  ;;  %v1338_v31 = vmul.f32 %v8082_v29, %v420_v2  ;;  %v492_v45 = vmul.f32 %v8017_v42, %v420_v2  ;;  %v11414_v11 = vrot.slane %v8541_v8, 1 }
 0x12c   : > { %v916_v50 = vmul.f32 %v8045_v3, %v420_v2  ;;  %v1471_v49 = vrot.slane %v1402_v46, 1  ;;  %v11415_v6 = vrot.slane %v8629_v15, 1  ;;  %v806_v39 = vrot.slane %v732_v9, 2 }
 0x12d   : > { %v631_v4 = vsel %vm594_vm1, %v11414_v11, %v630_v40  ;;  %v1226_v48 = vrot.slane %v1155_v58, 2  ;;  %v1366_v54 = vadd.f32 %v1338_v31, %v1292_v41  ;;  %v11416_v19 = vrot.slane %v8557_v17, 1 }
 0x12e   : > { %v633_v53 = vsel %vm594_vm1, %v630_v40, %v11415_v6  ;;  %v944_v16 = vadd.f32 %v916_v50, %v870_v0  ;;  %v11417_v8 = vrot.slane %v8576_v62, 1  ;;  %v1646_v63 = vrot.slane %v1577_v33, 2 }
 0x12f   : > { %v1052_v12 = vsel %vm594_vm1, %v11416_v19, %v1051_v60  ;;  %v8705_v2 = vmax.f32 %v1749_v10, 0.0  ;;  %v695_v46 = vadd.f32 %v631_v4, %v8563_v34  ;;  %v1648_v9 = vrot.slane %v8671_v32, 2 }
 0x130   : > { %v1472_v11 = vsel %vm594_vm1, %v11417_v8, %v1471_v49  ;;  %v1118_v51 = vadd.f32 %v1052_v12, %v943_v14  ;;  %v696_v41 = vadd.f32 %v633_v53, %v492_v45  ;;  %v11419_v0 = vrot.slane %v8665_v1, 1 }
 0x131   : > { %11418 = vst [vmem:[#allocation40_spill] sm:$0xff] %v8705_v2  ;;  %v1540_v40 = vadd.f32 %v1472_v11, %v1365_v20  ;;  %v8713_v58 = vmul.f32 %v7996_v35, %v435_v18  ;;  %v11420_v62 = vrot.slane %v8554_v28, 2  ;;  %v11421_v10 = vrot.slane %v8647_v5, 1 }
 0x132   : > { %v1474_v17 = vsel %vm594_vm1, %v1471_v49, %v11419_v0  ;;  %v11422_v12 = vrot.slane %v8570_v13, 2  ;;  %v11423_v45 = vrot.slane %v8587_v27, 2  ;;  %v8728_v35 = vmul.f32 %v8001_v36, %v435_v18  ;;  %v430_v13 = vpop.permute.xlu0 %429 }
 0x133   : > { %v807_v33 = vsel %vm770_vm0, %v11420_v62, %v806_v39  ;;  %v1054_v34 = vsel %vm594_vm1, %v1051_v60, %v11421_v10  ;;  %v1541_v20 = vadd.f32 %v1474_v17, %v1366_v54  ;;  %v8731_v28 = vmul.f32 %v8006_v37, %v435_v18  ;;  %v8773_v62 = vld [vmem:[%s11238_s1 + $0x4] ss:$0 sm:$0xff] }
 0x134   : > { %v1227_v14 = vsel %vm770_vm0, %v11422_v12, %v1226_v48  ;;  %v1119_v31 = vadd.f32 %v1054_v34, %v944_v16  ;;  %v1647_v4 = vsel %vm770_vm0, %v11423_v45, %v1646_v63  ;;  %v871_v50 = vadd.f32 %v807_v33, %v695_v46  ;;  %v8760_v46 = vld [vmem:[%s11238_s1 + $0x1] ss:$0 sm:$0xff] }
 0x135   : > { %v1293_v49 = vadd.f32 %v1227_v14, %v1118_v51  ;;  %v1715_v6 = vadd.f32 %v1647_v4, %v1540_v40  ;;  %v8734_v60 = vmul.f32 %v8017_v42, %v435_v18  ;;  %v1649_v53 = vsel %vm770_vm0, %v1646_v63, %v1648_v9  ;;  %11425 = vst [vmem:[#allocation41_spill] sm:$0xff] %v8760_v46 }
 0x136   : > { %v11293_v27 = vrot.slane %v8713_v58, 1  ;;  %v8741_v54 = vmul.f32 %v8045_v3, %v435_v18  ;;  %v8744_v36 = vmul.f32 %v8073_v26, %v435_v18  ;;  %v1716_v37 = vadd.f32 %v1649_v53, %v1541_v20 }
 0x137   : > { %v8747_v51 = vmul.f32 %v8011_v38, %v435_v18  ;;  %v8750_v42 = vmul.f32 %v8082_v29, %v435_v18  ;;  %v11424_v16 = vrot.slane %v8650_v23, 2  ;;  %v11291_v8 = vrot.slane %v8731_v28, 1 }
 0x138   : > { %v558_v38 = vmul.f32 %v8760_v46, %v430_v13  ;;  %v1750_v40 = vadd.f32 %v8528_v47, %v1715_v6  ;;  %v8765_v0 = vmul.f32 %v8087_v30, %v435_v18  ;;  %v11426_v17 = vrot.slane %v8632_v61, 2 }
 0x139   : > { %v1229_v19 = vsel %vm770_vm0, %v1226_v48, %v11424_v16  ;;  %v982_v33 = vmul.f32 %v8773_v62, %v430_v13  ;;  %v11292_v10 = vrot.slane %v8744_v36, 1  ;;  %v1340_v12 = vmul.f32 %v8082_v29, %v430_v13  ;;  %v8792_v29 = vld [vmem:[%s11238_s1 + $0x5] ss:$0 sm:$0xff] }
 0x13a   : > { %v1294_v11 = vadd.f32 %v1229_v19, %v1119_v31  ;;  %v809_v48 = vsel %vm770_vm0, %v806_v39, %v11426_v17  ;;  %v634_v34 = vrot.slane %v558_v38, 1  ;;  %v1404_v14 = vmul.f32 %v8073_v26, %v430_v13  ;;  %v8783_v39 = vld [vmem:[%s11238_s1 + $0x2] ss:$0 sm:$0xff] }
 0x13b   : > { %v872_v18 = vadd.f32 %v809_v48, %v696_v41  ;;  %v1367_v20 = vadd.f32 %v8662_v7, %v1293_v49  ;;  %11427 = vst [vmem:[#allocation42_spill] sm:$0xff] %v8783_v39  ;;  %v8786_v31 = vmul.f32 %v8783_v39, %v430_v13  ;;  %v1579_v45 = vmul.f32 %v8087_v30, %v430_v13 }
 0x13c   : > { %v1055_v4 = vrot.slane %v982_v33, 1  ;;  %v1157_v26 = vmul.f32 %v8792_v29, %v430_v13  ;;  %v1368_v41 = vadd.f32 %v1340_v12, %v1294_v11  ;;  %v1475_v7 = vrot.slane %v1404_v14, 1 }
 0x13d   : > { %v1751_v49 = vadd.f32 %v8528_v47, %v1716_v37  ;;  %v11289_v6 = vrot.slane %v8747_v51, 2  ;;  %v11290_v53 = vrot.slane %v8765_v0, 2  ;;  %v945_v16 = vadd.f32 %v8658_v57, %v871_v50  ;;  %v445_v50 = vpop.permute.xlu1 %444 }
 0x13e   : > { %v8799_v19 = vmax.f32 %v1750_v40, 0.0  ;;  %v11429_v30 = vrot.slane %v8629_v15, 1  ;;  %v918_v17 = vmul.f32 %v8045_v3, %v430_v13  ;;  %v11430_v48 = vrot.slane %v8665_v1, 1 }
 0x13f   : > { %v810_v37 = vrot.slane %v8786_v31, 2  ;;  %v1478_v33 = vsel %vm594_vm1, %v1475_v7, %v11292_v10  ;;  %v1650_v57 = vrot.slane %v1579_v45, 2  ;;  %v11431_v15 = vrot.slane %v8647_v5, 1  ;;  %v5938_v10 = vld [vmem:[%s11240_s3 + $0x20] sm:$0xff] }
 0x140   : > { %11428 = vst [vmem:[#allocation43_spill] sm:$0xff] %v8799_v19  ;;  %v635_v38 = vsel %vm594_vm1, %v11429_v30, %v634_v34  ;;  %v1476_v11 = vsel %vm594_vm1, %v11430_v48, %v1475_v7  ;;  %v946_v40 = vadd.f32 %v918_v17, %v872_v18  ;;  %v1230_v30 = vrot.slane %v1157_v26, 2  ;;  %v440_v17 = vpop.permute.xlu0 %439 }
 0x141   : > { %v1542_v12 = vadd.f32 %v1476_v11, %v1367_v20  ;;  %v1056_v14 = vsel %vm594_vm1, %v11431_v15, %v1055_v4  ;;  %v1543_v3 = vadd.f32 %v1478_v33, %v1368_v41  ;;  %v8815_v63 = vmax.f32 %v1751_v49, 0.0  ;;  %v8824_v20 = vld [vmem:[%s11238_s1] ss:$0 sm:$0xff] }
 0x142   : > { %v637_v1 = vsel %vm594_vm1, %v634_v34, %v11293_v27  ;;  %v697_v31 = vadd.f32 %v635_v38, %v8653_v52  ;;  %v1120_v48 = vadd.f32 %v1056_v14, %v945_v16  ;;  %11433 = vst [vmem:[#allocation45_spill] sm:$0xff] %v8824_v20  ;;  %v494_v5 = vmul.f32 %v8824_v20, %v430_v13 }
 0x143   : > { %11432 = vst [vmem:[#allocation44_spill] sm:$0xff] %v8815_v63  ;;  %v1651_v18 = vsel %vm770_vm0, %v1648_v9, %v1650_v57  ;;  %v8831_v45 = vmul.f32 %v8760_v46, %v445_v50  ;;  %v8834_v26 = vmul.f32 %v8783_v39, %v445_v50  ;;  %v11434_v52 = vrot.slane %v8632_v61, 2 }
 0x144   : > { %v1058_v41 = vsel %vm594_vm1, %v1055_v4, %v11291_v8  ;;  %v1653_v32 = vsel %vm770_vm0, %v1650_v57, %v11290_v53  ;;  %v1717_v13 = vadd.f32 %v1651_v18, %v1542_v12  ;;  %v698_v9 = vadd.f32 %v637_v1, %v494_v5  ;;  %v8884_v18 = vld [vmem:[%s11238_s1 + $0x6] ss:$0 sm:$0xff] }
 0x145   : > { %v811_v34 = vsel %vm770_vm0, %v11434_v52, %v810_v37  ;;  %v1121_v7 = vadd.f32 %v1058_v41, %v946_v40  ;;  %v11435_v49 = vrot.slane %v8650_v23, 2  ;;  %v1718_v38 = vadd.f32 %v1653_v32, %v1543_v3  ;;  %v8859_v23 = vld [vmem:[%s11238_s1 + $0x3] ss:$0 sm:$0xff]  ;;  %v8871_v3 = vld [vmem:[%s11238_s1 + $0x7] ss:$0 sm:$0xff]  ;;  %11437 = vst [vmem:[#allocation47_spill] sm:$0xff] %v8884_v18 }
 0x146   : > { %v873_v61 = vadd.f32 %v811_v34, %v697_v31  ;;  %v8849_v33 = vmul.f32 %v8824_v20, %v445_v50  ;;  %v8852_v4 = vmul.f32 %v8773_v62, %v445_v50  ;;  %11436 = vst [vmem:[#allocation46_spill] sm:$0xff] %v8859_v23  ;;  %v8862_v57 = vmul.f32 %v8859_v23, %v445_v50  ;;  %v8892_v34 = vld [vmem:[%s11238_s1 + $0x8] ss:$0 sm:$0xff] }
 0x147   : > { %v1231_v16 = vsel %vm770_vm0, %v11435_v49, %v1230_v30  ;;  %v8865_v40 = vmul.f32 %v8792_v29, %v445_v50  ;;  %v1752_v14 = vadd.f32 %v8528_v47, %v1717_v13  ;;  %v8874_v1 = vmul.f32 %v8871_v3, %v445_v50 }
 0x148   : > { %v1295_v11 = vadd.f32 %v1231_v16, %v1120_v48  ;;  %v1233_v31 = vsel %vm770_vm0, %v1230_v30, %v11289_v6  ;;  %v560_v48 = vmul.f32 %v8760_v46, %v440_v17  ;;  %v1753_v5 = vadd.f32 %v8528_v47, %v1718_v38 }
 0x149   : > { %v8887_v52 = vmul.f32 %v8884_v18, %v445_v50  ;;  %v8895_v41 = vmul.f32 %v8892_v34, %v445_v50  ;;  %v1296_v30 = vadd.f32 %v1233_v31, %v1121_v7  ;;  %v8899_v13 = vmul.f32 %v8783_v39, %v440_v17 }
 0x14a   : > { %v984_v49 = vmul.f32 %v8773_v62, %v440_v17  ;;  %v1406_v16 = vmul.f32 %v8871_v3, %v440_v17  ;;  %v638_v12 = vrot.slane %v560_v48, 1  ;;  %v1342_v6 = vmul.f32 %v8884_v18, %v440_v17  ;;  %v5939_v48 = vld [vmem:[%s11240_s3 + $0x28] sm:$0xff] }
 0x14b   : > { %v1581_v53 = vmul.f32 %v8892_v34, %v440_v17  ;;  %v8906_v8 = vmax.f32 %v1752_v14, 0.0  ;;  %v11439_v7 = vrot.slane %v8728_v35, 2  ;;  %v947_v32 = vadd.f32 %v8741_v54, %v873_v61 }
 0x14c   : > { %v1369_v14 = vadd.f32 %v8750_v42, %v1295_v11  ;;  %v1159_v50 = vmul.f32 %v8792_v29, %v440_v17  ;;  %v1370_v15 = vadd.f32 %v1342_v6, %v1296_v30  ;;  %v1479_v54 = vrot.slane %v1406_v16, 1 }
 0x14d   : > { %11438 = vst [vmem:[#allocation48_spill] sm:$0xff] %v8906_v8  ;;  %v813_v31 = vsel %vm770_vm0, %v810_v37, %v11439_v7  ;;  %v814_v37 = vrot.slane %v8899_v13, 2  ;;  %v1059_v7 = vrot.slane %v984_v49, 1  ;;  %v11440_v61 = vrot.slane %v8713_v58, 1  ;;  %v8937_v13 = vpop.permute.xlu1 %454 }
 0x14e   : > { %v874_v27 = vadd.f32 %v813_v31, %v698_v9  ;;  %v11441_v63 = vrot.slane %v8831_v45, 1  ;;  %v1654_v2 = vrot.slane %v1581_v53, 2  ;;  %v7337_v38 = vpack.c.bf16 %v5939_v48, %v5938_v10  ;;  %11444 = vst [vmem:[#allocation49_spill] sm:$0xff] %v8937_v13 }
 0x14f   : > { %v639_v8 = vsel %vm594_vm1, %v11440_v61, %v638_v12  ;;  %v496_v42 = vmul.f32 %v8824_v20, %v440_v17  ;;  %v920_v11 = vmul.f32 %v8859_v23, %v440_v17  ;;  %v11442_v6 = vrot.slane %v8744_v36, 1 }
 0x150   : > { %v641_v19 = vsel %vm594_vm1, %v638_v12, %v11441_v63  ;;  %v11443_v30 = vrot.slane %v8874_v1, 1  ;;  %v8939_v49 = vmax.f32 %v1753_v5, 0.0  ;;  %v1234_v16 = vrot.slane %v1159_v50, 2  ;;  %7338 = vmatprep.subr.bf16.mxu0 %v7337_v38 }
 0x151   : > { %v1480_v9 = vsel %vm594_vm1, %v11442_v6, %v1479_v54  ;;  %v699_v10 = vadd.f32 %v639_v8, %v8734_v60  ;;  %v700_v12 = vadd.f32 %v641_v19, %v496_v42  ;;  %v948_v17 = vadd.f32 %v920_v11, %v874_v27  ;;  %7340 = vmatpush3.bf16.msra.mxu0 %v7337_v38  ;;  %v450_v42 = vpop.permute.xlu0 %449 }
 0x152   : > { %v1482_v58 = vsel %vm594_vm1, %v1479_v54, %v11443_v30  ;;  %11445 = vst [vmem:[#allocation50_spill] sm:$0xff] %v8939_v49  ;;  %v1544_v63 = vadd.f32 %v1480_v9, %v1369_v14  ;;  %v11446_v36 = vrot.slane %v8731_v28, 1  ;;  %v11447_v48 = vrot.slane %v8728_v35, 2  ;;  %v11499_v49 = vld [vmem:[#allocation28_spill] sm:$0xff] }
 0x153   : > { %v1545_v53 = vadd.f32 %v1482_v58, %v1370_v15  ;;  %v11448_v5 = vrot.slane %v8765_v0, 2  ;;  %v8953_v15 = vmul.f32 %v8760_v46, %v8937_v13  ;;  %v11449_v60 = vrot.slane %v8895_v41, 2 }
 0x154   : > { %v1060_v31 = vsel %vm594_vm1, %v11446_v36, %v1059_v7  ;;  %v815_v54 = vsel %vm770_vm0, %v11447_v48, %v814_v37  ;;  %v8960_v8 = vmul.f32 %v8783_v39, %v8937_v13  ;;  %v8964_v35 = vmul.f32 %v8773_v62, %v8937_v13 }
 0x155   : > { %v1122_v61 = vadd.f32 %v1060_v31, %v947_v32  ;;  %v1655_v50 = vsel %vm770_vm0, %v11448_v5, %v1654_v2  ;;  %v1657_v28 = vsel %vm770_vm0, %v1654_v2, %v11449_v60  ;;  %v11451_v0 = vrot.slane %v8852_v4, 1  ;;  %v5941_v60 = vld [vmem:[%s11240_s3 + $0x38] sm:$0x3f] }
 0x156   : > { %v1719_v27 = vadd.f32 %v1655_v50, %v1544_v63  ;;  %11450 = vst [vmem:[#allocation51_spill] sm:$0xff] %v8964_v35  ;;  %v11452_v32 = vrot.slane %v8747_v51, 2  ;;  %v1720_v14 = vadd.f32 %v1657_v28, %v1545_v53  ;;  %v8974_v2 = vmul.f32 %v8792_v29, %v8937_v13  ;;  %v5940_v50 = vld [vmem:[%s11240_s3 + $0x30] sm:$0xff] }
 0x157   : > { %v1062_v19 = vsel %vm594_vm1, %v1059_v7, %v11451_v0  ;;  %v875_v11 = vadd.f32 %v815_v54, %v699_v10  ;;  %v8978_v9 = vmul.f32 %v8871_v3, %v8937_v13  ;;  %v8982_v30 = vmul.f32 %v8892_v34, %v8937_v13 }
 0x158   : > { %v1235_v38 = vsel %vm770_vm0, %v11452_v32, %v1234_v16  ;;  %v1123_v6 = vadd.f32 %v1062_v19, %v948_v17  ;;  %v8987_v58 = vmul.f32 %v8859_v23, %v8937_v13  ;;  %v8991_v63 = vmul.f32 %v8884_v18, %v8937_v13 }
 0x159   : > { %11453 = vst [vmem:[#allocation52_spill] sm:$0xff] %v8978_v9  ;;  %v1297_v7 = vadd.f32 %v1235_v38, %v1122_v61  ;;  %v1754_v53 = vadd.f32 %v8528_v47, %v1719_v27  ;;  %v11298_v17 = vrot.slane %v8964_v35, 1  ;;  %v8997_v36 = vmul.f32 %v8760_v46, %v450_v42 }
 0x15a   : > { %v9000_v31 = vadd.f32 %v8528_v47, %v1720_v14  ;;  %v11454_v54 = vrot.slane %v8834_v26, 2  ;;  %v986_v5 = vmul.f32 %v8773_v62, %v450_v42  ;;  %v11300_v28 = vrot.slane %v8978_v9, 1 }
 0x15b   : > { %v11455_v0 = vrot.slane %v8865_v40, 2  ;;  %v9022_v14 = vmul.f32 %v8792_v29, %v450_v42  ;;  %v9026_v10 = vadd.f32 %v8862_v57, %v875_v11  ;;  %v11299_v48 = vrot.slane %v8997_v36, 1  ;;  %v11466_v57 = vld [vmem:[#allocation27_spill] sm:$0xff] }
 0x15c   : > { %v817_v61 = vsel %vm770_vm0, %v814_v37, %v11454_v54  ;;  %v9019_v37 = vmul.f32 %v8783_v39, %v450_v42  ;;  %v1408_v54 = vmul.f32 %v8871_v3, %v450_v42  ;;  %v9030_v51 = vmul.f32 %v8892_v34, %v450_v42 }
 0x15d   : > { %v1237_v19 = vsel %vm770_vm0, %v1234_v16, %v11455_v0  ;;  %v876_v32 = vadd.f32 %v817_v61, %v700_v12  ;;  %v7341_v27 = vpack.c.bf16 %v5941_v60, %v5940_v50  ;;  %v922_v16 = vmul.f32 %v8859_v23, %v450_v42 }
 0x15e   : > { %v1298_v38 = vadd.f32 %v1237_v19, %v1123_v6  ;;  %v1063_v0 = vrot.slane %v986_v5, 1  ;;  %v1344_v12 = vmul.f32 %v8884_v18, %v450_v42  ;;  %v9034_v6 = vmax.f32 %v1754_v53, 0.0 }
 0x15f   : > { %v1371_v61 = vadd.f32 %v8887_v52, %v1297_v7  ;;  %v9038_v19 = vmul.f32 %v8824_v20, %v450_v42  ;;  %v11457_v11 = vmov 0  ;;  %v9046_v50 = vadd.f32 %v922_v16, %v876_v32  ;;  %7343 = vmatprep.subr.msk.bf16.mxu0 %vm9042_vm3, %v7341_v27  ;;  %v11478_v7 = vld [vmem:[#allocation11_spill] sm:$0xff]  ;;  %v11501_v20 = vld [vmem:[#allocation10_spill] sm:$0xff] }
 0x160   : > { %11456 = vst [vmem:[#allocation53_spill] sm:$0xff] %v9034_v6  ;;  %v11458_v11 = vsel %vm9042_vm3, 4294967295, %v11457_v11  ;;  %v9049_v60 = vadd.f32 %v1344_v12, %v1298_v38  ;;  %v1483_v53 = vrot.slane %v1408_v54, 1  ;;  %v11460_v52 = vrot.slane %v8831_v45, 1  ;;  %7346 = vmatpush3.bf16.msk.msra.mxu0 %vm9042_vm3, %v7341_v27  ;;  %v11480_v6 = vld [vmem:[#allocation18_spill] sm:$0xff] }
 0x161   : > { %11459 = vst [vmem:[#allocation54_spill] sm:$0xff] %v11458_v11  ;;  %v931_v32 = vadd.f32 %v8098_v43, %v8157_v24  ;;  %v1104_v38 = vadd.f32 %v8149_v21, %v8120_v59  ;;  %v11461_v54 = vrot.slane %v8852_v4, 1  ;;  %v9075_v45 = vsel %vm594_vm1, %v1063_v0, %v11298_v17 }
 0x162   : > { %v9058_v42 = vsel %vm594_vm1, %v11460_v52, %v11299_v48  ;;  %v11462_v12 = vrot.slane %v8115_v55, 2  ;;  %v11463_v27 = vrot.slane %v8038_v56, 2  ;;  %v11464_v43 = vrot.slane %v8101_v44, 2  ;;  %v11469_v55 = vld [vmem:[#allocation17_spill] sm:$0xff] }
 0x163   : > { %v9070_v16 = vsel %vm594_vm1, %v11461_v54, %v1063_v0  ;;  %v1106_v24 = vadd.f32 %v8210_v25, %v931_v32  ;;  %v11467_v0 = vld [vmem:[#allocation29_spill] sm:$0xff]  ;;  %v11468_v48 = vrot.slane %v8874_v1, 1  ;;  %v11502_v39 = vrot.slane %v11501_v20, 2 }
 0x164   : > { %v1199_v52 = vsel %vm770_vm0, %v11463_v27, %v11462_v12  ;;  %v11465_v59 = vmov %v11462_v12  ;;  %v1283_v17 = vadd.f32 %v11467_v0, %v11466_v57  ;;  %v9097_v12 = vsel %vm594_vm1, %v1483_v53, %v11300_v28  ;;  %v11471_v32 = vld [vmem:[#allocation13_spill] sm:$0xff] }
 0x165   : > { %v1201_v21 = vsel %vm770_vm0, %v11465_v59, %v11464_v43  ;;  %v1279_v4 = vadd.f32 %v1199_v52, %v1104_v38  ;;  %v1484_v56 = vsel %vm594_vm1, %v11468_v48, %v1483_v53  ;;  %v11470_v27 = vrot.slane %v11469_v55, 2  ;;  %v11473_v57 = vld [vmem:[#allocation9_spill] sm:$0xff]  ;;  %v11475_v48 = vld [vmem:[#allocation22_spill] sm:$0xff]  ;;  %v11476_v53 = vld [vmem:[#allocation8_spill] sm:$0xff] }
 0x166   : > { %v1280_v54 = vadd.f32 %v1201_v21, %v8151_v22  ;;  %v11472_v22 = vld [vmem:[#allocation12_spill] sm:$0xff]  ;;  %v11474_v1 = vld [vmem:[#allocation21_spill] sm:$0xff]  ;;  %v1357_v0 = vadd.f32 %v11475_v48, %v1283_v17  ;;  %v9109_v5 = vadd.f32 %v1484_v56, %v1371_v61  ;;  %v11477_v28 = vrot.slane %v11476_v53, 1 }
 0x167   : > { %v1203_v25 = vsel %vm770_vm0, %v11464_v43, %v11470_v27  ;;  %v1352_v38 = vadd.f32 %v11472_v22, %v11471_v32  ;;  %v1353_v59 = vadd.f32 %v11473_v57, %v1279_v4  ;;  %v11479_v55 = vrot.slane %v11478_v7, 1  ;;  %v11486_v61 = vld [vmem:[#allocation20_spill] sm:$0xff]  ;;  %v11487_v32 = vld [vmem:[#allocation25_spill] sm:$0xff]  ;;  %v11490_v57 = vld [vmem:[#allocation23_spill] sm:$0xff] }
 0x168   : > { %v1281_v52 = vadd.f32 %v1203_v25, %v1106_v24  ;;  %v1354_v21 = vadd.f32 %v11474_v1, %v1280_v54  ;;  %v11481_v27 = vrot.slane %v11480_v6, 1  ;;  %v11482_v43 = vmov %v11477_v28  ;;  %v11483_v25 = vld [vmem:[#allocation15_spill] sm:$0xff] }
 0x169   : > { %v1446_v44 = vsel %vm594_vm1, %v11479_v55, %v11477_v28  ;;  %v11484_v4 = vrot.slane %v11483_v25, 1  ;;  %v11488_v22 = vrot.slane %v11487_v32, 1  ;;  %v11491_v1 = vrot.slane %v11490_v57, 1  ;;  %v11493_v55 = vld [vmem:[#allocation32_spill] sm:$0xff]  ;;  %v11503_v57 = vld [vmem:[#allocation14_spill] sm:$0xff] }
 0x16a   : > { %v1448_v24 = vsel %vm594_vm1, %v11482_v43, %v11481_v27  ;;  %v11485_v54 = vmov %v11481_v27  ;;  %v1355_v56 = vadd.f32 %v11486_v61, %v1281_v52  ;;  %v11494_v27 = vrot.slane %v11493_v55, 1 }
 0x16b   : > { %v1450_v17 = vsel %vm594_vm1, %v11485_v54, %v11484_v4  ;;  %v11489_v7 = vmov %v11484_v4  ;;  %v11492_v48 = vmov %v11488_v22  ;;  %v11495_v6 = vmov %v11491_v1  ;;  %v11496_v4 = vld [vmem:[#allocation30_spill] sm:$0xff] }
 0x16c   : > { %v1452_v28 = vsel %vm594_vm1, %v11489_v7, %v11488_v22  ;;  %v1454_v53 = vsel %vm594_vm1, %v11492_v48, %v11491_v1  ;;  %v1456_v43 = vsel %vm594_vm1, %v11495_v6, %v11494_v27  ;;  %v11497_v52 = vrot.slane %v11496_v4, 1  ;;  %v11500_v1 = vld [vmem:[#allocation34_spill] sm:$0xff]  ;;  %v11505_v6 = vld [vmem:[#allocation19_spill] sm:$0xff] }
 0x16d   : > { %v11498_v54 = vmov %v11494_v27  ;;  %v1527_v61 = vadd.f32 %v1446_v44, %v1352_v38  ;;  %v1528_v22 = vadd.f32 %v1448_v24, %v1353_v59  ;;  %v1529_v7 = vadd.f32 %v1450_v17, %v1354_v21  ;;  %v11508_v59 = vld [vmem:[#allocation16_spill] sm:$0xff] }
 0x16e   : > { %v1458_v25 = vsel %vm594_vm1, %v11498_v54, %v11497_v52  ;;  %v1530_v11 = vadd.f32 %v1452_v28, %v1355_v56  ;;  %v1531_v32 = vadd.f32 %v1454_v53, %v11499_v49  ;;  %v1532_v13 = vadd.f32 %v1456_v43, %v1357_v0  ;;  %v11511_v0 = vld [vmem:[#allocation26_spill] sm:$0xff]  ;;  %v11514_v28 = vld [vmem:[#allocation24_spill] sm:$0xff]  ;;  %v11517_v53 = vld [vmem:[#allocation33_spill] sm:$0xff] }
 0x16f   : > { %v1533_v48 = vadd.f32 %v1458_v25, %v11500_v1  ;;  %v11504_v46 = vrot.slane %v11503_v57, 2  ;;  %v11506_v4 = vrot.slane %v11505_v6, 2  ;;  %v11507_v55 = vmov %v11502_v39  ;;  %v11520_v25 = vld [vmem:[#allocation31_spill] sm:$0xff] }
 0x170   : > { %v11509_v21 = vrot.slane %v11508_v59, 2  ;;  %v11512_v24 = vrot.slane %v11511_v0, 2  ;;  %v11518_v43 = vrot.slane %v11517_v53, 2  ;;  %v11521_v1 = vrot.slane %v11520_v25, 2 }
 0x171   : > { %v1621_v27 = vsel %vm770_vm0, %v11504_v46, %v11502_v39  ;;  %v1623_v38 = vsel %vm770_vm0, %v11507_v55, %v11506_v4  ;;  %v11510_v44 = vmov %v11506_v4  ;;  %v11515_v46 = vrot.slane %v11514_v28, 2 }
 0x172   : > { %v1625_v49 = vsel %vm770_vm0, %v11510_v44, %v11509_v21  ;;  %v11513_v17 = vmov %v11509_v21  ;;  %v11516_v39 = vmov %v11512_v24  ;;  %v11522_v57 = vmov %v11518_v43 }
 0x173   : > { %v1627_v56 = vsel %vm770_vm0, %v11513_v17, %v11512_v24  ;;  %v1629_v20 = vsel %vm770_vm0, %v11516_v39, %v11515_v46  ;;  %v11519_v52 = vmov %v11515_v46  ;;  %v1633_v6 = vsel %vm770_vm0, %v11522_v57, %v11521_v1  ;;  %v11523_v46 = vld [vmem:[#allocation35_spill] sm:$0xff] }
 0x174   : > { %v1631_v54 = vsel %vm770_vm0, %v11519_v52, %v11518_v43  ;;  %v1702_v4 = vadd.f32 %v1621_v27, %v1527_v61  ;;  %v1703_v55 = vadd.f32 %v1623_v38, %v1528_v22  ;;  %v1704_v59 = vadd.f32 %v1625_v49, %v1529_v7 }
 0x175   : > { %v1705_v21 = vadd.f32 %v1627_v56, %v1530_v11  ;;  %v1706_v44 = vadd.f32 %v1629_v20, %v1531_v32  ;;  %v1707_v0 = vadd.f32 %v1631_v54, %v1532_v13  ;;  %v1708_v24 = vadd.f32 %v1633_v6, %v1533_v48  ;;  %v11524_v56 = vld [vmem:[#allocation36_spill] sm:$0xff] }
 0x176   : > { %v1737_v17 = vadd.f32 %v8528_v47, %v1702_v4  ;;  %v1744_v28 = vadd.f32 %v8528_v47, %v11523_v46  ;;  %v1738_v39 = vadd.f32 %v8528_v47, %v1703_v55  ;;  %v1739_v43 = vadd.f32 %v8528_v47, %v1704_v59 }
 0x177   : > { %v1740_v53 = vadd.f32 %v8528_v47, %v1705_v21  ;;  %v1741_v52 = vadd.f32 %v8528_v47, %v1706_v44  ;;  %v1742_v61 = vadd.f32 %v8528_v47, %v1707_v0  ;;  %v1743_v11 = vadd.f32 %v8528_v47, %v1708_v24 }
 0x178   : > { %v1765_v22 = vmax.f32 %v1737_v17, 0.0  ;;  %v1772_v13 = vmax.f32 %v1744_v28, 0.0  ;;  %v1766_v7 = vmax.f32 %v1738_v39, 0.0  ;;  %v1767_v32 = vmax.f32 %v1739_v43, 0.0 }
 0x179   : > { %v1768_v48 = vmax.f32 %v1740_v53, 0.0  ;;  %v1769_v27 = vmax.f32 %v1741_v52, 0.0  ;;  %v1770_v38 = vmax.f32 %v1742_v61, 0.0  ;;  %v1771_v49 = vmax.f32 %v1743_v11, 0.0 }
 0x17a   : > { %v9194_v20 = vmax.f32 %v11524_v56, 0.0  ;;  %v1821_v54 = vrot.slane %v1765_v22, 1  ;;  %v1822_v25 = vrot.slane %v1766_v7, 1  ;;  %v1824_v1 = vrot.slane %v1767_v32, 1 }
 0x17b   : > { %v1826_v57 = vrot.slane %v1768_v48, 1  ;;  %v1828_v6 = vrot.slane %v1769_v27, 1  ;;  %v1830_v4 = vrot.slane %v1770_v38, 1  ;;  %v1832_v55 = vrot.slane %v1771_v49, 1 }
 0x17c   : > { %v1834_v59 = vrot.slane %v1772_v13, 1  ;;  %v1836_v21 = vrot.slane %v9194_v20, 1  ;;  %v1823_v44 = vsel %vm594_vm1, %v1821_v54, %v1822_v25  ;;  %v1825_v0 = vsel %vm594_vm1, %v1822_v25, %v1824_v1 }
 0x17d   : > { %v1827_v24 = vsel %vm594_vm1, %v1824_v1, %v1826_v57  ;;  %v1829_v17 = vsel %vm594_vm1, %v1826_v57, %v1828_v6  ;;  %v1547_v46 = vadd.f32 %v9097_v12, %v9049_v60  ;;  %v1831_v28 = vsel %vm594_vm1, %v1828_v6, %v1830_v4 }
 0x17e   : > { %v1833_v39 = vsel %vm594_vm1, %v1830_v4, %v1832_v55  ;;  %v1835_v43 = vsel %vm594_vm1, %v1832_v55, %v1834_v59  ;;  %v1837_v53 = vsel %vm594_vm1, %v1834_v59, %v1836_v21  ;;  %v1904_v52 = vmax.f32 %v1765_v22, %v1823_v44 }
 0x17f   : > { %v1905_v61 = vmax.f32 %v1766_v7, %v1825_v0  ;;  %v1906_v11 = vmax.f32 %v1767_v32, %v1827_v24  ;;  %v1907_v56 = vmax.f32 %v1768_v48, %v1829_v17  ;;  %v1908_v54 = vmax.f32 %v1769_v27, %v1831_v28 }
 0x180   : > { %v1909_v25 = vmax.f32 %v1770_v38, %v1833_v39  ;;  %v1910_v1 = vmax.f32 %v1771_v49, %v1835_v43  ;;  %v1932_v57 = vrot.slane %v1765_v22, 2  ;;  %v1933_v18 = vrot.slane %v1766_v7, 2 }
 0x181   : > { %v1935_v60 = vrot.slane %v1767_v32, 2  ;;  %v1937_v12 = vrot.slane %v1768_v48, 2  ;;  %v1939_v6 = vrot.slane %v1769_v27, 2  ;;  %v1941_v35 = vrot.slane %v1770_v38, 2 }
 0x182   : > { %v1943_v4 = vrot.slane %v1771_v49, 2  ;;  %v1945_v23 = vrot.slane %v1772_v13, 2  ;;  %v1911_v55 = vmax.f32 %v1772_v13, %v1837_v53  ;;  %v1934_v9 = vsel %vm770_vm0, %v1932_v57, %v1933_v18 }
 0x183   : > { %v1936_v59 = vsel %vm770_vm0, %v1933_v18, %v1935_v60  ;;  %v1947_v44 = vrot.slane %v9194_v20, 2  ;;  %v1938_v0 = vsel %vm770_vm0, %v1935_v60, %v1937_v12  ;;  %v1940_v24 = vsel %vm770_vm0, %v1937_v12, %v1939_v6 }
 0x184   : > { %v1942_v22 = vsel %vm770_vm0, %v1939_v6, %v1941_v35  ;;  %v1944_v7 = vsel %vm770_vm0, %v1941_v35, %v1943_v4  ;;  %v1946_v32 = vsel %vm770_vm0, %v1943_v4, %v1945_v23  ;;  %v2015_v48 = vmax.f32 %v1904_v52, %v1934_v9 }
 0x185   : > { %v1948_v13 = vsel %vm770_vm0, %v1945_v23, %v1947_v44  ;;  %v2017_v27 = vmax.f32 %v1906_v11, %v1938_v0  ;;  %v2016_v38 = vmax.f32 %v1905_v61, %v1936_v59  ;;  %v2018_v18 = vmax.f32 %v1907_v56, %v1940_v24  ;;  %v9233_v23 = vpop.permute.xlu0 %459 }
 0x186   : > { %v9220_v49 = vmax.f32 %v1908_v54, %v1942_v22  ;;  %v9222_v17 = vmax.f32 %v1909_v25, %v1944_v7  ;;  %v11525_v28 = vrot.slane %v9030_v51, 2  ;;  %v11526_v39 = vrot.slane %v8895_v41, 2  ;;  %v2091_v54 = vld [vmem:[%s11240_s3] sm:$0xff]  ;;  %v2092_v25 = vld [vmem:[%s11240_s3 + $0x8] sm:$0xff] }
 0x187   : > { %v9229_v43 = vmax.f32 %v1910_v1, %v1946_v32  ;;  %v9231_v53 = vmax.f32 %v1911_v55, %v1948_v13  ;;  %v2043_v57 = vmax.f32 %v2015_v48, %v2017_v27  ;;  %v1124_v9 = vadd.f32 %v9070_v16, %v9026_v10 }
 0x188   : > { %v1659_v35 = vsel %vm770_vm0, %v11526_v39, %v11525_v28  ;;  %v11527_v52 = vrot.slane %v9022_v14, 2  ;;  %v11528_v61 = vrot.slane %v8865_v40, 2  ;;  %v2044_v56 = vmax.f32 %v2016_v38, %v2018_v18 }
 0x189   : > { %v1721_v41 = vadd.f32 %v1659_v35, %v9109_v5  ;;  %v11529_v1 = vrot.slane %v8982_v30, 2  ;;  %v11530_v10 = vmov %v11525_v28  ;;  %v2045_v40 = vmax.f32 %v2017_v27, %v9220_v49  ;;  %v9292_v28 = vpop.permute.xlu1 %464 }
 0x18a   : > { %v1239_v11 = vsel %vm770_vm0, %v11528_v61, %v11527_v52  ;;  %v2046_v60 = vmax.f32 %v2018_v18, %v9222_v17  ;;  %v9257_v5 = vmax.f32 %v2043_v57, %v9220_v49  ;;  %v1125_v12 = vadd.f32 %v9075_v45, %v9046_v50 }
 0x18b   : > { %v1661_v16 = vsel %vm770_vm0, %v11530_v10, %v11529_v1  ;;  %v9262_v4 = vmax.f32 %v2044_v56, %v9222_v17  ;;  %v9266_v55 = vmul.f32 %v8871_v3, %v9233_v23  ;;  %v7347_v59 = vpack.c.bf16 %v2092_v25, %v2091_v54 }
 0x18c   : > { %v1722_v6 = vadd.f32 %v1661_v16, %v1547_v46  ;;  %v2120_v51 = vrot.slane %v9257_v5, 1  ;;  %v9270_v0 = vmax.f32 %v2045_v40, %v9229_v43  ;;  %v9273_v24 = vmax.f32 %v2046_v60, %v9231_v53 }
 0x18d   : > { %v1299_v22 = vadd.f32 %v1239_v11, %v1124_v9  ;;  %v9276_v50 = vadd.f32 %v8528_v47, %v1721_v41  ;;  %v2121_v45 = vrot.slane %v9262_v4, 1  ;;  %7348 = vmatprep.subr.bf16.mxu0 %v7347_v59  ;;  %v11531_v32 = vrot.slane %v8953_v15, 1 }
 0x18e   : > { %v2123_v46 = vrot.slane %v9270_v0, 1  ;;  %v2125_v7 = vrot.slane %v9273_v24, 1  ;;  %v11532_v13 = vrot.slane %v8997_v36, 1  ;;  %v701_v27 = vadd.f32 %v9058_v42, %v8849_v33 }
 0x18f   : > { %v9289_v38 = vadd.f32 %v8528_v47, %v1722_v6  ;;  %v2122_v18 = vsel %vm594_vm1, %v2120_v51, %v2121_v45  ;;  %v9296_v39 = vmul.f32 %v8892_v34, %v9233_v23  ;;  %v1487_v36 = vrot.slane %v9266_v55, 1  ;;  %v11539_v6 = vld [vmem:[#allocation52_spill] sm:$0xff] }
 0x190   : > { %v645_v48 = vsel %vm594_vm1, %v11532_v13, %v11531_v32  ;;  %6634 = vmatprep.mubr.msk.f32.mxu0 %vm2159_vm4, %v2122_v18  ;;  %v2124_v57 = vsel %vm594_vm1, %v2121_v45, %v2123_v46  ;;  %v9305_v47 = vsel %vm594_vm1, %v2123_v46, %v2125_v7  ;;  %v11533_v33 = vrot.slane %v9019_v37, 2  ;;  %v11542_v45 = vld [vmem:[#allocation51_spill] sm:$0xff] }
 0x191   : > { %v702_v35 = vadd.f32 %v645_v48, %v9038_v19  ;;  %v11534_v42 = vrot.slane %v8834_v26, 2  ;;  %v2047_v19 = vmax.f32 %v9220_v49, %v9229_v43  ;;  %v11535_v52 = vrot.slane %v8974_v2, 2  ;;  %6635 = vmatmul.mubr.msk.f32.vlgmr.msra.gmra.mrb[0].mxu0 %vm2159_vm4, %v2124_v57  ;;  %v9358_v57 = vpop.permute.xlu0 %884 }
 0x192   : > { %v11536_v61 = vrot.slane %v9022_v14, 2  ;;  %v988_v56 = vmul.f32 %v8773_v62, %v9233_v23  ;;  %v9323_v54 = vmax.f32 %v9000_v31, 0.0  ;;  %v1373_v26 = vadd.f32 %v8991_v63, %v1299_v22  ;;  %7350 = vmatpush3.bf16.msra.mxu0 %v7347_v59  ;;  %6637 = vmatprep.mubr.msk.f32.mxu0 %vm2159_vm4, %v9305_v47  ;;  %v11541_v59 = vld [vmem:[#allocation46_spill] sm:$0xff] }
 0x193   : > { %v819_v9 = vsel %vm770_vm0, %v11534_v42, %v11533_v33  ;;  %v11537_v25 = vrot.slane %v8960_v8, 2  ;;  %v11538_v14 = vmov %v11533_v33  ;;  %v9335_v10 = vmul.f32 %v8773_v62, %v9292_v28 }
 0x194   : > { %v1241_v11 = vsel %vm770_vm0, %v11536_v61, %v11535_v52  ;;  %v877_v41 = vadd.f32 %v819_v9, %v701_v27  ;;  %v1067_v40 = vrot.slane %v988_v56, 1  ;;  %v1163_v63 = vmul.f32 %v8792_v29, %v9233_v23  ;;  %v11545_v61 = vld [vmem:[#allocation37_spill] sm:$0xff]  ;;  %v11546_v56 = vld [vmem:[#allocation47_spill] sm:$0xff] }
 0x195   : > { %v821_v1 = vsel %vm770_vm0, %v11538_v14, %v11537_v25  ;;  %v2048_v60 = vmax.f32 %v9222_v17, %v9231_v53  ;;  %v11540_v55 = vrot.slane %v11539_v6, 1  ;;  %v1662_v51 = vrot.slane %v9296_v39, 2 }
 0x196   : > { %v878_v16 = vadd.f32 %v821_v1, %v702_v35  ;;  %v951_v31 = vadd.f32 %v8987_v58, %v877_v41  ;;  %v924_v22 = vmul.f32 %v11541_v59, %v9233_v23  ;;  %v11543_v46 = vrot.slane %v11542_v45, 1 }
 0x197   : > { %v1488_v37 = vsel %vm594_vm1, %v11540_v55, %v1487_v36  ;;  %v9353_v32 = vmul.f32 %v8792_v29, %v9292_v28  ;;  %v1242_v13 = vrot.slane %v1163_v63, 2  ;;  %v1411_v48 = vmul.f32 %v8871_v3, %v9292_v28 }
 0x198   : > { %v1068_v58 = vsel %vm594_vm1, %v11543_v46, %v1067_v40  ;;  %v1300_v27 = vadd.f32 %v1241_v11, %v1125_v12  ;;  %v1548_v18 = vadd.f32 %v1488_v37, %v1373_v26  ;;  %v11323_v35 = vrot.slane %v9335_v10, 1 }
 0x199   : > { %v1126_v39 = vadd.f32 %v1068_v58, %v951_v31  ;;  %v952_v33 = vadd.f32 %v924_v22, %v878_v16  ;;  %v11544_v42 = vmov %v11535_v52  ;;  %v1586_v52 = vmul.f32 %v8892_v34, %v9292_v28  ;;  %v9389_v58 = vpop.permute.xlu1 %889 }
 0x19a   : > { %v1243_v9 = vsel %vm770_vm0, %v11544_v42, %v1242_v13  ;;  %v1838_v41 = vrot.slane %v11545_v61, 1  ;;  %v1346_v25 = vmul.f32 %v11546_v56, %v9233_v23  ;;  %v11547_v12 = vrot.slane %v8982_v30, 2 }
 0x19b   : > { %v1301_v26 = vadd.f32 %v1243_v9, %v1126_v39  ;;  %v1347_v14 = vmul.f32 %v11546_v56, %v9292_v28  ;;  %v11321_v2 = vrot.slane %v9353_v32, 2  ;;  %v1489_v1 = vrot.slane %v1411_v48, 1  ;;  %v11548_v39 = vld [vmem:[#allocation38_spill] sm:$0xff] }
 0x19c   : > { %v1663_v11 = vsel %vm770_vm0, %v11547_v12, %v1662_v51  ;;  %v9376_v16 = vmul.f32 %v8871_v3, %v9358_v57  ;;  %v9380_v31 = vmul.f32 %v8892_v34, %v9358_v57  ;;  %v1374_v63 = vadd.f32 %v1346_v25, %v1300_v27 }
 0x19d   : > { %v1723_v6 = vadd.f32 %v1663_v11, %v1548_v18  ;;  %v1070_v30 = vsel %vm594_vm1, %v1067_v40, %v11323_v35  ;;  %v1375_v55 = vadd.f32 %v1347_v14, %v1301_v26  ;;  %v1664_v22 = vrot.slane %v1586_v52, 2  ;;  %v11549_v14 = vld [vmem:[#allocation41_spill] sm:$0xff] }
 0x19e   : > { %v1127_v37 = vadd.f32 %v1070_v30, %v952_v33  ;;  %v11324_v45 = vrot.slane %v9376_v16, 1  ;;  %v1839_v46 = vsel %vm594_vm1, %v1836_v21, %v1838_v41  ;;  %v11322_v48 = vrot.slane %v9380_v31, 2 }
 0x19f   : > { %v1912_v27 = vmax.f32 %v9194_v20, %v1839_v46  ;;  %v1949_v18 = vrot.slane %v11545_v61, 2  ;;  %v11320_v42 = vrot.slane %v11548_v39, 1  ;;  %v1245_v40 = vsel %vm770_vm0, %v1242_v13, %v11321_v2 }
 0x1a0   : > { %v1490_v33 = vsel %vm594_vm1, %v1487_v36, %v1489_v1  ;;  %v1492_v21 = vsel %vm594_vm1, %v1489_v1, %v11324_v45  ;;  %v11319_v9 = vrot.slane %v11548_v39, 2  ;;  %v9411_v13 = vmul.f32 %v8773_v62, %v9358_v57 }
 0x1a1   : > { %v1549_v52 = vadd.f32 %v1490_v33, %v1374_v63  ;;  %v1550_v25 = vadd.f32 %v1492_v21, %v1375_v55  ;;  %v1950_v12 = vsel %vm770_vm0, %v1947_v44, %v1949_v18  ;;  %v1841_v11 = vsel %vm594_vm1, %v1838_v41, %v11320_v42  ;;  %v11550_v41 = vld [vmem:[#allocation42_spill] sm:$0xff] }
 0x1a2   : > { %v9413_v36 = vmax.f32 %v1912_v27, %v1950_v12  ;;  %v1913_v26 = vmax.f32 %v11545_v61, %v1841_v11  ;;  %v565_v1 = vmul.f32 %v11549_v14, %v9292_v28  ;;  %v1665_v63 = vsel %vm770_vm0, %v1662_v51, %v1664_v22  ;;  %v11551_v51 = vld [vmem:[#allocation45_spill] sm:$0xff]  ;;  %v1314_v12 = vpop.permute.xlu1 %1313 }
 0x1a3   : > { %v1667_v20 = vsel %vm770_vm0, %v1664_v22, %v11322_v48  ;;  %v1952_v44 = vsel %vm770_vm0, %v1949_v18, %v11319_v9  ;;  %v741_v30 = vmul.f32 %v11550_v41, %v9292_v28  ;;  %v501_v46 = vmul.f32 %v11551_v51, %v9292_v28  ;;  %v1309_v48 = vpop.permute.xlu0 %1308 }
 0x1a4   : > { %v9431_v61 = vmax.f32 %v2047_v19, %v9413_v36  ;;  %v9433_v55 = vmax.f32 %v1913_v26, %v1952_v44  ;;  %v648_v27 = vrot.slane %v565_v1, 1  ;;  %v1302_v22 = vadd.f32 %v1245_v40, %v1127_v37  ;;  %v9451_v37 = vld [vmem:[%s11239_s2] ss:$0 sm:$0xff] }
 0x1a5   : > { %v1724_v33 = vadd.f32 %v1665_v63, %v1549_v52  ;;  %v1725_v21 = vadd.f32 %v1667_v20, %v1550_v25  ;;  %v9439_v18 = vmul.f32 %v8773_v62, %v9389_v58  ;;  %v824_v26 = vrot.slane %v741_v30, 2 }
 0x1a6   : > { %v2127_v11 = vrot.slane %v9431_v61, 1  ;;  %v9446_v49 = vmax.f32 %v2048_v60, %v9433_v55  ;;  %v705_v19 = vadd.f32 %v648_v27, %v501_v46  ;;  %v9454_v40 = vadd.f32 %v9451_v37, %v1723_v6 }
 0x1a7   : > { %v1348_v62 = vmul.f32 %v11546_v56, %v9358_v57  ;;  %v927_v52 = vmul.f32 %v11541_v59, %v9389_v58  ;;  %v9462_v17 = vmul.f32 %v8792_v29, %v9389_v58  ;;  %v9471_v6 = vmul.f32 %v8871_v3, %v1314_v12 }
 0x1a8   : > { %v9467_v60 = vsel %vm594_vm1, %v2125_v7, %v2127_v11  ;;  %v11318_v25 = vrot.slane %v9446_v49, 1  ;;  %v881_v1 = vadd.f32 %v824_v26, %v705_v19  ;;  %v9474_v63 = vadd.f32 %v9451_v37, %v1724_v33 }
 0x1a9   : > { %v1071_v20 = vrot.slane %v9411_v13, 1  ;;  %v1376_v44 = vadd.f32 %v1348_v62, %v1302_v22  ;;  %v1760_v30 = vadd.f32 %v9451_v37, %v1725_v21  ;;  %6638 = vmatmul.mubr.msk.f32.gmra.mrb[2].mxu0 %vm2159_vm4, %v9467_v60  ;;  %v1073_v19 = vrot.slane %v9439_v18, 1  ;;  %v11552_v18 = vld [vmem:[#allocation49_spill] sm:$0xff] }
 0x1aa   : > { %v9483_v7 = vsel %vm594_vm1, %v2127_v11, %v11318_v25  ;;  %v955_v46 = vadd.f32 %v927_v52, %v881_v1  ;;  %v564_v33 = vmul.f32 %v11549_v14, %v9233_v23  ;;  %v1248_v13 = vrot.slane %v9462_v17, 2 }
 0x1ab   : > { %6640 = vmatprep.mubr.msk.f32.mxu0 %vm2159_vm4, %v9483_v7  ;;  %v1351_v22 = vmul.f32 %v11546_v56, %v1314_v12  ;;  %v9493_v21 = vmul.f32 %v8892_v34, %v1314_v12  ;;  %v740_v11 = vmul.f32 %v11550_v41, %v9233_v23  ;;  %v1497_v52 = vrot.slane %v9471_v6, 1 }
 0x1ac   : > { %v1130_v62 = vadd.f32 %v1073_v19, %v955_v46  ;;  %v499_v1 = vmul.f32 %v11551_v51, %v11552_v18  ;;  %v646_v14 = vrot.slane %v564_v33, 1  ;;  %v500_v25 = vmul.f32 %v11551_v51, %v9233_v23 }
 0x1ad   : > { %v822_v9 = vrot.slane %v740_v11, 2  ;;  %v1413_v17 = vmul.f32 %v8871_v3, %v9389_v58  ;;  %v1588_v12 = vmul.f32 %v8892_v34, %v9389_v58  ;;  %v11553_v41 = vrot.slane %v8953_v15, 1 }
 0x1ae   : > { %v1305_v42 = vadd.f32 %v1248_v13, %v1130_v62  ;;  %v649_v2 = vsel %vm594_vm1, %v646_v14, %v648_v27  ;;  %v1165_v33 = vmul.f32 %v8792_v29, %v9358_v57  ;;  %v925_v11 = vmul.f32 %v11541_v59, %v9292_v28 }
 0x1af   : > { %v647_v46 = vsel %vm594_vm1, %v11553_v41, %v646_v14  ;;  %v704_v51 = vadd.f32 %v649_v2, %v500_v25  ;;  %v11554_v62 = vrot.slane %v8960_v8, 2  ;;  %v825_v41 = vsel %vm770_vm0, %v822_v9, %v824_v26 }
 0x1b0   : > { %v703_v23 = vadd.f32 %v647_v46, %v499_v1  ;;  %v1379_v35 = vadd.f32 %v1351_v22, %v1305_v42  ;;  %v1493_v45 = vrot.slane %v1413_v17, 1  ;;  %v926_v29 = vmul.f32 %v11541_v59, %v9358_v57  ;;  %v11559_v46 = vld [vmem:[#allocation39_spill] sm:$0xff] }
 0x1b1   : > { %v823_v15 = vsel %vm770_vm0, %v11554_v62, %v822_v9  ;;  %v880_v14 = vadd.f32 %v825_v41, %v704_v51  ;;  %v1668_v18 = vrot.slane %v1588_v12, 2  ;;  %v1246_v25 = vrot.slane %v1165_v33, 2 }
 0x1b2   : > { %v879_v27 = vadd.f32 %v823_v15, %v703_v23  ;;  %v1554_v2 = vadd.f32 %v1497_v52, %v1379_v35  ;;  %v11555_v28 = vrot.slane %v9376_v16, 1  ;;  %v1414_v8 = vmul.f32 %v8871_v3, %v1309_v48 }
 0x1b3   : > { %v954_v1 = vadd.f32 %v926_v29, %v880_v14  ;;  %v11556_v9 = vrot.slane %v9335_v10, 1  ;;  %v11557_v59 = vrot.slane %v9493_v21, 2  ;;  %v11558_v35 = vrot.slane %v9380_v31, 2 }
 0x1b4   : > { %v1494_v42 = vsel %vm594_vm1, %v11555_v28, %v1493_v45  ;;  %v953_v22 = vadd.f32 %v925_v11, %v879_v27  ;;  %v1589_v16 = vmul.f32 %v8892_v34, %v1309_v48  ;;  %v1842_v33 = vrot.slane %v11559_v46, 1 }
 0x1b5   : > { %v1072_v26 = vsel %vm594_vm1, %v11556_v9, %v1071_v20  ;;  %v1551_v17 = vadd.f32 %v1494_v42, %v1376_v44  ;;  %v9532_v57 = vadd.f32 %v11557_v59, %v1554_v2  ;;  %v1669_v12 = vsel %vm770_vm0, %v11558_v35, %v1668_v18 }
 0x1b6   : > { %v9540_v3 = vmax.f32 %v9276_v50, 0.0  ;;  %v1074_v10 = vsel %vm594_vm1, %v1071_v20, %v1073_v19  ;;  %v1128_v23 = vadd.f32 %v1072_v26, %v953_v22  ;;  %v9544_v44 = vmax.f32 %v9289_v38, 0.0 }
 0x1b7   : > { %v1726_v51 = vadd.f32 %v1669_v12, %v1551_v17  ;;  %v1129_v11 = vadd.f32 %v1074_v10, %v954_v1  ;;  %v11560_v62 = vrot.slane %v9353_v32, 2  ;;  %v1495_v15 = vrot.slane %v1414_v8, 1  ;;  %v11564_v10 = vld [vmem:[#allocation43_spill] sm:$0xff] }
 0x1b8   : > { %v9549_v41 = vmax.f32 %v1760_v30, 0.0  ;;  %v1349_v50 = vmul.f32 %v11546_v56, %v9389_v58  ;;  %v1953_v27 = vrot.slane %v11559_v46, 2  ;;  %v9555_v20 = vmax.f32 %v9454_v40, 0.0  ;;  %v11562_v40 = vld [vmem:[#allocation40_spill] sm:$0xff] }
 0x1b9   : > { %v1247_v31 = vsel %vm770_vm0, %v11560_v62, %v1246_v25  ;;  %v9558_v38 = vmax.f32 %v9474_v63, 0.0  ;;  %v1670_v19 = vrot.slane %v1589_v16, 2  ;;  %v11561_v32 = vrot.slane %v11548_v39, 1 }
 0x1ba   : > { %v1303_v34 = vadd.f32 %v1247_v31, %v1128_v23  ;;  %v1249_v30 = vsel %vm770_vm0, %v1246_v25, %v1248_v13  ;;  %v1761_v2 = vadd.f32 %v9451_v37, %v1726_v51  ;;  %v1496_v42 = vsel %vm594_vm1, %v1493_v45, %v1495_v15 }
 0x1bb   : > { %v1843_v14 = vsel %vm594_vm1, %v11561_v32, %v1842_v33  ;;  %v1304_v28 = vadd.f32 %v1249_v30, %v1129_v11  ;;  %v1844_v8 = vrot.slane %v11562_v40, 1  ;;  %v1955_v63 = vrot.slane %v11562_v40, 2  ;;  %v11565_v11 = vld [vmem:[#allocation44_spill] sm:$0xff] }
 0x1bc   : > { %v1377_v29 = vadd.f32 %v1349_v50, %v1303_v34  ;;  %v1914_v58 = vmax.f32 %v11548_v39, %v1843_v14  ;;  %v1866_v22 = vrot.slane %v9549_v41, 1  ;;  %v1350_v1 = vmul.f32 %v11546_v56, %v1309_v48 }
 0x1bd   : > { %v11563_v26 = vrot.slane %v11548_v39, 2  ;;  %v1671_v25 = vsel %vm770_vm0, %v1668_v18, %v1670_v19  ;;  %v2049_v45 = vmax.f32 %v9229_v43, %v9413_v36  ;;  %v1845_v59 = vsel %vm594_vm1, %v1842_v33, %v1844_v8 }
 0x1be   : > { %v1552_v9 = vadd.f32 %v1496_v42, %v1377_v29  ;;  %v1977_v35 = vrot.slane %v9549_v41, 2  ;;  %v9581_v12 = vmax.f32 %v1761_v2, 0.0  ;;  %v1915_v56 = vmax.f32 %v11559_v46, %v1845_v59 }
 0x1bf   : > { %v1954_v13 = vsel %vm770_vm0, %v11563_v26, %v1953_v27  ;;  %v1378_v48 = vadd.f32 %v1350_v1, %v1304_v28  ;;  %v1956_v18 = vsel %vm770_vm0, %v1953_v27, %v1955_v63  ;;  %v1846_v23 = vrot.slane %v11564_v10, 1  ;;  %v11568_v26 = vld [vmem:[#allocation48_spill] sm:$0xff] }
 0x1c0   : > { %v9575_v17 = vmax.f32 %v1914_v58, %v1954_v13  ;;  %v9583_v16 = vadd.f32 %v1671_v25, %v1552_v9  ;;  %v2026_v51 = vmax.f32 %v1915_v56, %v1956_v18  ;;  %v2050_v43 = vmax.f32 %v9231_v53, %v9433_v55 }
 0x1c1   : > { %v1957_v33 = vrot.slane %v11564_v10, 2  ;;  %v1848_v62 = vrot.slane %v11565_v11, 1  ;;  %v1498_v46 = vsel %vm594_vm1, %v1495_v15, %v1497_v52  ;;  %v1847_v34 = vsel %vm594_vm1, %v1844_v8, %v1846_v23 }
 0x1c2   : > { %v9587_v39 = vmax.f32 %v2049_v45, %v9575_v17  ;;  %v1959_v50 = vrot.slane %v11565_v11, 2  ;;  %v1868_v27 = vrot.slane %v9581_v12, 1  ;;  %v11566_v32 = vrot.slane %v9493_v21, 2  ;;  %v2093_v21 = vld [vmem:[%s11240_s3 + $0x10] sm:$0xff] }
 0x1c3   : > { %v9607_v14 = vmax.f32 %v2050_v43, %v2026_v51  ;;  %v1916_v30 = vmax.f32 %v11562_v40, %v1847_v34  ;;  %v1979_v6 = vrot.slane %v9581_v12, 2  ;;  %v9611_v52 = vadd.f32 %v1498_v46, %v1378_v48  ;;  %v11569_v45 = vld [vmem:[#allocation50_spill] sm:$0xff] }
 0x1c4   : > { %v2131_v31 = vrot.slane %v9587_v39, 1  ;;  %v9605_v53 = vsel %vm770_vm0, %v1670_v19, %v11566_v32  ;;  %v11567_v15 = vrot.slane %v9446_v49, 1  ;;  %v1849_v2 = vsel %vm594_vm1, %v1846_v23, %v1848_v62  ;;  %v2094_v19 = vld [vmem:[%s11240_s3 + $0x18] sm:$0x3f] }
 0x1c5   : > { %v1958_v58 = vsel %vm770_vm0, %v1955_v63, %v1957_v33  ;;  %v2051_v28 = vmax.f32 %v9413_v36, %v9575_v17  ;;  %v1960_v42 = vsel %vm770_vm0, %v1957_v33, %v1959_v50  ;;  %v2052_v40 = vmax.f32 %v9433_v55, %v2026_v51 }
 0x1c6   : > { %v9616_v29 = vsel %vm594_vm1, %v11567_v15, %v2131_v31  ;;  %v2133_v8 = vrot.slane %v9607_v14, 1  ;;  %v2027_v1 = vmax.f32 %v1916_v30, %v1958_v58  ;;  %v1917_v9 = vmax.f32 %v11564_v10, %v1849_v2 }
 0x1c7   : > { %6641 = vmatmul.mubr.msk.f32.gmra.mrb[4].mxu0 %vm2159_vm4, %v9616_v29  ;;  %v1850_v13 = vrot.slane %v11568_v26, 1  ;;  %v1961_v25 = vrot.slane %v11568_v26, 2  ;;  %v1852_v59 = vrot.slane %v11569_v45, 1  ;;  %v1963_v63 = vrot.slane %v11569_v45, 2 }
 0x1c8   : > { %v7351_v56 = vpack.c.bf16 %v2094_v19, %v2093_v21  ;;  %v9639_v36 = vsel %vm594_vm1, %v2131_v31, %v2133_v8  ;;  %v9641_v48 = vmax.f32 %v2051_v28, %v2027_v1  ;;  %v2028_v55 = vmax.f32 %v1917_v9, %v1960_v42 }
 0x1c9   : > { %v1851_v18 = vsel %vm594_vm1, %v1848_v62, %v1850_v13  ;;  %6643 = vmatprep.mubr.msk.f32.mxu0 %vm2159_vm4, %v9639_v36  ;;  %v1962_v23 = vsel %vm770_vm0, %v1959_v50, %v1961_v25  ;;  %v2053_v43 = vmax.f32 %v9575_v17, %v2027_v1  ;;  %v1853_v33 = vsel %vm594_vm1, %v1850_v13, %v1852_v59 }
 0x1ca   : > { %v1918_v10 = vmax.f32 %v11565_v11, %v1851_v18  ;;  %v2135_v46 = vrot.slane %v9641_v48, 1  ;;  %v9651_v31 = vmax.f32 %v2052_v40, %v2028_v55  ;;  %v1919_v34 = vmax.f32 %v11568_v26, %v1853_v33  ;;  %7353 = vmatprep.subr.msk.bf16.mxu0 %vm9042_vm3, %v7351_v56  ;;  %v11571_v11 = vld [vmem:[#allocation53_spill] sm:$0xff] }
 0x1cb   : > { %v1964_v32 = vsel %vm770_vm0, %v1961_v25, %v1963_v63  ;;  %v2054_v15 = vmax.f32 %v2026_v51, %v2028_v55  ;;  %v1854_v2 = vrot.slane %v11571_v11, 1  ;;  %v1965_v50 = vrot.slane %v11571_v11, 2  ;;  %7356 = vmatpush3.bf16.msk.msra.mxu0 %vm9042_vm3, %v7351_v56 }
 0x1cc   : > { %v2029_v30 = vmax.f32 %v1918_v10, %v1962_v23  ;;  %v9662_v17 = vsel %vm594_vm1, %v2133_v8, %v2135_v46  ;;  %v2137_v21 = vrot.slane %v9651_v31, 1  ;;  %v2030_v19 = vmax.f32 %v1919_v34, %v1964_v32 }
 0x1cd   : > { %v1856_v58 = vrot.slane %v9323_v54, 1  ;;  %6644 = vmatmul.mubr.msk.f32.gmra.mrb[6].mxu0 %vm2159_vm4, %v9662_v17  ;;  %v1855_v51 = vsel %vm594_vm1, %v1852_v59, %v1854_v2  ;;  %v1966_v42 = vsel %vm770_vm0, %v1963_v63, %v1965_v50  ;;  %v1967_v59 = vrot.slane %v9323_v54, 2 }
 0x1ce   : > { %v9668_v28 = vmax.f32 %v2053_v43, %v2029_v30  ;;  %v2055_v40 = vmax.f32 %v2027_v1, %v2029_v30  ;;  %v9673_v9 = vsel %vm594_vm1, %v2135_v46, %v2137_v21  ;;  %v9675_v8 = vmax.f32 %v2054_v15, %v2030_v19 }
 0x1cf   : > { %v1920_v26 = vmax.f32 %v11569_v45, %v1855_v51  ;;  %v1857_v13 = vsel %vm594_vm1, %v1854_v2, %v1856_v58  ;;  %6646 = vmatprep.mubr.msk.f32.mxu0 %vm2159_vm4, %v9673_v9  ;;  %v2056_v63 = vmax.f32 %v2028_v55, %v2030_v19  ;;  %v1858_v10 = vrot.slane %v9540_v3, 1 }
 0x1d0   : > { %v2139_v25 = vrot.slane %v9668_v28, 1  ;;  %v1921_v56 = vmax.f32 %v11571_v11, %v1857_v13  ;;  %v2141_v1 = vrot.slane %v9675_v8, 1  ;;  %v1969_v23 = vrot.slane %v9540_v3, 2 }
 0x1d1   : > { %v2031_v18 = vmax.f32 %v1920_v26, %v1966_v42  ;;  %v1968_v43 = vsel %vm770_vm0, %v1965_v50, %v1967_v59  ;;  %v1860_v33 = vrot.slane %v9544_v44, 1  ;;  %v1971_v46 = vrot.slane %v9544_v44, 2 }
 0x1d2   : > { %v9688_v45 = vsel %vm594_vm1, %v2137_v21, %v2139_v25  ;;  %v9696_v55 = vsel %vm594_vm1, %v2139_v25, %v2141_v1  ;;  %v2032_v32 = vmax.f32 %v1921_v56, %v1968_v43  ;;  %v1859_v15 = vsel %vm594_vm1, %v1856_v58, %v1858_v10 }
 0x1d3   : > { %6647 = vmatmul.mubr.msk.f32.gmra.mrb[8].mxu0 %vm2159_vm4, %v9688_v45  ;;  %v9698_v34 = vmax.f32 %v2055_v40, %v2031_v18  ;;  %v1922_v11 = vmax.f32 %v9323_v54, %v1859_v15  ;;  %v1970_v2 = vsel %vm770_vm0, %v1967_v59, %v1969_v23  ;;  %v2057_v50 = vmax.f32 %v2029_v30, %v2031_v18 }
 0x1d4   : > { %6649 = vmatprep.mubr.msk.f32.mxu0 %vm2159_vm4, %v9696_v55  ;;  %v1861_v21 = vsel %vm594_vm1, %v1858_v10, %v1860_v33  ;;  %v9707_v42 = vmax.f32 %v2056_v63, %v2032_v32  ;;  %v1972_v26 = vsel %vm770_vm0, %v1969_v23, %v1971_v46  ;;  %v2058_v58 = vmax.f32 %v2030_v19, %v2032_v32 }
 0x1d5   : > { %v2143_v51 = vrot.slane %v9698_v34, 1  ;;  %v1923_v40 = vmax.f32 %v9540_v3, %v1861_v21  ;;  %v2033_v13 = vmax.f32 %v1922_v11, %v1970_v2  ;;  %v1862_v25 = vrot.slane %v9555_v20, 1 }
 0x1d6   : > { %v1973_v56 = vrot.slane %v9555_v20, 2  ;;  %v2145_v30 = vrot.slane %v9707_v42, 1  ;;  %v1864_v10 = vrot.slane %v9558_v38, 1  ;;  %v1728_v63 = vadd.f32 %v9605_v53, %v9611_v52 }
 0x1d7   : > { %v9714_v54 = vsel %vm594_vm1, %v2141_v1, %v2143_v51  ;;  %v2034_v59 = vmax.f32 %v1923_v40, %v1972_v26  ;;  %v9722_v3 = vmax.f32 %v2057_v50, %v2033_v13  ;;  %v1863_v19 = vsel %vm594_vm1, %v1860_v33, %v1862_v25 }
 0x1d8   : > { %6650 = vmatmul.mubr.msk.f32.gmra.mrb[10].mxu0 %vm2159_vm4, %v9714_v54  ;;  %v1974_v23 = vsel %vm770_vm0, %v1971_v46, %v1973_v56  ;;  %v9727_v1 = vsel %vm594_vm1, %v2143_v51, %v2145_v30  ;;  %v1924_v15 = vmax.f32 %v9544_v44, %v1863_v19  ;;  %v1865_v11 = vsel %vm594_vm1, %v1862_v25, %v1864_v10 }
 0x1d9   : > { %v9729_v43 = vmax.f32 %v2058_v58, %v2034_v59  ;;  %6652 = vmatprep.mubr.msk.f32.mxu0 %vm2159_vm4, %v9727_v1  ;;  %v2147_v53 = vrot.slane %v9722_v3, 1  ;;  %v2059_v52 = vmax.f32 %v2031_v18, %v2033_v13  ;;  %v1925_v2 = vmax.f32 %v9555_v20, %v1865_v11  ;;  %v5984_v20 = vld [vmem:[%s11240_s3 + $0x40] sm:$0xff]  ;;  %v5985_v18 = vld [vmem:[%s11240_s3 + $0x48] sm:$0xff] }
 0x1da   : > { %v1975_v33 = vrot.slane %v9558_v38, 2  ;;  %v9739_v50 = vmax.f32 %v1924_v15, %v1974_v23  ;;  %v1867_v44 = vsel %vm594_vm1, %v1864_v10, %v1866_v22  ;;  %v1869_v21 = vsel %vm594_vm1, %v1866_v22, %v1868_v27 }
 0x1db   : > { %v2149_v46 = vrot.slane %v9729_v43, 1  ;;  %v9756_v51 = vsel %vm594_vm1, %v2145_v30, %v2147_v53  ;;  %v2060_v26 = vmax.f32 %v2032_v32, %v2034_v59  ;;  %v1926_v58 = vmax.f32 %v9558_v38, %v1867_v44 }
 0x1dc   : > { %v1976_v40 = vsel %vm770_vm0, %v1973_v56, %v1975_v33  ;;  %6653 = vmatmul.mubr.msk.f32.gmra.mrb[12].mxu0 %vm2159_vm4, %v9756_v51  ;;  %v9766_v25 = vmax.f32 %v2059_v52, %v9739_v50  ;;  %v1978_v30 = vsel %vm770_vm0, %v1975_v33, %v1977_v35  ;;  %v2061_v38 = vmax.f32 %v2033_v13, %v9739_v50 }
 0x1dd   : > { %v9763_v22 = vsel %vm594_vm1, %v2147_v53, %v2149_v46  ;;  %v9768_v10 = vmax.f32 %v1925_v2, %v1976_v40  ;;  %v9775_v32 = vmax.f32 %v1926_v58, %v1978_v30  ;;  %v1927_v56 = vmax.f32 %v9549_v41, %v1869_v21  ;;  %v5986_v58 = vld [vmem:[%s11240_s3 + $0x50] sm:$0xff]  ;;  %v5987_v30 = vld [vmem:[%s11240_s3 + $0x58] sm:$0x3f] }
 0x1de   : > { %6655 = vmatprep.mubr.msk.f32.mxu0 %vm2159_vm4, %v9763_v22  ;;  %v7357_v19 = vpack.c.bf16 %v5985_v18, %v5984_v20  ;;  %v2151_v23 = vrot.slane %v9766_v25, 1  ;;  %v1980_v11 = vsel %vm770_vm0, %v1977_v35, %v1979_v6  ;;  %v1762_v2 = vadd.f32 %v9451_v37, %v9583_v16 }
 0x1df   : > { %v9781_v15 = vmax.f32 %v2060_v26, %v9768_v10  ;;  %v9789_v53 = vmax.f32 %v2061_v38, %v9775_v32  ;;  %v9791_v52 = vmax.f32 %v1927_v56, %v1980_v11  ;;  %v2062_v13 = vmax.f32 %v2034_v59, %v9768_v10 }
 0x1e0   : > { %7358 = vmatprep.subr.bf16.mxu0 %v7357_v19  ;;  %v9797_v33 = vsel %vm594_vm1, %v2149_v46, %v2151_v23  ;;  %v1764_v41 = vadd.f32 %v9451_v37, %v9532_v57  ;;  %v1763_v35 = vadd.f32 %v9451_v37, %v1728_v63  ;;  %v1790_v37 = vmax.f32 %v1762_v2, 0.0  ;;  %v6009_v2 = vld [vmem:[%s11240_s3 + $0x60] sm:$0xff] }
 0x1e1   : > { %v2153_v44 = vrot.slane %v9781_v15, 1  ;;  %6656 = vmatmul.mubr.msk.f32.gmra.mrb[14].mxu0 %vm2159_vm4, %v9797_v33  ;;  %v2155_v21 = vrot.slane %v9789_v53, 1  ;;  %v9807_v59 = vmax.f32 %v2062_v13, %v9791_v52  ;;  %v7361_v13 = vpack.c.bf16 %v5987_v30, %v5986_v58 }
 0x1e2   : > { %v1792_v63 = vmax.f32 %v1764_v41, 0.0  ;;  %v1791_v20 = vmax.f32 %v1763_v35, 0.0  ;;  %v1870_v40 = vrot.slane %v1790_v37, 1  ;;  %v1981_v26 = vrot.slane %v1790_v37, 2 }
 0x1e3   : > { %v9810_v16 = vsel %vm594_vm1, %v2151_v23, %v2153_v44  ;;  %v9815_v46 = vsel %vm594_vm1, %v2153_v44, %v2155_v21  ;;  %v9818_v57 = vrot.slane %v9807_v59, 1  ;;  %v6010_v44 = vld [vmem:[%s11240_s3 + $0x68] sm:$0xff] }
 0x1e4   : > { %6658 = vmatprep.mubr.msk.f32.mxu0 %vm2159_vm4, %v9810_v16  ;;  %11572 = vst [vmem:[#allocation27_spill] sm:$0xff] %v9815_v46  ;;  %v1874_v38 = vrot.slane %v1792_v63, 1  ;;  %v1872_v56 = vrot.slane %v1791_v20, 1  ;;  %v1985_v23 = vrot.slane %v1792_v63, 2  ;;  %v1983_v11 = vrot.slane %v1791_v20, 2 }
 0x1e5   : > { %11573 = vst [vmem:[#allocation29_spill] sm:$0xff] %v9818_v57  ;;  %6659 = vmatmul.mubr.msk.f32.gmra.mrb[16].mxu0 %vm2159_vm4, %v9815_v46  ;;  %v9824_v18 = vsel %vm594_vm1, %v2155_v21, %v9818_v57  ;;  %v1871_v41 = vsel %vm594_vm1, %v1868_v27, %v1870_v40  ;;  %v1982_v35 = vsel %vm770_vm0, %v1979_v6, %v1981_v26 }
 0x1e6   : > { %11574 = vst [vmem:[#allocation17_spill] sm:$0xff] %v9824_v18  ;;  %6661 = vmatprep.mubr.msk.f32.mxu0 %vm2159_vm4, %v9824_v18  ;;  %v2063_v21 = vmax.f32 %v9739_v50, %v9775_v32  ;;  %v1931_v58 = vmax.f32 %v1792_v63, %v1874_v38  ;;  %v1928_v30 = vmax.f32 %v9581_v12, %v1871_v41 }
 0x1e7   : > { %v2064_v18 = vmax.f32 %v9768_v10, %v9791_v52  ;;  %v7367_v27 = vpack.c.bf16 %v6010_v44, %v6009_v2  ;;  %v1875_v46 = vsel %vm594_vm1, %v1872_v56, %v1874_v38  ;;  %v1984_v63 = vsel %vm770_vm0, %v1981_v26, %v1983_v11  ;;  %v6034_v44 = vld [vmem:[%s11240_s3 + $0x80] sm:$0xff] }
 0x1e8   : > { %v2039_v50 = vmax.f32 %v1928_v30, %v1982_v35  ;;  %v1930_v12 = vmax.f32 %v1791_v20, %v1875_v46  ;;  %v2042_v46 = vmax.f32 %v1931_v58, %v1985_v23  ;;  %v2588_v2 = vrot.slane %v9431_v61, 2  ;;  %v6035_v35 = vld [vmem:[%s11240_s3 + $0x88] sm:$0xff] }
 0x1e9   : > { %6662 = vmatmul.mubr.msk.f32.gmra.mrb[18].mxu0 %vm2159_vm4, %v9818_v57  ;;  %v1873_v57 = vsel %vm594_vm1, %v1870_v40, %v1872_v56  ;;  %v1986_v40 = vsel %vm770_vm0, %v1983_v11, %v1985_v23  ;;  %v6011_v56 = vld [vmem:[%s11240_s3 + $0x70] sm:$0xff]  ;;  %v6012_v23 = vld [vmem:[%s11240_s3 + $0x78] sm:$0x3f]  ;;  %v2590_v58 = vrot.slane %v9446_v49, 2  ;;  %v7377_v30 = vpack.c.bf16 %v6035_v35, %v6034_v44 }
 0x1ea   : > { %6672 = vmatprep.mubr.msk.f32.mxu0 %vm2159_vm4, %v9257_v5  ;;  %v1929_v6 = vmax.f32 %v1790_v37, %v1873_v57  ;;  %v9867_v10 = vmax.f32 %v2063_v21, %v2039_v50  ;;  %v2065_v57 = vmax.f32 %v9775_v32, %v2039_v50  ;;  %v2581_v32 = vrot.slane %v9257_v5, 2 }
 0x1eb   : > { %v7371_v11 = vpack.c.bf16 %v6012_v23, %v6011_v56  ;;  %v2592_v50 = vrot.slane %v9587_v39, 2  ;;  %v2606_v23 = vrot.slane %v9707_v42, 2  ;;  %v2612_v44 = vrot.slane %v9766_v25, 2 }
 0x1ec   : > { %v2040_v41 = vmax.f32 %v1929_v6, %v1984_v63  ;;  %v9947_v63 = vsel %vm770_vm0, %v2588_v2, %v2590_v58 }
 0x1ed   : > { %6673 = vmatmul.mubr.msk.f32.vlgmr.msra.gmra.mrb[0].mxu0 %vm2159_vm4, %v9262_v4 }
 0x1ee   : > { %7360 = vmatpush3.bf16.msra.mxu0 %v7357_v19  ;;  %6675 = vmatprep.mubr.msk.f32.mxu0 %vm2159_vm4, %v9270_v0  ;;  %v2041_v19 = vmax.f32 %v1930_v12, %v1986_v40  ;;  %v9874_v37 = vmax.f32 %v2064_v18, %v2040_v41  ;;  %v2066_v20 = vmax.f32 %v9791_v52, %v2040_v41  ;;  %v2582_v52 = vrot.slane %v9262_v4, 2 }
 0x1ef   : > { %7363 = vmatprep.subr.msk.bf16.mxu0 %vm9042_vm3, %v7361_v13  ;;  %v2584_v18 = vrot.slane %v9270_v0, 2  ;;  %v2586_v4 = vrot.slane %v9273_v24, 2  ;;  %v9955_v12 = vsel %vm770_vm0, %v2590_v58, %v2592_v50  ;;  %v2596_v40 = vrot.slane %v9641_v48, 2 }
 0x1f0   : > { %v9877_v26 = vmax.f32 %v2065_v57, %v2041_v19  ;;  %v9879_v38 = vmax.f32 %v2066_v20, %v2042_v46  ;;  %v2583_v5 = vsel %vm770_vm0, %v2581_v32, %v2582_v52  ;;  %v2598_v19 = vrot.slane %v9651_v31, 2 }
 0x1f1   : > { %6676 = vmatmul.mubr.msk.f32.gmra.mrb[2].mxu0 %vm2159_vm4, %v9273_v24  ;;  %v9933_v21 = vsel %vm770_vm0, %v2584_v18, %v2586_v4  ;;  %v9941_v6 = vsel %vm770_vm0, %v2586_v4, %v2588_v2  ;;  %v2600_v46 = vrot.slane %v9668_v28, 2  ;;  %v2602_v32 = vrot.slane %v9675_v8, 2 }
 0x1f2   : > { %6678 = vmatprep.mubr.msk.f32.mxu0 %vm2159_vm4, %v9431_v61  ;;  %7366 = vmatpush3.bf16.msk.msra.mxu0 %vm9042_vm3, %v7361_v13  ;;  %v2585_v13 = vsel %vm770_vm0, %v2582_v52, %v2584_v18  ;;  %v9973_v20 = vsel %vm770_vm0, %v2596_v40, %v2598_v19  ;;  %v2604_v18 = vrot.slane %v9698_v34, 2  ;;  %v2608_v4 = vrot.slane %v9722_v3, 2 }
 0x1f3   : > { %7368 = vmatprep.subr.bf16.mxu0 %v7367_v27  ;;  %v9979_v52 = vsel %vm770_vm0, %v2598_v19, %v2600_v46  ;;  %v9985_v56 = vsel %vm770_vm0, %v2600_v46, %v2602_v32  ;;  %v2614_v58 = vrot.slane %v9781_v15, 2  ;;  %v10024_v19 = vrot.slane %v9807_v59, 2 }
 0x1f4   : > { %v10003_v2 = vsel %vm770_vm0, %v2606_v23, %v2608_v4 }
 0x1f5   : > { %6679 = vmatmul.mubr.msk.f32.gmra.mrb[4].mxu0 %vm2159_vm4, %v9446_v49 }
 0x1f6   : > { %6681 = vmatprep.mubr.msk.f32.mxu0 %vm2159_vm4, %v9587_v39 }
 0x1f9   : > { %6682 = vmatmul.mubr.msk.f32.gmra.mrb[6].mxu0 %vm2159_vm4, %v9607_v14 }
 0x1fa   : > { %6684 = vmatprep.mubr.msk.f32.mxu0 %vm2159_vm4, %v9641_v48 }
 0x1fd   : > { %6685 = vmatmul.mubr.msk.f32.gmra.mrb[8].mxu0 %vm2159_vm4, %v9651_v31 }
 0x1fe   : > { %6687 = vmatprep.mubr.msk.f32.mxu0 %vm2159_vm4, %v9668_v28 }
 0x201   : > { %6688 = vmatmul.mubr.msk.f32.gmra.mrb[10].mxu0 %vm2159_vm4, %v9675_v8 }
 0x202   : > { %6690 = vmatprep.mubr.msk.f32.mxu0 %vm2159_vm4, %v9698_v34 }
 0x205   : > { %6691 = vmatmul.mubr.msk.f32.gmra.mrb[12].mxu0 %vm2159_vm4, %v9707_v42 }
 0x206   : > { %6693 = vmatprep.mubr.msk.f32.mxu0 %vm2159_vm4, %v9722_v3 }
 0x209   : > { %6694 = vmatmul.mubr.msk.f32.gmra.mrb[14].mxu0 %vm2159_vm4, %v9729_v43 }
 0x20a   : > { %6696 = vmatprep.mubr.msk.f32.mxu0 %vm2159_vm4, %v9766_v25 }
 0x20d   : > { %6697 = vmatmul.mubr.msk.f32.gmra.mrb[16].mxu0 %vm2159_vm4, %v9781_v15 }
 0x20e   : > { %6699 = vmatprep.mubr.msk.f32.mxu0 %vm2159_vm4, %v9789_v53 }
 0x211   : > { %6700 = vmatmul.mubr.msk.f32.gmra.mrb[18].mxu0 %vm2159_vm4, %v9807_v59 }
 0x212   : > { %6710 = vmatprep.mubr.msk.f32.mxu0 %vm2159_vm4, %v2583_v5  ;;  %v9991_v5 = vsel %vm770_vm0, %v2602_v32, %v2604_v18 }
 0x215   : > { %6711 = vmatmul.mubr.msk.f32.vlgmr.msra.gmra.mrb[0].mxu0 %vm2159_vm4, %v2585_v13  ;;  %v2610_v13 = vrot.slane %v9729_v43, 2 }
 0x216   : > { %7370 = vmatpush3.bf16.msra.mxu0 %v7367_v27  ;;  %6713 = vmatprep.mubr.msk.f32.mxu0 %vm2159_vm4, %v9933_v21  ;;  %v2594_v27 = vrot.slane %v9607_v14, 2 }
 0x217   : > { %7373 = vmatprep.subr.msk.bf16.mxu0 %vm9042_vm3, %v7371_v11  ;;  %v10009_v35 = vsel %vm770_vm0, %v2608_v4, %v2610_v13 }
 0x218   : > { %v9961_v41 = vsel %vm770_vm0, %v2592_v50, %v2594_v27  ;;  %v9967_v57 = vsel %vm770_vm0, %v2594_v27, %v2596_v40  ;;  %v10015_v50 = vsel %vm770_vm0, %v2610_v13, %v2612_v44  ;;  %v2616_v27 = vrot.slane %v9789_v53, 2  ;;  %v6059_v13 = vld [vmem:[%s11240_s3 + $0xa0] sm:$0xff] }
 0x219   : > { %6714 = vmatmul.mubr.msk.f32.gmra.mrb[2].mxu0 %vm2159_vm4, %v9941_v6  ;;  %v10021_v40 = vsel %vm770_vm0, %v2612_v44, %v2614_v58  ;;  %v6060_v44 = vld [vmem:[%s11240_s3 + $0xa8] sm:$0xff] }
 0x21a   : > { %6716 = vmatprep.mubr.msk.f32.mxu0 %vm2159_vm4, %v9947_v63  ;;  %7376 = vmatpush3.bf16.msk.msra.mxu0 %vm9042_vm3, %v7371_v11  ;;  %v9997_v11 = vsel %vm770_vm0, %v2604_v18, %v2606_v23  ;;  %v10029_v46 = vsel %vm770_vm0, %v2614_v58, %v2616_v27  ;;  %v10035_v32 = vsel %vm770_vm0, %v2616_v27, %v10024_v19  ;;  %v6036_v18 = vld [vmem:[%s11240_s3 + $0x90] sm:$0xff]  ;;  %v6037_v23 = vld [vmem:[%s11240_s3 + $0x98] sm:$0x3f]  ;;  %v6084_v27 = vld [vmem:[%s11240_s3 + $0xc0] sm:$0xff] }
 0x21b   : > { %7378 = vmatprep.subr.bf16.mxu0 %v7377_v30  ;;  %v7381_v4 = vpack.c.bf16 %v6037_v23, %v6036_v18  ;;  %v6085_v18 = vld [vmem:[%s11240_s3 + $0xc8] sm:$0xff]  ;;  %v11575_v23 = vld [vmem:[#allocation27_spill] sm:$0xff] }
 0x21d   : > { %6717 = vmatmul.mubr.msk.f32.gmra.mrb[4].mxu0 %vm2159_vm4, %v9955_v12 }
 0x21e   : > { %6719 = vmatprep.mubr.msk.f32.mxu0 %vm2159_vm4, %v9961_v41 }
 0x221   : > { %6720 = vmatmul.mubr.msk.f32.gmra.mrb[6].mxu0 %vm2159_vm4, %v9967_v57 }
 0x222   : > { %6722 = vmatprep.mubr.msk.f32.mxu0 %vm2159_vm4, %v9973_v20 }
 0x225   : > { %6723 = vmatmul.mubr.msk.f32.gmra.mrb[8].mxu0 %vm2159_vm4, %v9979_v52 }
 0x226   : > { %6725 = vmatprep.mubr.msk.f32.mxu0 %vm2159_vm4, %v9985_v56 }
 0x229   : > { %6726 = vmatmul.mubr.msk.f32.gmra.mrb[10].mxu0 %vm2159_vm4, %v9991_v5 }
 0x22a   : > { %6728 = vmatprep.mubr.msk.f32.mxu0 %vm2159_vm4, %v9997_v11 }
 0x22d   : > { %6729 = vmatmul.mubr.msk.f32.gmra.mrb[12].mxu0 %vm2159_vm4, %v10003_v2 }
 0x22e   : > { %6731 = vmatprep.mubr.msk.f32.mxu0 %vm2159_vm4, %v10009_v35 }
 0x231   : > { %6732 = vmatmul.mubr.msk.f32.gmra.mrb[14].mxu0 %vm2159_vm4, %v10015_v50 }
 0x232   : > { %6734 = vmatprep.mubr.msk.f32.mxu0 %vm2159_vm4, %v10021_v40 }
 0x235   : > { %6735 = vmatmul.mubr.msk.f32.gmra.mrb[16].mxu0 %vm2159_vm4, %v10029_v46 }
 0x236   : > { %6737 = vmatprep.mubr.msk.f32.mxu0 %vm2159_vm4, %v10035_v32 }
 0x239   : > { %6738 = vmatmul.mubr.msk.f32.gmra.mrb[18].mxu0 %vm2159_vm4, %v10024_v19 }
 0x23a   : > { %6748 = vmatprep.mubr.msk.f32.mxu0 %vm2159_vm4, %v9270_v0  ;;  %v7387_v0 = vpack.c.bf16 %v6060_v44, %v6059_v13  ;;  %v11576_v13 = vld [vmem:[#allocation17_spill] sm:$0xff] }
 0x23b   : > { %v11577_v44 = vld [vmem:[#allocation29_spill] sm:$0xff] }
 0x23d   : > { %6749 = vmatmul.mubr.msk.f32.vlgmr.msra.gmra.mrb[0].mxu0 %vm2159_vm4, %v9273_v24  ;;  %v6061_v24 = vld [vmem:[%s11240_s3 + $0xb0] sm:$0xff] }
 0x23e   : > { %7380 = vmatpush3.bf16.msra.mxu0 %v7377_v30  ;;  %6751 = vmatprep.mubr.msk.f32.mxu0 %vm2159_vm4, %v9431_v61  ;;  %v6062_v30 = vld [vmem:[%s11240_s3 + $0xb8] sm:$0x3f] }
 0x23f   : > { %7383 = vmatprep.subr.msk.bf16.mxu0 %vm9042_vm3, %v7381_v4  ;;  %v7391_v58 = vpack.c.bf16 %v6062_v30, %v6061_v24  ;;  %v6086_v30 = vld [vmem:[%s11240_s3 + $0xd0] sm:$0xff] }
 0x241   : > { %6752 = vmatmul.mubr.msk.f32.gmra.mrb[2].mxu0 %vm2159_vm4, %v9446_v49 }
 0x242   : > { %6754 = vmatprep.mubr.msk.f32.mxu0 %vm2159_vm4, %v9587_v39  ;;  %7386 = vmatpush3.bf16.msk.msra.mxu0 %vm9042_vm3, %v7381_v4  ;;  %v10147_v4 = vrot.slane %v9874_v37, 1 }
 0x243   : > { %7388 = vmatprep.subr.bf16.mxu0 %v7387_v0 }
 0x245   : > { %6755 = vmatmul.mubr.msk.f32.gmra.mrb[4].mxu0 %vm2159_vm4, %v9607_v14 }
 0x246   : > { %6757 = vmatprep.mubr.msk.f32.mxu0 %vm2159_vm4, %v9641_v48 }
 0x249   : > { %6758 = vmatmul.mubr.msk.f32.gmra.mrb[6].mxu0 %vm2159_vm4, %v9651_v31 }
 0x24a   : > { %6760 = vmatprep.mubr.msk.f32.mxu0 %vm2159_vm4, %v9668_v28 }
 0x24d   : > { %6761 = vmatmul.mubr.msk.f32.gmra.mrb[8].mxu0 %vm2159_vm4, %v9675_v8 }
 0x24e   : > { %6763 = vmatprep.mubr.msk.f32.mxu0 %vm2159_vm4, %v9698_v34 }
 0x251   : > { %6764 = vmatmul.mubr.msk.f32.gmra.mrb[10].mxu0 %vm2159_vm4, %v9707_v42 }
 0x252   : > { %6766 = vmatprep.mubr.msk.f32.mxu0 %vm2159_vm4, %v9722_v3 }
 0x255   : > { %6767 = vmatmul.mubr.msk.f32.gmra.mrb[12].mxu0 %vm2159_vm4, %v9729_v43 }
 0x256   : > { %6769 = vmatprep.mubr.msk.f32.mxu0 %vm2159_vm4, %v9766_v25 }
 0x259   : > { %6770 = vmatmul.mubr.msk.f32.gmra.mrb[14].mxu0 %vm2159_vm4, %v9781_v15 }
 0x25a   : > { %6772 = vmatprep.mubr.msk.f32.mxu0 %vm2159_vm4, %v9789_v53 }
 0x25d   : > { %6773 = vmatmul.mubr.msk.f32.gmra.mrb[16].mxu0 %vm2159_vm4, %v9807_v59 }
 0x25e   : > { %6775 = vmatprep.mubr.msk.f32.mxu0 %vm2159_vm4, %v9867_v10 }
 0x261   : > { %6776 = vmatmul.mubr.msk.f32.gmra.mrb[18].mxu0 %vm2159_vm4, %v9874_v37 }
 0x262   : > { %6786 = vmatprep.mubr.msk.f32.mxu0 %vm2159_vm4, %v9305_v47  ;;  %v7397_v47 = vpack.c.bf16 %v6085_v18, %v6084_v27  ;;  %v6109_v18 = vld [vmem:[%s11240_s3 + $0xe0] sm:$0xff] }
 0x265   : > { %6787 = vmatmul.mubr.msk.f32.vlgmr.msra.gmra.mrb[0].mxu0 %vm2159_vm4, %v9467_v60  ;;  %v3052_v60 = vrot.slane %v9867_v10, 1 }
 0x266   : > { %7390 = vmatpush3.bf16.msra.mxu0 %v7387_v0  ;;  %6789 = vmatprep.mubr.msk.f32.mxu0 %vm2159_vm4, %v9483_v7 }
 0x267   : > { %7393 = vmatprep.subr.msk.bf16.mxu0 %vm9042_vm3, %v7391_v58  ;;  %v10153_v0 = vsel %vm594_vm1, %v11577_v44, %v3052_v60  ;;  %v10159_v24 = vsel %vm594_vm1, %v3052_v60, %v10147_v4  ;;  %v6110_v60 = vld [vmem:[%s11240_s3 + $0xe8] sm:$0xff] }
 0x269   : > { %6790 = vmatmul.mubr.msk.f32.gmra.mrb[2].mxu0 %vm2159_vm4, %v9616_v29 }
 0x26a   : > { %6792 = vmatprep.mubr.msk.f32.mxu0 %vm2159_vm4, %v9639_v36  ;;  %7396 = vmatpush3.bf16.msk.msra.mxu0 %vm9042_vm3, %v7391_v58  ;;  %v6087_v58 = vld [vmem:[%s11240_s3 + $0xd8] sm:$0x3f] }
 0x26b   : > { %7398 = vmatprep.subr.bf16.mxu0 %v7397_v47  ;;  %v7401_v27 = vpack.c.bf16 %v6087_v58, %v6086_v30  ;;  %v6111_v58 = vld [vmem:[%s11240_s3 + $0xf0] sm:$0xff] }
 0x26d   : > { %6793 = vmatmul.mubr.msk.f32.gmra.mrb[4].mxu0 %vm2159_vm4, %v9662_v17 }
 0x26e   : > { %6795 = vmatprep.mubr.msk.f32.mxu0 %vm2159_vm4, %v9673_v9 }
 0x271   : > { %6796 = vmatmul.mubr.msk.f32.gmra.mrb[6].mxu0 %vm2159_vm4, %v9688_v45 }
 0x272   : > { %6798 = vmatprep.mubr.msk.f32.mxu0 %vm2159_vm4, %v9696_v55 }
 0x275   : > { %6799 = vmatmul.mubr.msk.f32.gmra.mrb[8].mxu0 %vm2159_vm4, %v9714_v54 }
 0x276   : > { %6801 = vmatprep.mubr.msk.f32.mxu0 %vm2159_vm4, %v9727_v1 }
 0x279   : > { %6802 = vmatmul.mubr.msk.f32.gmra.mrb[10].mxu0 %vm2159_vm4, %v9756_v51 }
 0x27a   : > { %6804 = vmatprep.mubr.msk.f32.mxu0 %vm2159_vm4, %v9763_v22 }
 0x27d   : > { %6805 = vmatmul.mubr.msk.f32.gmra.mrb[12].mxu0 %vm2159_vm4, %v9797_v33 }
 0x27e   : > { %6807 = vmatprep.mubr.msk.f32.mxu0 %vm2159_vm4, %v9810_v16 }
 0x281   : > { %6808 = vmatmul.mubr.msk.f32.gmra.mrb[14].mxu0 %vm2159_vm4, %v11575_v23 }
 0x282   : > { %6810 = vmatprep.mubr.msk.f32.mxu0 %vm2159_vm4, %v11576_v13 }
 0x285   : > { %6811 = vmatmul.mubr.msk.f32.gmra.mrb[16].mxu0 %vm2159_vm4, %v10153_v0 }
 0x286   : > { %6813 = vmatprep.mubr.msk.f32.mxu0 %vm2159_vm4, %v10159_v24 }
 0x289   : > { %6814 = vmatmul.mubr.msk.f32.gmra.mrb[18].mxu0 %vm2159_vm4, %v10147_v4 }
 0x28a   : > { %6824 = vmatprep.mubr.msk.f32.mxu0 %vm2159_vm4, %v9933_v21  ;;  %v7407_v21 = vpack.c.bf16 %v6110_v60, %v6109_v18  ;;  %v6134_v18 = vld [vmem:[%s11240_s3 + $0x100] sm:$0xff]  ;;  %v6135_v60 = vld [vmem:[%s11240_s3 + $0x108] sm:$0xff] }
 0x28d   : > { %6825 = vmatmul.mubr.msk.f32.vlgmr.msra.gmra.mrb[0].mxu0 %vm2159_vm4, %v9941_v6  ;;  %v3255_v6 = vrot.slane %v9867_v10, 2 }
 0x28e   : > { %7400 = vmatpush3.bf16.msra.mxu0 %v7397_v47  ;;  %6827 = vmatprep.mubr.msk.f32.mxu0 %vm2159_vm4, %v9947_v63  ;;  %v10215_v47 = vrot.slane %v9874_v37, 2 }
 0x28f   : > { %7403 = vmatprep.subr.msk.bf16.mxu0 %vm9042_vm3, %v7401_v27  ;;  %v10221_v44 = vsel %vm770_vm0, %v10024_v19, %v3255_v6 }
 0x290   : > { %v10227_v30 = vsel %vm770_vm0, %v3255_v6, %v10215_v47 }
 0x291   : > { %6828 = vmatmul.mubr.msk.f32.gmra.mrb[2].mxu0 %vm2159_vm4, %v9955_v12 }
 0x292   : > { %6830 = vmatprep.mubr.msk.f32.mxu0 %vm2159_vm4, %v9961_v41  ;;  %7406 = vmatpush3.bf16.msk.msra.mxu0 %vm9042_vm3, %v7401_v27  ;;  %v6112_v27 = vld [vmem:[%s11240_s3 + $0xf8] sm:$0x3f] }
 0x293   : > { %7408 = vmatprep.subr.bf16.mxu0 %v7407_v21  ;;  %v7411_v19 = vpack.c.bf16 %v6112_v27, %v6111_v58 }
 0x295   : > { %6831 = vmatmul.mubr.msk.f32.gmra.mrb[4].mxu0 %vm2159_vm4, %v9967_v57 }
 0x296   : > { %6833 = vmatprep.mubr.msk.f32.mxu0 %vm2159_vm4, %v9973_v20 }
 0x299   : > { %6834 = vmatmul.mubr.msk.f32.gmra.mrb[6].mxu0 %vm2159_vm4, %v9979_v52 }
 0x29a   : > { %6836 = vmatprep.mubr.msk.f32.mxu0 %vm2159_vm4, %v9985_v56 }
 0x29d   : > { %6837 = vmatmul.mubr.msk.f32.gmra.mrb[8].mxu0 %vm2159_vm4, %v9991_v5 }
 0x29e   : > { %6839 = vmatprep.mubr.msk.f32.mxu0 %vm2159_vm4, %v9997_v11 }
 0x2a1   : > { %6840 = vmatmul.mubr.msk.f32.gmra.mrb[10].mxu0 %vm2159_vm4, %v10003_v2 }
 0x2a2   : > { %6842 = vmatprep.mubr.msk.f32.mxu0 %vm2159_vm4, %v10009_v35 }
 0x2a5   : > { %6843 = vmatmul.mubr.msk.f32.gmra.mrb[12].mxu0 %vm2159_vm4, %v10015_v50 }
 0x2a6   : > { %6845 = vmatprep.mubr.msk.f32.mxu0 %vm2159_vm4, %v10021_v40 }
 0x2a9   : > { %6846 = vmatmul.mubr.msk.f32.gmra.mrb[14].mxu0 %vm2159_vm4, %v10029_v46 }
 0x2aa   : > { %6848 = vmatprep.mubr.msk.f32.mxu0 %vm2159_vm4, %v10035_v32 }
 0x2ad   : > { %6849 = vmatmul.mubr.msk.f32.gmra.mrb[16].mxu0 %vm2159_vm4, %v10221_v44 }
 0x2ae   : > { %6851 = vmatprep.mubr.msk.f32.mxu0 %vm2159_vm4, %v10227_v30 }
 0x2b1   : > { %6852 = vmatmul.mubr.msk.f32.gmra.mrb[18].mxu0 %vm2159_vm4, %v10215_v47 }
 0x2b2   : > { %6862 = vmatprep.mubr.msk.f32.mxu0 %vm2159_vm4, %v9431_v61  ;;  %v7417_v61 = vpack.c.bf16 %v6135_v60, %v6134_v18 }
 0x2b5   : > { %6863 = vmatmul.mubr.msk.f32.vlgmr.msra.gmra.mrb[0].mxu0 %vm2159_vm4, %v9446_v49  ;;  %v6136_v49 = vld [vmem:[%s11240_s3 + $0x110] sm:$0xff] }
 0x2b6   : > { %7410 = vmatpush3.bf16.msra.mxu0 %v7407_v21  ;;  %6865 = vmatprep.mubr.msk.f32.mxu0 %vm2159_vm4, %v9587_v39  ;;  %v6137_v39 = vld [vmem:[%s11240_s3 + $0x118] sm:$0x3f] }
 0x2b7   : > { %7413 = vmatprep.subr.msk.bf16.mxu0 %vm9042_vm3, %v7411_v19 }
 0x2b9   : > { %6866 = vmatmul.mubr.msk.f32.gmra.mrb[2].mxu0 %vm2159_vm4, %v9607_v14  ;;  %v7421_v14 = vpack.c.bf16 %v6137_v39, %v6136_v49 }
 0x2ba   : > { %6868 = vmatprep.mubr.msk.f32.mxu0 %vm2159_vm4, %v9641_v48  ;;  %7416 = vmatpush3.bf16.msk.msra.mxu0 %vm9042_vm3, %v7411_v19 }
 0x2bb   : > { %7418 = vmatprep.subr.bf16.mxu0 %v7417_v61 }
 0x2bd   : > { %6869 = vmatmul.mubr.msk.f32.gmra.mrb[4].mxu0 %vm2159_vm4, %v9651_v31  ;;  %v3860_v31 = vrot.slane %v9877_v26, 2 }
 0x2be   : > { %6871 = vmatprep.mubr.msk.f32.mxu0 %vm2159_vm4, %v9668_v28 }
 0x2bf   : > { %v3861_v28 = vsel %vm770_vm0, %v10215_v47, %v3860_v31 }
 0x2c1   : > { %6872 = vmatmul.mubr.msk.f32.gmra.mrb[6].mxu0 %vm2159_vm4, %v9675_v8  ;;  %v4314_v8 = vld [vmem:[#allocation2 + $0x20] sm:$0xff] }
 0x2c2   : > { %6874 = vmatprep.mubr.msk.f32.mxu0 %vm2159_vm4, %v9698_v34 }
 0x2c5   : > { %6875 = vmatmul.mubr.msk.f32.gmra.mrb[8].mxu0 %vm2159_vm4, %v9707_v42  ;;  %v4316_v42 = vld [vmem:[#allocation2 + $0x30] sm:$0xff] }
 0x2c6   : > { %6877 = vmatprep.mubr.msk.f32.mxu0 %vm2159_vm4, %v9722_v3 }
 0x2c9   : > { %6878 = vmatmul.mubr.msk.f32.gmra.mrb[10].mxu0 %vm2159_vm4, %v9729_v43  ;;  %v10399_v43 = vld [vmem:[%s11241_s4] ss:$0 sm:$0xff] }
 0x2ca   : > { %6880 = vmatprep.mubr.msk.f32.mxu0 %vm2159_vm4, %v9766_v25 }
 0x2cd   : > { %6881 = vmatmul.mubr.msk.f32.gmra.mrb[12].mxu0 %vm2159_vm4, %v9781_v15 }
 0x2ce   : > { %6883 = vmatprep.mubr.msk.f32.mxu0 %vm2159_vm4, %v9789_v53 }
 0x2d1   : > { %6884 = vmatmul.mubr.msk.f32.gmra.mrb[14].mxu0 %vm2159_vm4, %v9807_v59 }
 0x2d2   : > { %6886 = vmatprep.mubr.msk.f32.mxu0 %vm2159_vm4, %v9867_v10 }
 0x2d5   : > { %6887 = vmatmul.mubr.msk.f32.gmra.mrb[16].mxu0 %vm2159_vm4, %v9874_v37 }
 0x2d6   : > { %6889 = vmatprep.mubr.msk.f32.mxu0 %vm2159_vm4, %v9877_v26 }
 0x2d9   : > { %6890 = vmatmul.mubr.msk.f32.gmra.mrb[18].mxu0 %vm2159_vm4, %v9879_v38 }
 0x2da   : > { %6900 = vmatprep.mubr.msk.f32.mxu0 %vm2159_vm4, %v9483_v7  ;;  %v3657_v7 = vrot.slane %v9877_v26, 1 }
 0x2dd   : > { %6901 = vmatmul.mubr.msk.f32.vlgmr.msra.gmra.mrb[0].mxu0 %vm2159_vm4, %v9616_v29  ;;  %v3659_v29 = vrot.slane %v9879_v38, 1 }
 0x2de   : > { %7420 = vmatpush3.bf16.msra.mxu0 %v7417_v61  ;;  %6903 = vmatprep.mubr.msk.f32.mxu0 %vm2159_vm4, %v9639_v36  ;;  %v3658_v36 = vsel %vm594_vm1, %v10147_v4, %v3657_v7 }
 0x2df   : > { %7423 = vmatprep.subr.msk.bf16.mxu0 %vm9042_vm3, %v7421_v14  ;;  %v3660_v48 = vsel %vm594_vm1, %v3657_v7, %v3659_v29 }
 0x2e1   : > { %6904 = vmatmul.mubr.msk.f32.gmra.mrb[2].mxu0 %vm2159_vm4, %v9662_v17  ;;  %v3862_v17 = vrot.slane %v9879_v38, 2 }
 0x2e2   : > { %6906 = vmatprep.mubr.msk.f32.mxu0 %vm2159_vm4, %v9673_v9  ;;  %7426 = vmatpush3.bf16.msk.msra.mxu0 %vm9042_vm3, %v7421_v14 }
 0x2e3   : > { %v3863_v9 = vsel %vm770_vm0, %v3860_v31, %v3862_v17 }
 0x2e5   : > { %6907 = vmatmul.mubr.msk.f32.gmra.mrb[4].mxu0 %vm2159_vm4, %v9688_v45  ;;  %v4315_v45 = vld [vmem:[#allocation2 + $0x28] sm:$0xff] }
 0x2e6   : > { %6909 = vmatprep.mubr.msk.f32.mxu0 %vm2159_vm4, %v9696_v55  ;;  %v7826_v55 = vmov 0.0|0.0   ;;  %v7428_v34 = vpack.c.bf16 %v4315_v45, %v4314_v8 }
 0x2e7   : > { %7427 = vmatprep.subr.bf16.mxu0 %v7826_v55  ;;  %7490 = vmatprep.subr.bf16.mxu1 %v7826_v55 }
 0x2e8   : > { %7492 = vmatpush3.bf16.msra.mxu1 %v7428_v34 }
 0x2e9   : > { %6910 = vmatmul.mubr.msk.f32.gmra.mrb[6].mxu0 %vm2159_vm4, %v9714_v54  ;;  %v4317_v54 = vld [vmem:[#allocation2 + $0x38] sm:$0x3f]  ;;  %7491 = vmatprep.subr.bf16.mxu1 %v7826_v55 }
 0x2ea   : > { %6912 = vmatprep.mubr.msk.f32.mxu0 %vm2159_vm4, %v9727_v1  ;;  %v7431_v3 = vpack.c.bf16 %v4317_v54, %v4316_v42  ;;  %v7828_v1 = vmov 0.0  }
 0x2eb   : > { %6988 = vmatprep.mubr.msk.f32.mxu1 %vm7827_vm5, %v7828_v1 }
 0x2ec   : > { %7493 = vmatpush3.bf16.msk.msra.mxu1 %vm9042_vm3, %v7431_v3 }
 0x2ed   : > { %6913 = vmatmul.mubr.msk.f32.gmra.mrb[8].mxu0 %vm2159_vm4, %v9756_v51  ;;  %7434 = vmatprep.subr.bf16.mxu1 %v7826_v55 }
 0x2ee   : > { %6915 = vmatprep.mubr.msk.f32.mxu0 %vm2159_vm4, %v9763_v22 }
 0x2f1   : > { %6916 = vmatmul.mubr.msk.f32.gmra.mrb[10].mxu0 %vm2159_vm4, %v9797_v33 }
 0x2f2   : > { %6918 = vmatprep.mubr.msk.f32.mxu0 %vm2159_vm4, %v9810_v16 }
 0x2f5   : > { %6919 = vmatmul.mubr.msk.f32.gmra.mrb[12].mxu0 %vm2159_vm4, %v11575_v23 }
 0x2f6   : > { %6921 = vmatprep.mubr.msk.f32.mxu0 %vm2159_vm4, %v11576_v13 }
 0x2f9   : > { %6922 = vmatmul.mubr.msk.f32.gmra.mrb[14].mxu0 %vm2159_vm4, %v10153_v0 }
 0x2fa   : > { %6924 = vmatprep.mubr.msk.f32.mxu0 %vm2159_vm4, %v10159_v24 }
 0x2fd   : > { %6925 = vmatmul.mubr.msk.f32.gmra.mrb[16].mxu0 %vm2159_vm4, %v3658_v36 }
 0x2fe   : > { %6927 = vmatprep.mubr.msk.f32.mxu0 %vm2159_vm4, %v3660_v48 }
 0x301   : > { %6928 = vmatmul.mubr.msk.f32.gmra.mrb[18].mxu0 %vm2159_vm4, %v3659_v29 }
 0x302   : > { %6938 = vmatprep.mubr.msk.f32.mxu0 %vm2159_vm4, %v9947_v63 }
 0x305   : > { %6939 = vmatmul.mubr.msk.f32.vlgmr.msra.gmra.mrb[0].mxu0 %vm2159_vm4, %v9955_v12 }
 0x306   : > { %6941 = vmatprep.mubr.msk.f32.mxu0 %vm2159_vm4, %v9961_v41  ;;  %7429 = vmatpush3.bf16.msra.mxu0 %v7428_v34 }
 0x307   : > { %7430 = vmatprep.subr.bf16.mxu0 %v7826_v55 }
 0x309   : > { %6942 = vmatmul.mubr.msk.f32.gmra.mrb[2].mxu0 %vm2159_vm4, %v9967_v57 }
 0x30a   : > { %6944 = vmatprep.mubr.msk.f32.mxu0 %vm2159_vm4, %v9973_v20  ;;  %7433 = vmatpush3.bf16.msk.msra.mxu0 %vm9042_vm3, %v7431_v3 }
 0x30d   : > { %6945 = vmatmul.mubr.msk.f32.gmra.mrb[4].mxu0 %vm2159_vm4, %v9979_v52 }
 0x30e   : > { %6947 = vmatprep.mubr.msk.f32.mxu0 %vm2159_vm4, %v9985_v56 }
 0x311   : > { %6948 = vmatmul.mubr.msk.f32.gmra.mrb[6].mxu0 %vm2159_vm4, %v9991_v5 }
 0x312   : > { %6950 = vmatprep.mubr.msk.f32.mxu0 %vm2159_vm4, %v9997_v11 }
 0x315   : > { %6951 = vmatmul.mubr.msk.f32.gmra.mrb[8].mxu0 %vm2159_vm4, %v10003_v2 }
 0x316   : > { %6953 = vmatprep.mubr.msk.f32.mxu0 %vm2159_vm4, %v10009_v35 }
 0x319   : > { %6954 = vmatmul.mubr.msk.f32.gmra.mrb[10].mxu0 %vm2159_vm4, %v10015_v50 }
 0x31a   : > { %6956 = vmatprep.mubr.msk.f32.mxu0 %vm2159_vm4, %v10021_v40 }
 0x31d   : > { %6957 = vmatmul.mubr.msk.f32.gmra.mrb[12].mxu0 %vm2159_vm4, %v10029_v46 }
 0x31e   : > { %6959 = vmatprep.mubr.msk.f32.mxu0 %vm2159_vm4, %v10035_v32 }
 0x321   : > { %6960 = vmatmul.mubr.msk.f32.gmra.mrb[14].mxu0 %vm2159_vm4, %v10221_v44 }
 0x322   : > { %6962 = vmatprep.mubr.msk.f32.mxu0 %vm2159_vm4, %v10227_v30 }
 0x325   : > { %6963 = vmatmul.mubr.msk.f32.gmra.mrb[16].mxu0 %vm2159_vm4, %v3861_v28 }
 0x326   : > { %6965 = vmatprep.mubr.msk.f32.mxu0 %vm2159_vm4, %v3863_v9 }
 0x329   : > { %6966 = vmatmul.mubr.msk.f32.gmra.mrb[18].mxu0 %vm2159_vm4, %v3862_v17 }
 0x32a   : > { %6976 = vmatprep.mubr.msk.f32.mxu0 %vm7827_vm5, %v7828_v1 }
 0x3d8   : > { %v6940_v51 = vpop.f32.mrb[0].mxu0 }
 0x3d9   : > { %v4066_v22 = vadd.f32 %v6940_v51, %v10399_v43  ;;  %v3939_v25 = vpop.f32.mrb[1].mxu0 }
 0x3da   : > { %v4065_v15 = vadd.f32 %v10399_v43, %v3939_v25 }
 0x3db   : > { %v4086_v53 = vmax.f32 %v4066_v22, 0.0 }
 0x3dc   : > { %v4085_v33 = vmax.f32 %v4065_v15, 0.0  ;;  %v6943_v59 = vpop.f32.mrb[2].mxu0 }
 0x3dd   : > { %v4126_v16 = vrot.slane %v4086_v53, 1  ;;  %v4203_v10 = vrot.slane %v4086_v53, 2  ;;  %v4068_v37 = vadd.f32 %v6943_v59, %v10399_v43  ;;  %v3949_v26 = vpop.f32.mrb[3].mxu0 }
 0x3de   : > { %v4125_v38 = vrot.slane %v4085_v33, 1  ;;  %v4202_v63 = vrot.slane %v4085_v33, 2  ;;  %v4067_v12 = vadd.f32 %v10399_v43, %v3949_v26 }
 0x3df   : > { %v4088_v41 = vmax.f32 %v4068_v37, 0.0 }
 0x3e0   : > { %v4127_v57 = vsel %vm594_vm1, %v4125_v38, %v4126_v16  ;;  %v4204_v20 = vsel %vm770_vm0, %v4202_v63, %v4203_v10  ;;  %v4087_v52 = vmax.f32 %v4067_v12, 0.0  ;;  %v6946_v56 = vpop.f32.mrb[4].mxu0 }
 0x3e1   : > { %v4183_v5 = vmax.f32 %v4085_v33, %v4127_v57  ;;  %v4130_v11 = vrot.slane %v4088_v41, 1  ;;  %v4207_v2 = vrot.slane %v4088_v41, 2  ;;  %v4070_v35 = vadd.f32 %v6946_v56, %v10399_v43  ;;  %v3959_v50 = vpop.f32.mrb[5].mxu0 }
 0x3e2   : > { %v4128_v40 = vrot.slane %v4087_v52, 1  ;;  %v4205_v46 = vrot.slane %v4087_v52, 2  ;;  %v4069_v32 = vadd.f32 %v10399_v43, %v3959_v50 }
 0x3e3   : > { %v4260_v23 = vmax.f32 %v4183_v5, %v4204_v20  ;;  %v4090_v4 = vmax.f32 %v4070_v35, 0.0 }
 0x3e4   : > { %v4129_v13 = vsel %vm594_vm1, %v4126_v16, %v4128_v40  ;;  %v4131_v0 = vsel %vm594_vm1, %v4128_v40, %v4130_v11  ;;  %v4206_v24 = vsel %vm770_vm0, %v4203_v10, %v4205_v46  ;;  %v4208_v21 = vsel %vm770_vm0, %v4205_v46, %v4207_v2  ;;  %v6949_v6 = vpop.f32.mrb[6].mxu0 }
 0x3e5   : > { %v4184_v47 = vmax.f32 %v4086_v53, %v4129_v13  ;;  %v4185_v44 = vmax.f32 %v4087_v52, %v4131_v0  ;;  %v4134_v30 = vrot.slane %v4090_v4, 1  ;;  %v3969_v58 = vpop.f32.mrb[7].mxu0  ;;  %v4211_v27 = vrot.slane %v4090_v4, 2 }
 0x3e6   : > { %v4089_v19 = vmax.f32 %v4069_v32, 0.0  ;;  %v4072_v18 = vadd.f32 %v6949_v6, %v10399_v43  ;;  %v4071_v60 = vadd.f32 %v10399_v43, %v3969_v58 }
 0x3e7   : > { %v4261_v61 = vmax.f32 %v4184_v47, %v4206_v24  ;;  %v4262_v49 = vmax.f32 %v4185_v44, %v4208_v21 }
 0x3e8   : > { %v4132_v39 = vrot.slane %v4089_v19, 1  ;;  %v4209_v14 = vrot.slane %v4089_v19, 2  ;;  %v10415_v7 = vmax.f32 %v4072_v18, 0.0  ;;  %v4091_v29 = vmax.f32 %v4071_v60, 0.0  ;;  %v6952_v36 = vpop.f32.mrb[8].mxu0 }
 0x3e9   : > { %v4279_v48 = vmax.f32 %v4260_v23, %v4262_v49  ;;  %v4074_v31 = vadd.f32 %v6952_v36, %v10399_v43  ;;  %v3979_v17 = vpop.f32.mrb[9].mxu0 }
 0x3ea   : > { %v4133_v28 = vsel %vm594_vm1, %v4130_v11, %v4132_v39  ;;  %v4135_v9 = vsel %vm594_vm1, %v4132_v39, %v4134_v30  ;;  %v4210_v8 = vsel %vm770_vm0, %v4207_v2, %v4209_v14  ;;  %v4212_v45 = vsel %vm770_vm0, %v4209_v14, %v4211_v27 }
 0x3eb   : > { %v4186_v34 = vmax.f32 %v4088_v41, %v4133_v28  ;;  %v4187_v42 = vmax.f32 %v4089_v19, %v4135_v9  ;;  %v4138_v54 = vrot.slane %v10415_v7, 1  ;;  %v4215_v3 = vrot.slane %v10415_v7, 2 }
 0x3ec   : > { %v4136_v51 = vrot.slane %v4091_v29, 1  ;;  %v4213_v22 = vrot.slane %v4091_v29, 2  ;;  %v10424_v25 = vmax.f32 %v4074_v31, 0.0  ;;  %v4073_v15 = vadd.f32 %v10399_v43, %v3979_v17  ;;  %v6955_v53 = vpop.f32.mrb[10].mxu0 }
 0x3ed   : > { %v4263_v33 = vmax.f32 %v4186_v34, %v4210_v8  ;;  %v4264_v59 = vmax.f32 %v4187_v42, %v4212_v45  ;;  %v4076_v16 = vadd.f32 %v6955_v53, %v10399_v43  ;;  %v3989_v10 = vpop.f32.mrb[11].mxu0 }
 0x3ee   : > { %v4137_v37 = vsel %vm594_vm1, %v4134_v30, %v4136_v51  ;;  %v4139_v26 = vsel %vm594_vm1, %v4136_v51, %v4138_v54  ;;  %v4214_v38 = vsel %vm770_vm0, %v4211_v27, %v4213_v22  ;;  %v4216_v63 = vsel %vm770_vm0, %v4213_v22, %v4215_v3 }
 0x3ef   : > { %v4280_v12 = vmax.f32 %v4261_v61, %v4263_v33  ;;  %v4281_v41 = vmax.f32 %v4262_v49, %v4264_v59  ;;  %v10432_v57 = vmax.f32 %v4279_v48, %v4264_v59  ;;  %v4188_v20 = vmax.f32 %v4090_v4, %v4137_v37 }
 0x3f0   : > { %v4189_v52 = vmax.f32 %v4091_v29, %v4139_v26  ;;  %v4142_v56 = vrot.slane %v10424_v25, 1  ;;  %v4219_v5 = vrot.slane %v10424_v25, 2  ;;  %v4093_v11 = vmax.f32 %v4073_v15, 0.0  ;;  %v6958_v2 = vpop.f32.mrb[12].mxu0 }
 0x3f1   : > { %v10436_v35 = vmax.f32 %v4188_v20, %v4214_v38  ;;  %v10438_v50 = vmax.f32 %v4076_v16, 0.0  ;;  %v4075_v40 = vadd.f32 %v10399_v43, %v3989_v10  ;;  %v4078_v46 = vadd.f32 %v6958_v2, %v10399_v43  ;;  %v3999_v32 = vpop.f32.mrb[13].mxu0 }
 0x3f2   : > { %v4266_v23 = vmax.f32 %v4189_v52, %v4216_v63  ;;  %v4140_v13 = vrot.slane %v4093_v11, 1  ;;  %v4217_v0 = vrot.slane %v4093_v11, 2  ;;  %v4077_v4 = vadd.f32 %v10399_v43, %v3999_v32 }
 0x3f3   : > { %v4282_v24 = vmax.f32 %v4263_v33, %v10436_v35  ;;  %v10445_v21 = vmax.f32 %v4280_v12, %v10436_v35  ;;  %v4146_v6 = vrot.slane %v10438_v50, 1  ;;  %v4223_v47 = vrot.slane %v10438_v50, 2 }
 0x3f4   : > { %v4283_v44 = vmax.f32 %v4264_v59, %v4266_v23  ;;  %v10449_v30 = vmax.f32 %v4281_v41, %v4266_v23  ;;  %v4141_v58 = vsel %vm594_vm1, %v4138_v54, %v4140_v13  ;;  %v4143_v27 = vsel %vm594_vm1, %v4140_v13, %v4142_v56  ;;  %v6961_v19 = vpop.f32.mrb[14].mxu0 }
 0x3f5   : > { %v4190_v18 = vmax.f32 %v10415_v7, %v4141_v58  ;;  %v4191_v60 = vmax.f32 %v4093_v11, %v4143_v27  ;;  %v4218_v61 = vsel %vm770_vm0, %v4215_v3, %v4217_v0  ;;  %v4220_v49 = vsel %vm770_vm0, %v4217_v0, %v4219_v5  ;;  %v4009_v39 = vpop.f32.mrb[15].mxu0 }
 0x3f6   : > { %v4095_v14 = vmax.f32 %v4075_v40, 0.0  ;;  %v10456_v29 = vmax.f32 %v4078_v46, 0.0  ;;  %v4097_v36 = vmax.f32 %v4077_v4, 0.0  ;;  %v4080_v48 = vadd.f32 %v6961_v19, %v10399_v43 }
 0x3f7   : > { %v4267_v31 = vmax.f32 %v4190_v18, %v4218_v61  ;;  %v4268_v17 = vmax.f32 %v4191_v60, %v4220_v49  ;;  %v4079_v28 = vadd.f32 %v10399_v43, %v4009_v39  ;;  %v4329_v9 = vrot.slane %v10432_v57, 1  ;;  %v4309_v18 = vld [vmem:[#allocation2] sm:$0xff]  ;;  %v4310_v60 = vld [vmem:[#allocation2 + $0x8] sm:$0xff] }
 0x3f8   : > { %v4144_v8 = vrot.slane %v4095_v14, 1  ;;  %v4221_v7 = vrot.slane %v4095_v14, 2  ;;  %v4150_v45 = vrot.slane %v10456_v29, 1  ;;  %v4227_v34 = vrot.slane %v10456_v29, 2  ;;  %v6964_v42 = vpop.f32.mrb[16].mxu0 }
 0x3f9   : > { %v4284_v54 = vmax.f32 %v10436_v35, %v4267_v31  ;;  %v4285_v3 = vmax.f32 %v4266_v23, %v4268_v17  ;;  %v10464_v51 = vmax.f32 %v4282_v24, %v4267_v31  ;;  %v10466_v22 = vmax.f32 %v4283_v44, %v4268_v17  ;;  %v4019_v15 = vpop.f32.mrb[17].mxu0 }
 0x3fa   : > { %v4145_v53 = vsel %vm594_vm1, %v4142_v56, %v4144_v8  ;;  %v4147_v33 = vsel %vm594_vm1, %v4144_v8, %v4146_v6  ;;  %v4222_v59 = vsel %vm770_vm0, %v4219_v5, %v4221_v7  ;;  %v4224_v16 = vsel %vm770_vm0, %v4221_v7, %v4223_v47 }
 0x3fb   : > { %v4192_v10 = vmax.f32 %v10424_v25, %v4145_v53  ;;  %v4193_v37 = vmax.f32 %v4095_v14, %v4147_v33  ;;  %v4148_v26 = vrot.slane %v4097_v36, 1  ;;  %v4225_v38 = vrot.slane %v4097_v36, 2 }
 0x3fc   : > { %v10473_v63 = vmax.f32 %v4080_v48, 0.0  ;;  %v4099_v12 = vmax.f32 %v4079_v28, 0.0  ;;  %v4330_v41 = vrot.slane %v10445_v21, 1  ;;  %v4082_v20 = vadd.f32 %v6964_v42, %v10399_v43  ;;  %v6967_v52 = vpop.f32.mrb[18].mxu0 }
 0x3fd   : > { %v4269_v56 = vmax.f32 %v4192_v10, %v4222_v59  ;;  %v4270_v11 = vmax.f32 %v4193_v37, %v4224_v16  ;;  %v4149_v2 = vsel %vm594_vm1, %v4146_v6, %v4148_v26  ;;  %v4151_v5 = vsel %vm594_vm1, %v4148_v26, %v4150_v45  ;;  %v4029_v35 = vpop.f32.mrb[19].mxu0 }
 0x3fe   : > { %v4194_v25 = vmax.f32 %v10438_v50, %v4149_v2  ;;  %v4195_v40 = vmax.f32 %v4097_v36, %v4151_v5  ;;  %v4226_v46 = vsel %vm770_vm0, %v4223_v47, %v4225_v38  ;;  %v4228_v32 = vsel %vm770_vm0, %v4225_v38, %v4227_v34 }
 0x3ff   : > { %v4286_v23 = vmax.f32 %v4267_v31, %v4269_v56  ;;  %v4287_v13 = vmax.f32 %v4268_v17, %v4270_v11  ;;  %v10482_v0 = vmax.f32 %v4284_v54, %v4269_v56  ;;  %v10484_v4 = vmax.f32 %v4285_v3, %v4270_v11 }
 0x400   : > { %v10486_v24 = vmax.f32 %v4194_v25, %v4226_v46  ;;  %v10488_v44 = vmax.f32 %v4195_v40, %v4228_v32  ;;  %v4154_v6 = vrot.slane %v10473_v63, 1  ;;  %v4231_v58 = vrot.slane %v10473_v63, 2  ;;  %v4311_v32 = vld [vmem:[#allocation2 + $0x10] sm:$0xff] }
 0x401   : > { %v4152_v50 = vrot.slane %v4099_v12, 1  ;;  %v4229_v27 = vrot.slane %v4099_v12, 2  ;;  %v4331_v47 = vsel %vm594_vm1, %v4329_v9, %v4330_v41  ;;  %v10493_v19 = vmax.f32 %v4082_v20, 0.0 }
 0x402   : > { %v4288_v61 = vmax.f32 %v4269_v56, %v10486_v24  ;;  %v4289_v49 = vmax.f32 %v4270_v11, %v10488_v44  ;;  %v10498_v39 = vmax.f32 %v4286_v23, %v10486_v24  ;;  %v10501_v14 = vmax.f32 %v4287_v13, %v10488_v44  ;;  %6977 = vmatmul.mubr.msk.f32.vlgmr.msra.gmra.mrb[20].mxu0 %vm2159_vm4, %v4331_v47  ;;  %v4312_v23 = vld [vmem:[#allocation2 + $0x18] sm:$0x3f] }
 0x403   : > { %v4153_v36 = vsel %vm594_vm1, %v4150_v45, %v4152_v50  ;;  %v4155_v48 = vsel %vm594_vm1, %v4152_v50, %v4154_v6  ;;  %v4230_v31 = vsel %vm770_vm0, %v4227_v34, %v4229_v27  ;;  %v4232_v17 = vsel %vm770_vm0, %v4229_v27, %v4231_v58  ;;  %6979 = vmatprep.mubr.msk.f32.mxu0 %vm7827_vm5, %v7828_v1 }
 0x404   : > { %v4196_v28 = vmax.f32 %v10456_v29, %v4153_v36  ;;  %v4197_v9 = vmax.f32 %v4099_v12, %v4155_v48  ;;  %v4158_v8 = vrot.slane %v10493_v19, 1  ;;  %v7435_v7 = vpack.c.bf16 %v4310_v60, %v4309_v18 }
 0x405   : > { %v4081_v42 = vadd.f32 %v10399_v43, %v4019_v15  ;;  %v4332_v54 = vrot.slane %v10449_v30, 1  ;;  %v4084_v45 = vadd.f32 %v6967_v52, %v10399_v43  ;;  %v4083_v3 = vadd.f32 %v10399_v43, %v4029_v35 }
 0x406   : > { %v10516_v34 = vmax.f32 %v4196_v28, %v4230_v31  ;;  %v10518_v53 = vmax.f32 %v4197_v9, %v4232_v17  ;;  %v4235_v33 = vrot.slane %v10493_v19, 2  ;;  %v4334_v29 = vrot.slane %v10464_v51, 1 }
 0x407   : > { %v4101_v59 = vmax.f32 %v4081_v42, 0.0  ;;  %v4333_v16 = vsel %vm594_vm1, %v4330_v41, %v4332_v54  ;;  %v4104_v10 = vmax.f32 %v4084_v45, 0.0  ;;  %v4103_v37 = vmax.f32 %v4083_v3, 0.0 }
 0x408   : > { %v10524_v15 = vmax.f32 %v4288_v61, %v10516_v34  ;;  %v10527_v26 = vmax.f32 %v4289_v49, %v10518_v53  ;;  %6980 = vmatmul.mubr.msk.f32.gmra.mrb[22].mxu0 %vm2159_vm4, %v4333_v16  ;;  %v4336_v43 = vrot.slane %v10466_v22, 1  ;;  %v4338_v38 = vrot.slane %v10482_v0, 1 }
 0x409   : > { %v4156_v12 = vrot.slane %v4101_v59, 1  ;;  %v4233_v20 = vrot.slane %v4101_v59, 2  ;;  %v4162_v52 = vrot.slane %v4104_v10, 1  ;;  %v4239_v56 = vrot.slane %v4104_v10, 2  ;;  %6982 = vmatprep.mubr.msk.f32.mxu0 %vm7827_vm5, %v7828_v1 }
 0x40a   : > { %v4160_v41 = vrot.slane %v4103_v37, 1  ;;  %v4237_v11 = vrot.slane %v4103_v37, 2  ;;  %v10535_v2 = vsel %vm594_vm1, %v4332_v54, %v4334_v29  ;;  %v10538_v5 = vsel %vm594_vm1, %v4336_v43, %v4338_v38 }
 0x40b   : > { %v4157_v35 = vsel %vm594_vm1, %v4154_v6, %v4156_v12  ;;  %v4159_v25 = vsel %vm594_vm1, %v4156_v12, %v4158_v8  ;;  %v4234_v40 = vsel %vm770_vm0, %v4231_v58, %v4233_v20  ;;  %v4236_v46 = vsel %vm770_vm0, %v4233_v20, %v4235_v33  ;;  %6989 = vmatmul.mubr.msk.f32.vlgmr.msra.gmra.mrb[0].mxu1 %vm2159_vm4, %v10538_v5  ;;  %v4642_v12 = vld [vmem:[#allocation2 + $0x48] sm:$0xff] }
 0x40c   : > { %v4198_v13 = vmax.f32 %v10473_v63, %v4157_v35  ;;  %v4199_v50 = vmax.f32 %v4101_v59, %v4159_v25  ;;  %v4161_v27 = vsel %vm594_vm1, %v4158_v8, %v4160_v41  ;;  %v4163_v47 = vsel %vm594_vm1, %v4160_v41, %v4162_v52  ;;  %6983 = vmatmul.mubr.msk.f32.gmra.mrb[24].mxu0 %vm2159_vm4, %v10535_v2  ;;  %v4643_v52 = vld [vmem:[#allocation2 + $0x50] sm:$0xff] }
 0x40d   : > { %v4200_v6 = vmax.f32 %v10493_v19, %v4161_v27  ;;  %v4201_v58 = vmax.f32 %v4103_v37, %v4163_v47  ;;  %v4238_v18 = vsel %vm770_vm0, %v4235_v33, %v4237_v11  ;;  %v4240_v60 = vsel %vm770_vm0, %v4237_v11, %v4239_v56  ;;  %7436 = vmatpush3.bf16.msra.mxu1 %v7435_v7  ;;  %v4644_v56 = vld [vmem:[#allocation2 + $0x58] sm:$0x3f]  ;;  %v4824_v11 = vld [vmem:[#allocation2 + $0x68] sm:$0xff]  ;;  %v4825_v25 = vld [vmem:[#allocation2 + $0x70] sm:$0xff] }
 0x40e   : > { %v4276_v61 = vmax.f32 %v4199_v50, %v4236_v46  ;;  %6985 = vmatprep.mubr.msk.f32.mxu0 %vm7827_vm5, %v7828_v1  ;;  %6991 = vmatprep.mubr.msk.f32.mxu1 %vm7827_vm5, %v7828_v1  ;;  %v4340_v63 = vrot.slane %v10484_v4, 1  ;;  %v7438_v49 = vpack.c.bf16 %v4312_v23, %v4311_v32  ;;  %v10560_v48 = vsel %vm594_vm1, %v4334_v29, %v4336_v43 }
 0x40f   : > { %v4278_v36 = vmax.f32 %v4201_v58, %v4240_v60  ;;  %7437 = vmatprep.subr.bf16.mxu1 %v7826_v55  ;;  %v4342_v31 = vrot.slane %v10498_v39, 1  ;;  %v4645_v17 = vrot.slane %v10432_v57, 2  ;;  %v4646_v28 = vrot.slane %v10445_v21, 2 }
 0x410   : > { %6986 = vmatmul.mubr.msk.f32.gmra.mrb[26].mxu0 %vm2159_vm4, %v10560_v48  ;;  %v10566_v19 = vsel %vm594_vm1, %v4338_v38, %v4340_v63  ;;  %v4344_v7 = vrot.slane %v10501_v14, 1  ;;  %v4275_v42 = vmax.f32 %v4198_v13, %v4234_v40  ;;  %v4290_v54 = vmax.f32 %v10486_v24, %v10516_v34  ;;  %v4641_v38 = vld [vmem:[#allocation2 + $0x40] sm:$0xff]  ;;  %v4826_v40 = vld [vmem:[#allocation2 + $0x78] sm:$0x3f] }
 0x411   : > { %6992 = vmatmul.mubr.msk.f32.gmra.mrb[2].mxu1 %vm2159_vm4, %v10566_v19  ;;  %v10580_v9 = vsel %vm770_vm0, %v4645_v17, %v4646_v28  ;;  %v10584_v8 = vsel %vm594_vm1, %v4340_v63, %v4342_v31  ;;  %v4291_v45 = vmax.f32 %v10488_v44, %v10518_v53  ;;  %v4277_v3 = vmax.f32 %v4200_v6, %v4238_v18 }
 0x412   : > { %6994 = vmatprep.mubr.msk.f32.mxu1 %vm7827_vm5, %v7828_v1  ;;  %7440 = vmatpush3.bf16.msk.msra.mxu1 %vm9042_vm3, %v7438_v49  ;;  %v4293_v33 = vmax.f32 %v10518_v53, %v4276_v61  ;;  %v10597_v29 = vsel %vm594_vm1, %v4342_v31, %v4344_v7  ;;  %v4346_v59 = vrot.slane %v10524_v15, 1  ;;  %v10600_v16 = vmax.f32 %v4290_v54, %v4275_v42  ;;  %v4970_v54 = vld [vmem:[#allocation2 + $0x90] sm:$0xff] }
 0x413   : > { %7441 = vmatprep.subr.bf16.mxu1 %v7826_v55  ;;  %v4292_v10 = vmax.f32 %v10516_v34, %v4275_v42  ;;  %v10605_v37 = vmax.f32 %v4291_v45, %v4276_v61  ;;  %v10617_v43 = vrot.slane %v10527_v26, 1  ;;  %v7442_v20 = vpack.c.bf16 %v4642_v12, %v4641_v38  ;;  %v4971_v45 = vld [vmem:[#allocation2 + $0x98] sm:$0x3f] }
 0x414   : > { %v10607_v24 = vmax.f32 %v4293_v33, %v4278_v36  ;;  %v10614_v53 = vsel %vm594_vm1, %v4344_v7, %v4346_v59  ;;  %v7445_v41 = vpack.c.bf16 %v4644_v56, %v4643_v52  ;;  %v4648_v46 = vrot.slane %v10449_v30, 2  ;;  %v4969_v7 = vld [vmem:[#allocation2 + $0x88] sm:$0xff] }
 0x415   : > { %6995 = vmatmul.mubr.msk.f32.gmra.mrb[4].mxu1 %vm2159_vm4, %v10584_v8  ;;  %v10611_v44 = vmax.f32 %v4292_v10, %v4277_v3  ;;  %v10625_v34 = vsel %vm594_vm1, %v4346_v59, %v10617_v43  ;;  %v7452_v32 = vpack.c.bf16 %v4826_v40, %v4825_v25  ;;  %v4650_v13 = vrot.slane %v10464_v51, 2  ;;  %v5119_v59 = vld [vmem:[#allocation2 + $0xb0] sm:$0xff]  ;;  %v5120_v10 = vld [vmem:[#allocation2 + $0xb8] sm:$0x3f]  ;;  %v5267_v52 = vld [vmem:[#allocation2 + $0xc8] sm:$0xff] }
 0x416   : > { %6997 = vmatprep.mubr.msk.f32.mxu1 %vm7827_vm5, %v7828_v1  ;;  %v4649_v23 = vsel %vm770_vm0, %v4646_v28, %v4648_v46  ;;  %v4652_v27 = vrot.slane %v10466_v22, 2  ;;  %v4654_v47 = vrot.slane %v10482_v0, 2  ;;  %v4656_v58 = vrot.slane %v10484_v4, 2 }
 0x417   : > { %v10700_v50 = vsel %vm770_vm0, %v4648_v46, %v4650_v13  ;;  %v4658_v60 = vrot.slane %v10498_v39, 2  ;;  %v4660_v63 = vrot.slane %v10501_v14, 2  ;;  %v4662_v36 = vrot.slane %v10524_v15, 2 }
 0x418   : > { %v10716_v6 = vsel %vm770_vm0, %v4652_v27, %v4654_v47  ;;  %v10724_v18 = vsel %vm770_vm0, %v4654_v47, %v4656_v58  ;;  %v10751_v17 = vrot.slane %v10527_v26, 2  ;;  %v7459_v3 = vpack.c.bf16 %v4971_v45, %v4970_v54 }
 0x419   : > { %6998 = vmatmul.mubr.msk.f32.gmra.mrb[6].mxu1 %vm2159_vm4, %v10597_v29  ;;  %v10732_v61 = vsel %vm770_vm0, %v4656_v58, %v4658_v60  ;;  %v10740_v49 = vsel %vm770_vm0, %v4658_v60, %v4660_v63  ;;  %v10748_v31 = vsel %vm770_vm0, %v4660_v63, %v4662_v36  ;;  %v7466_v38 = vpack.c.bf16 %v5120_v10, %v5119_v59 }
 0x41a   : > { %7000 = vmatprep.mubr.msk.f32.mxu1 %vm7827_vm5, %v7828_v1  ;;  %v10759_v28 = vsel %vm770_vm0, %v4662_v36, %v10751_v17  ;;  %v10859_v12 = vrot.slane %v10605_v37, 1  ;;  %v5121_v45 = vrot.slane %v10600_v16, 2 }
 0x41d   : > { %7001 = vmatmul.mubr.msk.f32.gmra.mrb[8].mxu1 %vm2159_vm4, %v10614_v53 }
 0x41e   : > { %7003 = vmatprep.mubr.msk.f32.mxu1 %vm7827_vm5, %v7828_v1 }
 0x421   : > { %7004 = vmatmul.mubr.msk.f32.gmra.mrb[10].mxu1 %vm2159_vm4, %v10625_v34 }
 0x422   : > { %7006 = vmatprep.mubr.msk.f32.mxu1 %vm7827_vm5, %v7828_v1 }
 0x425   : > { %7007 = vmatmul.mubr.msk.f32.gmra.mrb[12].mxu1 %vm2159_vm4, %v10617_v43 }
 0x426   : > { %7017 = vmatprep.mubr.msk.f32.mxu1 %vm7827_vm5, %v7828_v1 }
 0x429   : > { %7018 = vmatmul.mubr.msk.f32.vlgmr.msra.gmra.mrb[14].mxu1 %vm2159_vm4, %v10432_v57  ;;  %v4823_v57 = vld [vmem:[#allocation2 + $0x60] sm:$0xff] }
 0x42a   : > { %7443 = vmatpush3.bf16.msra.mxu1 %v7442_v20  ;;  %7020 = vmatprep.mubr.msk.f32.mxu1 %vm7827_vm5, %v7828_v1  ;;  %v7449_v35 = vpack.c.bf16 %v4824_v11, %v4823_v57  ;;  %v5268_v11 = vld [vmem:[#allocation2 + $0xd0] sm:$0xff] }
 0x42b   : > { %7444 = vmatprep.subr.bf16.mxu1 %v7826_v55 }
 0x42d   : > { %7021 = vmatmul.mubr.msk.f32.gmra.mrb[16].mxu1 %vm2159_vm4, %v10445_v21  ;;  %v10708_v21 = vsel %vm770_vm0, %v4650_v13, %v4652_v27 }
 0x42e   : > { %7023 = vmatprep.mubr.msk.f32.mxu1 %vm7827_vm5, %v7828_v1  ;;  %7447 = vmatpush3.bf16.msk.msra.mxu1 %vm9042_vm3, %v7445_v41 }
 0x42f   : > { %7448 = vmatprep.subr.bf16.mxu1 %v7826_v55 }
 0x431   : > { %7024 = vmatmul.mubr.msk.f32.gmra.mrb[18].mxu1 %vm2159_vm4, %v10449_v30 }
 0x432   : > { %7026 = vmatprep.mubr.msk.f32.mxu1 %vm7827_vm5, %v7828_v1 }
 0x435   : > { %7027 = vmatmul.mubr.msk.f32.gmra.mrb[20].mxu1 %vm2159_vm4, %v10464_v51 }
 0x436   : > { %7029 = vmatprep.mubr.msk.f32.mxu1 %vm7827_vm5, %v7828_v1 }
 0x439   : > { %7030 = vmatmul.mubr.msk.f32.gmra.mrb[22].mxu1 %vm2159_vm4, %v10466_v22 }
 0x43a   : > { %7032 = vmatprep.mubr.msk.f32.mxu1 %vm7827_vm5, %v7828_v1 }
 0x43d   : > { %7033 = vmatmul.mubr.msk.f32.gmra.mrb[24].mxu1 %vm2159_vm4, %v10482_v0 }
 0x43e   : > { %7035 = vmatprep.mubr.msk.f32.mxu1 %vm7827_vm5, %v7828_v1 }
 0x441   : > { %7036 = vmatmul.mubr.msk.f32.gmra.mrb[26].mxu1 %vm2159_vm4, %v10484_v4 }
 0x442   : > { %7038 = vmatprep.mubr.msk.f32.mxu1 %vm7827_vm5, %v7828_v1 }
 0x445   : > { %7039 = vmatmul.mubr.msk.f32.gmra.mrb[28].mxu1 %vm2159_vm4, %v10498_v39 }
 0x446   : > { %7041 = vmatprep.mubr.msk.f32.mxu1 %vm7827_vm5, %v7828_v1 }
 0x449   : > { %7042 = vmatmul.mubr.msk.f32.gmra.mrb[30].mxu1 %vm2159_vm4, %v10501_v14 }
 0x44a   : > { %7044 = vmatprep.mubr.msk.f32.mxu1 %vm7827_vm5, %v7828_v1 }
 0x44d   : > { %7045 = vmatmul.mubr.msk.f32.gmra.mrb[32].mxu1 %vm2159_vm4, %v10524_v15 }
 0x44e   : > { %7047 = vmatprep.mubr.msk.f32.mxu1 %vm7827_vm5, %v7828_v1 }
 0x451   : > { %7048 = vmatmul.mubr.msk.f32.gmra.mrb[34].mxu1 %vm2159_vm4, %v10527_v26 }
 0x452   : > { %7058 = vmatprep.mubr.msk.f32.mxu1 %vm7827_vm5, %v7828_v1 }
 0x455   : > { %7059 = vmatmul.mubr.msk.f32.vlgmr.msra.gmra.mrb[36].mxu1 %vm2159_vm4, %v10580_v9  ;;  %v4968_v9 = vld [vmem:[#allocation2 + $0x80] sm:$0xff] }
 0x456   : > { %7450 = vmatpush3.bf16.msra.mxu1 %v7449_v35  ;;  %7061 = vmatprep.mubr.msk.f32.mxu1 %vm7827_vm5, %v7828_v1  ;;  %v7456_v42 = vpack.c.bf16 %v4969_v7, %v4968_v9  ;;  %v5269_v35 = vld [vmem:[#allocation2 + $0xd8] sm:$0x3f] }
 0x457   : > { %7451 = vmatprep.subr.bf16.mxu1 %v7826_v55  ;;  %v7473_v25 = vpack.c.bf16 %v5269_v35, %v5268_v11  ;;  %v5413_v35 = vld [vmem:[#allocation2 + $0xf0] sm:$0xff] }
 0x459   : > { %7062 = vmatmul.mubr.msk.f32.gmra.mrb[38].mxu1 %vm2159_vm4, %v4649_v23 }
 0x45a   : > { %7064 = vmatprep.mubr.msk.f32.mxu1 %vm7827_vm5, %v7828_v1  ;;  %7454 = vmatpush3.bf16.msk.msra.mxu1 %vm9042_vm3, %v7452_v32 }
 0x45b   : > { %7455 = vmatprep.subr.bf16.mxu1 %v7826_v55 }
 0x45d   : > { %7065 = vmatmul.mubr.msk.f32.gmra.mrb[40].mxu1 %vm2159_vm4, %v10700_v50 }
 0x45e   : > { %7067 = vmatprep.mubr.msk.f32.mxu1 %vm7827_vm5, %v7828_v1 }
 0x461   : > { %7068 = vmatmul.mubr.msk.f32.gmra.mrb[42].mxu1 %vm2159_vm4, %v10708_v21 }
 0x462   : > { %7070 = vmatprep.mubr.msk.f32.mxu1 %vm7827_vm5, %v7828_v1 }
 0x465   : > { %7071 = vmatmul.mubr.msk.f32.gmra.mrb[44].mxu1 %vm2159_vm4, %v10716_v6 }
 0x466   : > { %7073 = vmatprep.mubr.msk.f32.mxu1 %vm7827_vm5, %v7828_v1 }
 0x469   : > { %7074 = vmatmul.mubr.msk.f32.gmra.mrb[46].mxu1 %vm2159_vm4, %v10724_v18 }
 0x46a   : > { %7076 = vmatprep.mubr.msk.f32.mxu1 %vm7827_vm5, %v7828_v1 }
 0x46d   : > { %7077 = vmatmul.mubr.msk.f32.gmra.mrb[48].mxu1 %vm2159_vm4, %v10732_v61 }
 0x46e   : > { %7079 = vmatprep.mubr.msk.f32.mxu1 %vm7827_vm5, %v7828_v1 }
 0x471   : > { %7080 = vmatmul.mubr.msk.f32.gmra.mrb[50].mxu1 %vm2159_vm4, %v10740_v49 }
 0x472   : > { %7082 = vmatprep.mubr.msk.f32.mxu1 %vm7827_vm5, %v7828_v1 }
 0x475   : > { %7083 = vmatmul.mubr.msk.f32.gmra.mrb[52].mxu1 %vm2159_vm4, %v10748_v31 }
 0x476   : > { %7085 = vmatprep.mubr.msk.f32.mxu1 %vm7827_vm5, %v7828_v1 }
 0x479   : > { %7086 = vmatmul.mubr.msk.f32.gmra.mrb[54].mxu1 %vm2159_vm4, %v10759_v28 }
 0x47a   : > { %7088 = vmatprep.mubr.msk.f32.mxu1 %vm7827_vm5, %v7828_v1 }
 0x47d   : > { %7089 = vmatmul.mubr.msk.f32.gmra.mrb[56].mxu1 %vm2159_vm4, %v10751_v17 }
 0x47e   : > { %7099 = vmatprep.mubr.msk.f32.mxu1 %vm7827_vm5, %v7828_v1 }
 0x481   : > { %7100 = vmatmul.mubr.msk.f32.vlgmr.msra.gmra.mrb[58].mxu1 %vm2159_vm4, %v10449_v30  ;;  %v5117_v30 = vld [vmem:[#allocation2 + $0xa0] sm:$0xff] }
 0x482   : > { %7457 = vmatpush3.bf16.msra.mxu1 %v7456_v42  ;;  %7102 = vmatprep.mubr.msk.f32.mxu1 %vm7827_vm5, %v7828_v1 }
 0x483   : > { %7458 = vmatprep.subr.bf16.mxu1 %v7826_v55 }
 0x485   : > { %7103 = vmatmul.mubr.msk.f32.gmra.mrb[60].mxu1 %vm2159_vm4, %v10464_v51  ;;  %v5118_v51 = vld [vmem:[#allocation2 + $0xa8] sm:$0xff] }
 0x486   : > { %7105 = vmatprep.mubr.msk.f32.mxu1 %vm7827_vm5, %v7828_v1  ;;  %7461 = vmatpush3.bf16.msk.msra.mxu1 %vm9042_vm3, %v7459_v3  ;;  %v7463_v33 = vpack.c.bf16 %v5118_v51, %v5117_v30  ;;  %v10930_v51 = vsel %vm770_vm0, %v10751_v17, %v5121_v45  ;;  %v5411_v17 = vld [vmem:[#allocation2 + $0xe0] sm:$0xff] }
 0x487   : > { %7462 = vmatprep.subr.bf16.mxu1 %v7826_v55 }
 0x489   : > { %7106 = vmatmul.mubr.msk.f32.gmra.mrb[62].mxu1 %vm2159_vm4, %v10466_v22 }
 0x48a   : > { %7108 = vmatprep.mubr.msk.f32.mxu1 %vm7827_vm5, %v7828_v1 }
 0x48d   : > { %7109 = vmatmul.mubr.msk.f32.gmra.mrb[64].mxu1 %vm2159_vm4, %v10482_v0 }
 0x48e   : > { %7111 = vmatprep.mubr.msk.f32.mxu1 %vm7827_vm5, %v7828_v1 }
 0x491   : > { %7112 = vmatmul.mubr.msk.f32.gmra.mrb[66].mxu1 %vm2159_vm4, %v10484_v4 }
 0x492   : > { %7114 = vmatprep.mubr.msk.f32.mxu1 %vm7827_vm5, %v7828_v1 }
 0x495   : > { %7115 = vmatmul.mubr.msk.f32.gmra.mrb[68].mxu1 %vm2159_vm4, %v10498_v39 }
 0x496   : > { %7117 = vmatprep.mubr.msk.f32.mxu1 %vm7827_vm5, %v7828_v1 }
 0x499   : > { %7118 = vmatmul.mubr.msk.f32.gmra.mrb[70].mxu1 %vm2159_vm4, %v10501_v14 }
 0x49a   : > { %7120 = vmatprep.mubr.msk.f32.mxu1 %vm7827_vm5, %v7828_v1 }
 0x49d   : > { %7121 = vmatmul.mubr.msk.f32.gmra.mrb[72].mxu1 %vm2159_vm4, %v10524_v15 }
 0x49e   : > { %7123 = vmatprep.mubr.msk.f32.mxu1 %vm7827_vm5, %v7828_v1 }
 0x4a1   : > { %7124 = vmatmul.mubr.msk.f32.gmra.mrb[74].mxu1 %vm2159_vm4, %v10527_v26 }
 0x4a2   : > { %7126 = vmatprep.mubr.msk.f32.mxu1 %vm7827_vm5, %v7828_v1 }
 0x4a5   : > { %7127 = vmatmul.mubr.msk.f32.gmra.mrb[76].mxu1 %vm2159_vm4, %v10600_v16 }
 0x4a6   : > { %7129 = vmatprep.mubr.msk.f32.mxu1 %vm7827_vm5, %v7828_v1 }
 0x4a9   : > { %7130 = vmatmul.mubr.msk.f32.gmra.mrb[78].mxu1 %vm2159_vm4, %v10605_v37 }
 0x4aa   : > { %7140 = vmatprep.mubr.msk.f32.mxu1 %vm7827_vm5, %v7828_v1 }
 0x4ad   : > { %7141 = vmatmul.mubr.msk.f32.vlgmr.msra.gmra.mrb[80].mxu1 %vm2159_vm4, %v10535_v2  ;;  %v4972_v2 = vrot.slane %v10600_v16, 1 }
 0x4ae   : > { %7464 = vmatpush3.bf16.msra.mxu1 %v7463_v33  ;;  %7143 = vmatprep.mubr.msk.f32.mxu1 %vm7827_vm5, %v7828_v1  ;;  %v10933_v33 = vrot.slane %v10605_v37, 2 }
 0x4af   : > { %7465 = vmatprep.subr.bf16.mxu1 %v7826_v55  ;;  %v10867_v20 = vsel %vm594_vm1, %v4972_v2, %v10859_v12 }
 0x4b1   : > { %7144 = vmatmul.mubr.msk.f32.gmra.mrb[82].mxu1 %vm2159_vm4, %v10560_v48  ;;  %v10856_v48 = vsel %vm594_vm1, %v10617_v43, %v4972_v2  ;;  %v5266_v43 = vld [vmem:[#allocation2 + $0xc0] sm:$0xff] }
 0x4b2   : > { %7146 = vmatprep.mubr.msk.f32.mxu1 %vm7827_vm5, %v7828_v1  ;;  %7468 = vmatpush3.bf16.msk.msra.mxu1 %vm9042_vm3, %v7466_v38  ;;  %v7470_v57 = vpack.c.bf16 %v5267_v52, %v5266_v43  ;;  %v10941_v38 = vsel %vm770_vm0, %v5121_v45, %v10933_v33  ;;  %v5412_v52 = vld [vmem:[#allocation2 + $0xe8] sm:$0xff] }
 0x4b3   : > { %7469 = vmatprep.subr.bf16.mxu1 %v7826_v55 }
 0x4b5   : > { %7147 = vmatmul.mubr.msk.f32.gmra.mrb[84].mxu1 %vm2159_vm4, %v10538_v5 }
 0x4b6   : > { %7149 = vmatprep.mubr.msk.f32.mxu1 %vm7827_vm5, %v7828_v1 }
 0x4b9   : > { %7150 = vmatmul.mubr.msk.f32.gmra.mrb[86].mxu1 %vm2159_vm4, %v10566_v19 }
 0x4ba   : > { %7152 = vmatprep.mubr.msk.f32.mxu1 %vm7827_vm5, %v7828_v1 }
 0x4bd   : > { %7153 = vmatmul.mubr.msk.f32.gmra.mrb[88].mxu1 %vm2159_vm4, %v10584_v8 }
 0x4be   : > { %7155 = vmatprep.mubr.msk.f32.mxu1 %vm7827_vm5, %v7828_v1 }
 0x4c1   : > { %7156 = vmatmul.mubr.msk.f32.gmra.mrb[90].mxu1 %vm2159_vm4, %v10597_v29 }
 0x4c2   : > { %7158 = vmatprep.mubr.msk.f32.mxu1 %vm7827_vm5, %v7828_v1 }
 0x4c5   : > { %7159 = vmatmul.mubr.msk.f32.gmra.mrb[92].mxu1 %vm2159_vm4, %v10614_v53 }
 0x4c6   : > { %7161 = vmatprep.mubr.msk.f32.mxu1 %vm7827_vm5, %v7828_v1 }
 0x4c9   : > { %7162 = vmatmul.mubr.msk.f32.gmra.mrb[94].mxu1 %vm2159_vm4, %v10625_v34 }
 0x4ca   : > { %7164 = vmatprep.mubr.msk.f32.mxu1 %vm7827_vm5, %v7828_v1 }
 0x4cd   : > { %7165 = vmatmul.mubr.msk.f32.gmra.mrb[96].mxu1 %vm2159_vm4, %v10856_v48 }
 0x4ce   : > { %7167 = vmatprep.mubr.msk.f32.mxu1 %vm7827_vm5, %v7828_v1 }
 0x4d1   : > { %7168 = vmatmul.mubr.msk.f32.gmra.mrb[98].mxu1 %vm2159_vm4, %v10867_v20 }
 0x4d2   : > { %7170 = vmatprep.mubr.msk.f32.mxu1 %vm7827_vm5, %v7828_v1 }
 0x4d5   : > { %7171 = vmatmul.mubr.msk.f32.gmra.mrb[100].mxu1 %vm2159_vm4, %v10859_v12  ;;  %v4441_v56 = vpop.f32.mrb[20].mxu0 }
 0x4d6   : > { %7181 = vmatprep.mubr.msk.f32.mxu1 %vm7827_vm5, %v7828_v1  ;;  %v6978_v41 = vpop.f32.mrb[21].mxu0 }
 0x4d9   : > { %7182 = vmatmul.mubr.msk.f32.vlgmr.msra.gmra.mrb[102].mxu1 %vm2159_vm4, %v10700_v50 }
 0x4da   : > { %7471 = vmatpush3.bf16.msra.mxu1 %v7470_v57  ;;  %7184 = vmatprep.mubr.msk.f32.mxu1 %vm7827_vm5, %v7828_v1 }
 0x4db   : > { %v4446_v40 = vpop.f32.mrb[22].mxu0  ;;  %7472 = vmatprep.subr.bf16.mxu1 %v7826_v55 }
 0x4dc   : > { %v6981_v46 = vpop.f32.mrb[23].mxu0 }
 0x4dd   : > { %7185 = vmatmul.mubr.msk.f32.gmra.mrb[104].mxu1 %vm2159_vm4, %v10708_v21 }
 0x4de   : > { %v10884_v32 = vpop.f32.mrb[0].mxu1  ;;  %7187 = vmatprep.mubr.msk.f32.mxu1 %vm7827_vm5, %v7828_v1  ;;  %7475 = vmatpush3.bf16.msk.msra.mxu1 %vm9042_vm3, %v7473_v25  ;;  %v5414_v25 = vld [vmem:[#allocation2 + $0xf8] sm:$0x3f] }
 0x4df   : > { %v4451_v23 = vpop.f32.mrb[24].mxu0  ;;  %v6990_v13 = vpop.f32.mrb[1].mxu1  ;;  %7476 = vmatprep.subr.bf16.mxu1 %v7826_v55 }
 0x4e0   : > { %v6984_v50 = vpop.f32.mrb[25].mxu0 }
 0x4e1   : > { %7188 = vmatmul.mubr.msk.f32.gmra.mrb[106].mxu1 %vm2159_vm4, %v10716_v6 }
 0x4e2   : > { %7190 = vmatprep.mubr.msk.f32.mxu1 %vm7827_vm5, %v7828_v1 }
 0x4e3   : > { %v4456_v27 = vpop.f32.mrb[26].mxu0 }
 0x4e4   : > { %v10895_v21 = vpop.f32.mrb[2].mxu1  ;;  %v6987_v47 = vpop.f32.mrb[27].mxu0 }
 0x4e5   : > { %v6993_v58 = vpop.f32.mrb[3].mxu1  ;;  %7191 = vmatmul.mubr.msk.f32.gmra.mrb[108].mxu1 %vm2159_vm4, %v10724_v18 }
 0x4e6   : > { %7193 = vmatprep.mubr.msk.f32.mxu1 %vm7827_vm5, %v7828_v1 }
 0x4e8   : > { %v10901_v60 = vpop.f32.mrb[4].mxu1 }
 0x4e9   : > { %v6996_v63 = vpop.f32.mrb[5].mxu1  ;;  %7194 = vmatmul.mubr.msk.f32.gmra.mrb[110].mxu1 %vm2159_vm4, %v10732_v61 }
 0x4ea   : > { %7196 = vmatprep.mubr.msk.f32.mxu1 %vm7827_vm5, %v7828_v1 }
 0x4ec   : > { %v10907_v36 = vpop.f32.mrb[6].mxu1 }
 0x4ed   : > { %v6999_v9 = vpop.f32.mrb[7].mxu1  ;;  %7197 = vmatmul.mubr.msk.f32.gmra.mrb[112].mxu1 %vm2159_vm4, %v10740_v49 }
 0x4ee   : > { %7199 = vmatprep.mubr.msk.f32.mxu1 %vm7827_vm5, %v7828_v1 }
 0x4f0   : > { %v10913_v7 = vpop.f32.mrb[8].mxu1 }
 0x4f1   : > { %v7002_v42 = vpop.f32.mrb[9].mxu1  ;;  %7200 = vmatmul.mubr.msk.f32.gmra.mrb[114].mxu1 %vm2159_vm4, %v10748_v31 }
 0x4f2   : > { %7202 = vmatprep.mubr.msk.f32.mxu1 %vm7827_vm5, %v7828_v1 }
 0x4f4   : > { %v10919_v54 = vpop.f32.mrb[10].mxu1 }
 0x4f5   : > { %v7005_v3 = vpop.f32.mrb[11].mxu1  ;;  %7203 = vmatmul.mubr.msk.f32.gmra.mrb[116].mxu1 %vm2159_vm4, %v10759_v28 }
 0x4f6   : > { %7205 = vmatprep.mubr.msk.f32.mxu1 %vm7827_vm5, %v7828_v1 }
 0x4f8   : > { %v10926_v30 = vpop.f32.mrb[12].mxu1 }
 0x4f9   : > { %v7008_v59 = vpop.f32.mrb[13].mxu1  ;;  %7206 = vmatmul.mubr.msk.f32.gmra.mrb[118].mxu1 %vm2159_vm4, %v10930_v51 }
 0x4fa   : > { %7208 = vmatprep.mubr.msk.f32.mxu1 %vm7827_vm5, %v7828_v1 }
 0x4fc   : > { %v4586_v10 = vpop.f32.mrb[14].mxu1 }
 0x4fd   : > { %v10943_v2 = vadd.f32 %v4586_v10, %v4441_v56  ;;  %v7019_v43 = vpop.f32.mrb[15].mxu1  ;;  %7209 = vmatmul.mubr.msk.f32.gmra.mrb[120].mxu1 %vm2159_vm4, %v10941_v38  ;;  %v7477_v56 = vpack.c.bf16 %v5412_v52, %v5411_v17 }
 0x4fe   : > { %7211 = vmatprep.mubr.msk.f32.mxu1 %vm7827_vm5, %v7828_v1 }
 0x500   : > { %v4591_v41 = vpop.f32.mrb[16].mxu1 }
 0x501   : > { %v10949_v57 = vadd.f32 %v4591_v41, %v4446_v40  ;;  %v7022_v11 = vpop.f32.mrb[17].mxu1  ;;  %7212 = vmatmul.mubr.msk.f32.gmra.mrb[122].mxu1 %vm2159_vm4, %v10933_v33  ;;  %v7480_v40 = vpack.c.bf16 %v5414_v25, %v5413_v35  ;;  %v5563_v35 = vld [vmem:[#allocation2 + $0x118] sm:$0x3f] }
 0x502   : > { %7222 = vmatprep.mubr.msk.f32.mxu1 %vm7827_vm5, %v7828_v1 }
 0x504   : > { %v4596_v46 = vpop.f32.mrb[18].mxu1 }
 0x505   : > { %v10955_v13 = vadd.f32 %v4596_v46, %v4451_v23  ;;  %v7025_v50 = vpop.f32.mrb[19].mxu1  ;;  %7223 = vmatmul.mubr.msk.f32.vlgmr.msra.gmra.mrb[124].mxu1 %vm2159_vm4, %v10466_v22 }
 0x506   : > { %7478 = vmatpush3.bf16.msra.mxu1 %v7477_v56  ;;  %7225 = vmatprep.mubr.msk.f32.mxu1 %vm7827_vm5, %v7828_v1  ;;  %v5562_v56 = vld [vmem:[#allocation2 + $0x110] sm:$0xff] }
 0x507   : > { %7479 = vmatprep.subr.bf16.mxu1 %v7826_v55 }
 0x508   : > { %v4601_v47 = vpop.f32.mrb[20].mxu1 }
 0x509   : > { %v10962_v58 = vadd.f32 %v4601_v47, %v4456_v27  ;;  %v7028_v63 = vpop.f32.mrb[21].mxu1  ;;  %7226 = vmatmul.mubr.msk.f32.gmra.mrb[126].mxu1 %vm2159_vm4, %v10482_v0 }
 0x50a   : > { %7228 = vmatprep.mubr.msk.f32.mxu1 %vm7827_vm5, %v7828_v1  ;;  %7482 = vmatpush3.bf16.msk.msra.mxu1 %vm9042_vm3, %v7480_v40 }
 0x50b   : > { %7483 = vmatprep.subr.bf16.mxu1 %v7826_v55 }
 0x50c   : > { %v4606_v22 = vpop.f32.mrb[22].mxu1 }
 0x50d   : > { %v10972_v23 = vadd.f32 %v4606_v22, %v10884_v32  ;;  %v7031_v9 = vpop.f32.mrb[23].mxu1  ;;  %7229 = vmatmul.mubr.msk.f32.gmra.mrb[128].mxu1 %vm2159_vm4, %v10484_v4 }
 0x50e   : > { %7231 = vmatprep.mubr.msk.f32.mxu1 %vm7827_vm5, %v7828_v1 }
 0x510   : > { %v4611_v0 = vpop.f32.mrb[24].mxu1 }
 0x511   : > { %v10979_v27 = vadd.f32 %v4611_v0, %v10895_v21  ;;  %v7034_v42 = vpop.f32.mrb[25].mxu1  ;;  %7232 = vmatmul.mubr.msk.f32.gmra.mrb[130].mxu1 %vm2159_vm4, %v10498_v39 }
 0x512   : > { %7234 = vmatprep.mubr.msk.f32.mxu1 %vm7827_vm5, %v7828_v1 }
 0x514   : > { %v4616_v32 = vpop.f32.mrb[26].mxu1 }
 0x515   : > { %v10986_v45 = vadd.f32 %v4616_v32, %v10901_v60  ;;  %v7037_v3 = vpop.f32.mrb[27].mxu1  ;;  %7235 = vmatmul.mubr.msk.f32.gmra.mrb[132].mxu1 %vm2159_vm4, %v10501_v14 }
 0x516   : > { %7237 = vmatprep.mubr.msk.f32.mxu1 %vm7827_vm5, %v7828_v1 }
 0x518   : > { %v4621_v4 = vpop.f32.mrb[28].mxu1 }
 0x519   : > { %v10993_v21 = vadd.f32 %v4621_v4, %v10907_v36  ;;  %v7040_v59 = vpop.f32.mrb[29].mxu1  ;;  %7238 = vmatmul.mubr.msk.f32.gmra.mrb[134].mxu1 %vm2159_vm4, %v10524_v15 }
 0x51a   : > { %7240 = vmatprep.mubr.msk.f32.mxu1 %vm7827_vm5, %v7828_v1 }
 0x51c   : > { %v4626_v39 = vpop.f32.mrb[30].mxu1 }
 0x51d   : > { %v11000_v60 = vadd.f32 %v4626_v39, %v10913_v7  ;;  %v7043_v10 = vpop.f32.mrb[31].mxu1  ;;  %7241 = vmatmul.mubr.msk.f32.gmra.mrb[136].mxu1 %vm2159_vm4, %v10527_v26 }
 0x51e   : > { %7243 = vmatprep.mubr.msk.f32.mxu1 %vm7827_vm5, %v7828_v1 }
 0x520   : > { %v4631_v14 = vpop.f32.mrb[32].mxu1 }
 0x521   : > { %v11007_v36 = vadd.f32 %v4631_v14, %v10919_v54  ;;  %v7046_v43 = vpop.f32.mrb[33].mxu1  ;;  %7244 = vmatmul.mubr.msk.f32.gmra.mrb[138].mxu1 %vm2159_vm4, %v10600_v16  ;;  %v5560_v16 = vld [vmem:[#allocation2 + $0x100] sm:$0xff] }
 0x522   : > { %7246 = vmatprep.mubr.msk.f32.mxu1 %vm7827_vm5, %v7828_v1 }
 0x524   : > { %v4636_v15 = vpop.f32.mrb[34].mxu1 }
 0x525   : > { %v11014_v7 = vadd.f32 %v4636_v15, %v10926_v30  ;;  %v7049_v17 = vpop.f32.mrb[35].mxu1  ;;  %7247 = vmatmul.mubr.msk.f32.gmra.mrb[140].mxu1 %vm2159_vm4, %v10605_v37  ;;  %v5561_v30 = vld [vmem:[#allocation2 + $0x108] sm:$0xff] }
 0x526   : > { %7249 = vmatprep.mubr.msk.f32.mxu1 %vm7827_vm5, %v7828_v1 }
 0x528   : > { %v4757_v26 = vpop.f32.mrb[36].mxu1 }
 0x529   : > { %v11021_v54 = vadd.f32 %v4757_v26, %v10943_v2  ;;  %v7060_v52 = vpop.f32.mrb[37].mxu1  ;;  %7250 = vmatmul.mubr.msk.f32.gmra.mrb[142].mxu1 %vm2159_vm4, %v10611_v44  ;;  %v7484_v2 = vpack.c.bf16 %v5561_v30, %v5560_v16 }
 0x52a   : > { %7252 = vmatprep.mubr.msk.f32.mxu1 %vm7827_vm5, %v7828_v1 }
 0x52c   : > { %v4762_v41 = vpop.f32.mrb[38].mxu1 }
 0x52d   : > { %v11028_v11 = vadd.f32 %v4762_v41, %v10949_v57  ;;  %v7063_v37 = vpop.f32.mrb[39].mxu1  ;;  %7253 = vmatmul.mubr.msk.f32.gmra.mrb[144].mxu1 %vm2159_vm4, %v10607_v24  ;;  %v7487_v57 = vpack.c.bf16 %v5563_v35, %v5562_v56 }
 0x52e   : > { %7263 = vmatprep.mubr.msk.f32.mxu1 %vm7827_vm5, %v7828_v1 }
 0x530   : > { %v4767_v25 = vpop.f32.mrb[40].mxu1 }
 0x531   : > { %v11035_v46 = vadd.f32 %v4767_v25, %v10955_v13  ;;  %v7066_v50 = vpop.f32.mrb[41].mxu1  ;;  %7264 = vmatmul.mubr.msk.f32.vlgmr.msra.gmra.mrb[146].mxu1 %vm2159_vm4, %v10538_v5 }
 0x532   : > { %7485 = vmatpush3.bf16.msra.mxu1 %v7484_v2  ;;  %7266 = vmatprep.mubr.msk.f32.mxu1 %vm7827_vm5, %v7828_v1 }
 0x533   : > { %7486 = vmatprep.subr.bf16.mxu1 %v7826_v55 }
 0x534   : > { %v4772_v40 = vpop.f32.mrb[42].mxu1 }
 0x535   : > { %v4814_v47 = vadd.f32 %v4772_v40, %v10962_v58  ;;  %v7069_v63 = vpop.f32.mrb[43].mxu1  ;;  %7267 = vmatmul.mubr.msk.f32.gmra.mrb[148].mxu1 %vm2159_vm4, %v10566_v19 }
 0x536   : > { %7269 = vmatprep.mubr.msk.f32.mxu1 %vm7827_vm5, %v7828_v1  ;;  %7489 = vmatpush3.bf16.msk.msra.mxu1 %vm9042_vm3, %v7487_v57  ;;  %v5564_v57 = vrot.slane %v10611_v44, 2 }
 0x538   : > { %v4777_v5 = vpop.f32.mrb[44].mxu1  ;;  %v5565_v63 = vsel %vm770_vm0, %v10933_v33, %v5564_v57 }
 0x539   : > { %v4815_v13 = vadd.f32 %v4777_v5, %v10972_v23  ;;  %v7072_v22 = vpop.f32.mrb[45].mxu1  ;;  %7270 = vmatmul.mubr.msk.f32.gmra.mrb[150].mxu1 %vm2159_vm4, %v10584_v8 }
 0x53a   : > { %7272 = vmatprep.mubr.msk.f32.mxu1 %vm7827_vm5, %v7828_v1 }
 0x53c   : > { %v4782_v55 = vpop.f32.mrb[46].mxu1 }
 0x53d   : > { %v4816_v58 = vadd.f32 %v4782_v55, %v10979_v27  ;;  %v7075_v19 = vpop.f32.mrb[47].mxu1  ;;  %7273 = vmatmul.mubr.msk.f32.gmra.mrb[152].mxu1 %vm2159_vm4, %v10597_v29 }
 0x53e   : > { %7275 = vmatprep.mubr.msk.f32.mxu1 %vm7827_vm5, %v7828_v1 }
 0x540   : > { %v4787_v62 = vpop.f32.mrb[48].mxu1 }
 0x541   : > { %v4817_v23 = vadd.f32 %v4787_v62, %v10986_v45  ;;  %v7078_v9 = vpop.f32.mrb[49].mxu1  ;;  %7276 = vmatmul.mubr.msk.f32.gmra.mrb[154].mxu1 %vm2159_vm4, %v10614_v53  ;;  %v5415_v45 = vrot.slane %v10611_v44, 1 }
 0x542   : > { %7278 = vmatprep.mubr.msk.f32.mxu1 %vm7827_vm5, %v7828_v1 }
 0x544   : > { %v4792_v8 = vpop.f32.mrb[50].mxu1 }
 0x545   : > { %v4818_v0 = vadd.f32 %v4792_v8, %v10993_v21  ;;  %v7081_v27 = vpop.f32.mrb[51].mxu1  ;;  %7279 = vmatmul.mubr.msk.f32.gmra.mrb[156].mxu1 %vm2159_vm4, %v10625_v34  ;;  %v5416_v21 = vsel %vm594_vm1, %v10859_v12, %v5415_v45 }
 0x546   : > { %7281 = vmatprep.mubr.msk.f32.mxu1 %vm7827_vm5, %v7828_v1 }
 0x548   : > { %v4797_v29 = vpop.f32.mrb[52].mxu1 }
 0x549   : > { %v4819_v42 = vadd.f32 %v4797_v29, %v11000_v60  ;;  %v7084_v32 = vpop.f32.mrb[53].mxu1  ;;  %7282 = vmatmul.mubr.msk.f32.gmra.mrb[158].mxu1 %vm2159_vm4, %v10856_v48  ;;  %v5417_v48 = vrot.slane %v10607_v24, 1 }
 0x54a   : > { %7284 = vmatprep.mubr.msk.f32.mxu1 %vm7827_vm5, %v7828_v1 }
 0x54c   : > { %v4802_v53 = vpop.f32.mrb[54].mxu1 }
 0x54d   : > { %v4820_v3 = vadd.f32 %v4802_v53, %v11007_v36  ;;  %v7087_v4 = vpop.f32.mrb[55].mxu1  ;;  %7285 = vmatmul.mubr.msk.f32.gmra.mrb[160].mxu1 %vm2159_vm4, %v10867_v20  ;;  %v5418_v20 = vsel %vm594_vm1, %v5415_v45, %v5417_v48 }
 0x54e   : > { %7287 = vmatprep.mubr.msk.f32.mxu1 %vm7827_vm5, %v7828_v1 }
 0x550   : > { %v4807_v34 = vpop.f32.mrb[56].mxu1 }
 0x551   : > { %v4821_v59 = vadd.f32 %v4807_v34, %v11014_v7  ;;  %v7090_v39 = vpop.f32.mrb[57].mxu1  ;;  %7288 = vmatmul.mubr.msk.f32.gmra.mrb[162].mxu1 %vm2159_vm4, %v5416_v21 }
 0x552   : > { %7290 = vmatprep.mubr.msk.f32.mxu1 %vm7827_vm5, %v7828_v1 }
 0x554   : > { %v4902_v60 = vpop.f32.mrb[58].mxu1 }
 0x555   : > { %v4956_v10 = vadd.f32 %v4902_v60, %v11021_v54  ;;  %v7101_v14 = vpop.f32.mrb[59].mxu1  ;;  %7291 = vmatmul.mubr.msk.f32.gmra.mrb[164].mxu1 %vm2159_vm4, %v5418_v20 }
 0x556   : > { %7293 = vmatprep.mubr.msk.f32.mxu1 %vm7827_vm5, %v7828_v1 }
 0x558   : > { %v4907_v12 = vpop.f32.mrb[60].mxu1 }
 0x559   : > { %v4957_v36 = vadd.f32 %v4907_v12, %v11028_v11  ;;  %v7104_v43 = vpop.f32.mrb[61].mxu1  ;;  %7294 = vmatmul.mubr.msk.f32.gmra.mrb[166].mxu1 %vm2159_vm4, %v5417_v48 }
 0x55a   : > { %7304 = vmatprep.mubr.msk.f32.mxu1 %vm7827_vm5, %v7828_v1 }
 0x55c   : > { %v4912_v15 = vpop.f32.mrb[62].mxu1 }
 0x55d   : > { %v4958_v7 = vadd.f32 %v4912_v15, %v11035_v46  ;;  %v7107_v17 = vpop.f32.mrb[63].mxu1  ;;  %7305 = vmatmul.mubr.msk.f32.vlgmr.msra.gmra.mrb[168].mxu1 %vm2159_vm4, %v10716_v6 }
 0x55e   : > { %7307 = vmatprep.mubr.msk.f32.mxu1 %vm7827_vm5, %v7828_v1 }
 0x560   : > { %v4917_v26 = vpop.f32.mrb[64].mxu1 }
 0x561   : > { %v4959_v54 = vadd.f32 %v4917_v26, %v4814_v47  ;;  %v7110_v52 = vpop.f32.mrb[65].mxu1  ;;  %7308 = vmatmul.mubr.msk.f32.gmra.mrb[170].mxu1 %vm2159_vm4, %v10724_v18 }
 0x562   : > { %7310 = vmatprep.mubr.msk.f32.mxu1 %vm7827_vm5, %v7828_v1 }
 0x564   : > { %v4922_v16 = vpop.f32.mrb[66].mxu1 }
 0x565   : > { %v4960_v30 = vadd.f32 %v4922_v16, %v4815_v13  ;;  %v7113_v41 = vpop.f32.mrb[67].mxu1  ;;  %7311 = vmatmul.mubr.msk.f32.gmra.mrb[172].mxu1 %vm2159_vm4, %v10732_v61 }
 0x566   : > { %7313 = vmatprep.mubr.msk.f32.mxu1 %vm7827_vm5, %v7828_v1 }
 0x568   : > { %v4927_v6 = vpop.f32.mrb[68].mxu1 }
 0x569   : > { %v4961_v11 = vadd.f32 %v4927_v6, %v4816_v58  ;;  %v7116_v37 = vpop.f32.mrb[69].mxu1  ;;  %7314 = vmatmul.mubr.msk.f32.gmra.mrb[174].mxu1 %vm2159_vm4, %v10740_v49 }
 0x56a   : > { %7316 = vmatprep.mubr.msk.f32.mxu1 %vm7827_vm5, %v7828_v1 }
 0x56c   : > { %v4932_v18 = vpop.f32.mrb[70].mxu1 }
 0x56d   : > { %v4962_v2 = vadd.f32 %v4932_v18, %v4817_v23  ;;  %v7119_v56 = vpop.f32.mrb[71].mxu1  ;;  %7317 = vmatmul.mubr.msk.f32.gmra.mrb[176].mxu1 %vm2159_vm4, %v10748_v31 }
 0x56e   : > { %7319 = vmatprep.mubr.msk.f32.mxu1 %vm7827_vm5, %v7828_v1 }
 0x570   : > { %v4937_v61 = vpop.f32.mrb[72].mxu1 }
 0x571   : > { %v4963_v35 = vadd.f32 %v4937_v61, %v4818_v0  ;;  %v7122_v25 = vpop.f32.mrb[73].mxu1  ;;  %7320 = vmatmul.mubr.msk.f32.gmra.mrb[178].mxu1 %vm2159_vm4, %v10759_v28 }
 0x572   : > { %7322 = vmatprep.mubr.msk.f32.mxu1 %vm7827_vm5, %v7828_v1 }
 0x574   : > { %v4942_v49 = vpop.f32.mrb[74].mxu1 }
 0x575   : > { %v4964_v46 = vadd.f32 %v4942_v49, %v4819_v42  ;;  %v7125_v50 = vpop.f32.mrb[75].mxu1  ;;  %7323 = vmatmul.mubr.msk.f32.gmra.mrb[180].mxu1 %vm2159_vm4, %v10930_v51  ;;  %v5566_v51 = vrot.slane %v10607_v24, 2 }
 0x576   : > { %7325 = vmatprep.mubr.msk.f32.mxu1 %vm7827_vm5, %v7828_v1 }
 0x577   : > { %v5567_v22 = vsel %vm770_vm0, %v5564_v57, %v5566_v51 }
 0x578   : > { %v4947_v31 = vpop.f32.mrb[76].mxu1 }
 0x579   : > { %v4965_v40 = vadd.f32 %v4947_v31, %v4820_v3  ;;  %v7128_v47 = vpop.f32.mrb[77].mxu1  ;;  %7326 = vmatmul.mubr.msk.f32.gmra.mrb[182].mxu1 %vm2159_vm4, %v10941_v38 }
 0x57a   : > { %7328 = vmatprep.mubr.msk.f32.mxu1 %vm7827_vm5, %v7828_v1 }
 0x57c   : > { %v4952_v28 = vpop.f32.mrb[78].mxu1 }
 0x57d   : > { %v4966_v5 = vadd.f32 %v4952_v28, %v4821_v59  ;;  %v7131_v13 = vpop.f32.mrb[79].mxu1  ;;  %7329 = vmatmul.mubr.msk.f32.gmra.mrb[184].mxu1 %vm2159_vm4, %v5565_v63 }
 0x57e   : > { %7331 = vmatprep.mubr.msk.f32.mxu1 %vm7827_vm5, %v7828_v1 }
 0x580   : > { %v5051_v44 = vpop.f32.mrb[80].mxu1 }
 0x581   : > { %v5105_v38 = vadd.f32 %v5051_v44, %v4956_v10  ;;  %v7142_v55 = vpop.f32.mrb[81].mxu1  ;;  %7332 = vmatmul.mubr.msk.f32.gmra.mrb[186].mxu1 %vm2159_vm4, %v5567_v22 }
 0x582   : > { %7334 = vmatprep.mubr.msk.f32.mxu1 %vm7827_vm5, %v7828_v1 }
 0x584   : > { %v5056_v33 = vpop.f32.mrb[82].mxu1 }
 0x585   : > { %v5106_v58 = vadd.f32 %v5056_v33, %v4957_v36  ;;  %v7145_v24 = vpop.f32.mrb[83].mxu1  ;;  %7335 = vmatmul.mubr.msk.f32.gmra.mrb[188].mxu1 %vm2159_vm4, %v5566_v51 }
 0x588   : > { %v5061_v19 = vpop.f32.mrb[84].mxu1 }
 0x589   : > { %v5107_v62 = vadd.f32 %v5061_v19, %v4958_v7  ;;  %v7148_v23 = vpop.f32.mrb[85].mxu1 }
 0x58c   : > { %v5066_v9 = vpop.f32.mrb[86].mxu1 }
 0x58d   : > { %v5108_v8 = vadd.f32 %v5066_v9, %v4959_v54  ;;  %v7151_v0 = vpop.f32.mrb[87].mxu1 }
 0x590   : > { %v5071_v27 = vpop.f32.mrb[88].mxu1 }
 0x591   : > { %v5109_v29 = vadd.f32 %v5071_v27, %v4960_v30  ;;  %v7154_v42 = vpop.f32.mrb[89].mxu1 }
 0x594   : > { %v5076_v32 = vpop.f32.mrb[90].mxu1 }
 0x595   : > { %v5110_v53 = vadd.f32 %v5076_v32, %v4961_v11  ;;  %v7157_v45 = vpop.f32.mrb[91].mxu1 }
 0x598   : > { %v5081_v3 = vpop.f32.mrb[92].mxu1 }
 0x599   : > { %v5111_v4 = vadd.f32 %v5081_v3, %v4962_v2  ;;  %v7160_v1 = vpop.f32.mrb[93].mxu1 }
 0x59c   : > { %v5086_v34 = vpop.f32.mrb[94].mxu1 }
 0x59d   : > { %v5112_v21 = vadd.f32 %v5086_v34, %v4963_v35  ;;  %v7163_v48 = vpop.f32.mrb[95].mxu1 }
 0x5a0   : > { %v5091_v59 = vpop.f32.mrb[96].mxu1 }
 0x5a1   : > { %v5113_v39 = vadd.f32 %v5091_v59, %v4964_v46  ;;  %v7166_v60 = vpop.f32.mrb[97].mxu1 }
 0x5a4   : > { %v5096_v20 = vpop.f32.mrb[98].mxu1 }
 0x5a5   : > { %v5114_v10 = vadd.f32 %v5096_v20, %v4965_v40  ;;  %v7169_v14 = vpop.f32.mrb[99].mxu1 }
 0x5a8   : > { %v5101_v12 = vpop.f32.mrb[100].mxu1 }
 0x5a9   : > { %v5115_v36 = vadd.f32 %v5101_v12, %v4966_v5  ;;  %v7172_v43 = vpop.f32.mrb[101].mxu1 }
 0x5ac   : > { %v5200_v15 = vpop.f32.mrb[102].mxu1 }
 0x5ad   : > { %v5254_v7 = vadd.f32 %v5200_v15, %v5105_v38  ;;  %v7183_v17 = vpop.f32.mrb[103].mxu1 }
 0x5b0   : > { %v5205_v26 = vpop.f32.mrb[104].mxu1 }
 0x5b1   : > { %v5255_v54 = vadd.f32 %v5205_v26, %v5106_v58  ;;  %v7186_v52 = vpop.f32.mrb[105].mxu1 }
 0x5b4   : > { %v5210_v16 = vpop.f32.mrb[106].mxu1 }
 0x5b5   : > { %v5256_v30 = vadd.f32 %v5210_v16, %v5107_v62  ;;  %v7189_v41 = vpop.f32.mrb[107].mxu1 }
 0x5b8   : > { %v5215_v6 = vpop.f32.mrb[108].mxu1 }
 0x5b9   : > { %v5257_v11 = vadd.f32 %v5215_v6, %v5108_v8  ;;  %v7192_v37 = vpop.f32.mrb[109].mxu1 }
 0x5bc   : > { %v5220_v18 = vpop.f32.mrb[110].mxu1 }
 0x5bd   : > { %v5258_v2 = vadd.f32 %v5220_v18, %v5109_v29  ;;  %v7195_v56 = vpop.f32.mrb[111].mxu1 }
 0x5c0   : > { %v5225_v61 = vpop.f32.mrb[112].mxu1 }
 0x5c1   : > { %v5259_v35 = vadd.f32 %v5225_v61, %v5110_v53  ;;  %v7198_v25 = vpop.f32.mrb[113].mxu1 }
 0x5c4   : > { %v5230_v49 = vpop.f32.mrb[114].mxu1 }
 0x5c5   : > { %v5260_v46 = vadd.f32 %v5230_v49, %v5111_v4  ;;  %v7201_v50 = vpop.f32.mrb[115].mxu1 }
 0x5c8   : > { %v5235_v31 = vpop.f32.mrb[116].mxu1 }
 0x5c9   : > { %v5261_v57 = vadd.f32 %v5235_v31, %v5112_v21  ;;  %v7204_v40 = vpop.f32.mrb[117].mxu1 }
 0x5cc   : > { %v5240_v47 = vpop.f32.mrb[118].mxu1 }
 0x5cd   : > { %v5262_v28 = vadd.f32 %v5240_v47, %v5113_v39  ;;  %v7207_v63 = vpop.f32.mrb[119].mxu1 }
 0x5d0   : > { %v5245_v51 = vpop.f32.mrb[120].mxu1 }
 0x5d1   : > { %v5263_v5 = vadd.f32 %v5245_v51, %v5114_v10  ;;  %v7210_v13 = vpop.f32.mrb[121].mxu1 }
 0x5d4   : > { %v5250_v44 = vpop.f32.mrb[122].mxu1 }
 0x5d5   : > { %v5264_v22 = vadd.f32 %v5250_v44, %v5115_v36  ;;  %v7213_v38 = vpop.f32.mrb[123].mxu1 }
 0x5d8   : > { %v5345_v55 = vpop.f32.mrb[124].mxu1 }
 0x5d9   : > { %v5399_v33 = vadd.f32 %v5345_v55, %v5254_v7  ;;  %v7224_v58 = vpop.f32.mrb[125].mxu1 }
 0x5dc   : > { %v5350_v24 = vpop.f32.mrb[126].mxu1 }
 0x5dd   : > { %v5400_v19 = vadd.f32 %v5350_v24, %v5255_v54  ;;  %v7227_v62 = vpop.f32.mrb[127].mxu1  ;;  %v11152_v24 = vld [vmem:[%s11243_s6] ss:$0 sm:$0xff] }
 0x5e0   : > { %v5355_v23 = vpop.f32.mrb[128].mxu1 }
 0x5e1   : > { %v5401_v9 = vadd.f32 %v5355_v23, %v5256_v30  ;;  %v7230_v8 = vpop.f32.mrb[129].mxu1 }
 0x5e4   : > { %v5360_v0 = vpop.f32.mrb[130].mxu1 }
 0x5e5   : > { %v5402_v27 = vadd.f32 %v5360_v0, %v5257_v11  ;;  %v7233_v29 = vpop.f32.mrb[131].mxu1 }
 0x5e8   : > { %v5365_v42 = vpop.f32.mrb[132].mxu1 }
 0x5e9   : > { %v5403_v32 = vadd.f32 %v5365_v42, %v5258_v2  ;;  %v7236_v53 = vpop.f32.mrb[133].mxu1 }
 0x5ec   : > { %v5370_v45 = vpop.f32.mrb[134].mxu1 }
 0x5ed   : > { %v5404_v3 = vadd.f32 %v5370_v45, %v5259_v35  ;;  %v7239_v4 = vpop.f32.mrb[135].mxu1 }
 0x5f0   : > { %v5375_v1 = vpop.f32.mrb[136].mxu1 }
 0x5f1   : > { %v5405_v34 = vadd.f32 %v5375_v1, %v5260_v46  ;;  %v7242_v21 = vpop.f32.mrb[137].mxu1 }
 0x5f4   : > { %v5380_v48 = vpop.f32.mrb[138].mxu1 }
 0x5f5   : > { %v5406_v59 = vadd.f32 %v5380_v48, %v5261_v57  ;;  %v7245_v39 = vpop.f32.mrb[139].mxu1 }
 0x5f8   : > { %v5385_v60 = vpop.f32.mrb[140].mxu1 }
 0x5f9   : > { %v5407_v20 = vadd.f32 %v5385_v60, %v5262_v28  ;;  %v7248_v10 = vpop.f32.mrb[141].mxu1 }
 0x5fc   : > { %v5390_v14 = vpop.f32.mrb[142].mxu1 }
 0x5fd   : > { %v5408_v12 = vadd.f32 %v5390_v14, %v5263_v5  ;;  %v7251_v36 = vpop.f32.mrb[143].mxu1 }
 0x600   : > { %v5395_v43 = vpop.f32.mrb[144].mxu1 }
 0x601   : > { %v5409_v15 = vadd.f32 %v5395_v43, %v5264_v22  ;;  %v7254_v7 = vpop.f32.mrb[145].mxu1 }
 0x604   : > { %v5494_v17 = vpop.f32.mrb[146].mxu1 }
 0x605   : > { %v5548_v26 = vadd.f32 %v5494_v17, %v5399_v33  ;;  %v7265_v54 = vpop.f32.mrb[147].mxu1 }
 0x608   : > { %v5499_v52 = vpop.f32.mrb[148].mxu1 }
 0x609   : > { %v5549_v16 = vadd.f32 %v5499_v52, %v5400_v19  ;;  %v7268_v30 = vpop.f32.mrb[149].mxu1 }
 0x60c   : > { %v5504_v41 = vpop.f32.mrb[150].mxu1 }
 0x60d   : > { %v5550_v6 = vadd.f32 %v5504_v41, %v5401_v9  ;;  %v7271_v11 = vpop.f32.mrb[151].mxu1 }
 0x610   : > { %v5509_v37 = vpop.f32.mrb[152].mxu1 }
 0x611   : > { %v5551_v18 = vadd.f32 %v5509_v37, %v5402_v27  ;;  %v7274_v2 = vpop.f32.mrb[153].mxu1 }
 0x614   : > { %v5514_v56 = vpop.f32.mrb[154].mxu1 }
 0x615   : > { %v5552_v61 = vadd.f32 %v5514_v56, %v5403_v32  ;;  %v7277_v35 = vpop.f32.mrb[155].mxu1 }
 0x618   : > { %v5519_v25 = vpop.f32.mrb[156].mxu1 }
 0x619   : > { %v5553_v49 = vadd.f32 %v5519_v25, %v5404_v3  ;;  %v7280_v46 = vpop.f32.mrb[157].mxu1 }
 0x61c   : > { %v5524_v50 = vpop.f32.mrb[158].mxu1 }
 0x61d   : > { %v5554_v31 = vadd.f32 %v5524_v50, %v5405_v34  ;;  %v7283_v57 = vpop.f32.mrb[159].mxu1 }
 0x620   : > { %v5529_v40 = vpop.f32.mrb[160].mxu1 }
 0x621   : > { %v11141_v47 = vadd.f32 %v5529_v40, %v5406_v59  ;;  %v7286_v28 = vpop.f32.mrb[161].mxu1 }
 0x624   : > { %v5534_v63 = vpop.f32.mrb[162].mxu1 }
 0x625   : > { %v11143_v51 = vadd.f32 %v5534_v63, %v5407_v20  ;;  %v7289_v5 = vpop.f32.mrb[163].mxu1 }
 0x628   : > { %v5539_v13 = vpop.f32.mrb[164].mxu1 }
 0x629   : > { %v11145_v44 = vadd.f32 %v5539_v13, %v5408_v12  ;;  %v7292_v22 = vpop.f32.mrb[165].mxu1 }
 0x62c   : > { %v5544_v38 = vpop.f32.mrb[166].mxu1 }
 0x62d   : > { %v11147_v55 = vadd.f32 %v5544_v38, %v5409_v15  ;;  %v7295_v33 = vpop.f32.mrb[167].mxu1 }
 0x630   : > { %v5643_v58 = vpop.f32.mrb[168].mxu1 }
 0x631   : > { %v5697_v19 = vadd.f32 %v5643_v58, %v5548_v26  ;;  %v7306_v62 = vpop.f32.mrb[169].mxu1 }
 0x633   : > { %v5715_v23 = vadd.f32 %v11152_v24, %v5697_v19 }
 0x634   : > { %v5648_v9 = vpop.f32.mrb[170].mxu1 }
 0x635   : > { %v5698_v8 = vadd.f32 %v5648_v9, %v5549_v16  ;;  %v7309_v0 = vpop.f32.mrb[171].mxu1  ;;  %v5726_v27 = vmax.f32 %v5715_v23, 0.0 }
 0x637   : > { %v5716_v29 = vadd.f32 %v11152_v24, %v5698_v8  ;;  %v5748_v3 = vrot.slane %v5726_v27, 1  ;;  %v5776_v4 = vrot.slane %v5726_v27, 2 }
 0x638   : > { %v5653_v42 = vpop.f32.mrb[172].mxu1 }
 0x639   : > { %v5727_v32 = vmax.f32 %v5716_v29, 0.0  ;;  %v5699_v53 = vadd.f32 %v5653_v42, %v5550_v6  ;;  %v7312_v45 = vpop.f32.mrb[173].mxu1 }
 0x63b   : > { %v5749_v1 = vrot.slane %v5727_v32, 1  ;;  %v5777_v34 = vrot.slane %v5727_v32, 2  ;;  %v5717_v21 = vadd.f32 %v11152_v24, %v5699_v53 }
 0x63c   : > { %v5658_v48 = vpop.f32.mrb[174].mxu1 }
 0x63d   : > { %v5750_v59 = vsel %vm594_vm1, %v5748_v3, %v5749_v1  ;;  %v5778_v39 = vsel %vm770_vm0, %v5776_v4, %v5777_v34  ;;  %v5700_v60 = vadd.f32 %v5658_v48, %v5551_v18  ;;  %v7315_v20 = vpop.f32.mrb[175].mxu1  ;;  %v5728_v14 = vmax.f32 %v5717_v21, 0.0 }
 0x63e   : > { %v5770_v10 = vmax.f32 %v5726_v27, %v5750_v59 }
 0x63f   : > { %v5718_v12 = vadd.f32 %v11152_v24, %v5700_v60  ;;  %v5751_v26 = vrot.slane %v5728_v14, 1  ;;  %v5779_v54 = vrot.slane %v5728_v14, 2 }
 0x640   : > { %v5798_v36 = vmax.f32 %v5770_v10, %v5778_v39  ;;  %v5663_v43 = vpop.f32.mrb[176].mxu1 }
 0x641   : > { %v5729_v15 = vmax.f32 %v5718_v12, 0.0  ;;  %v5701_v7 = vadd.f32 %v5663_v43, %v5552_v61  ;;  %v7318_v17 = vpop.f32.mrb[177].mxu1 }
 0x643   : > { %v5752_v52 = vrot.slane %v5729_v15, 1  ;;  %v5780_v16 = vrot.slane %v5729_v15, 2  ;;  %v5719_v30 = vadd.f32 %v11152_v24, %v5701_v7 }
 0x644   : > { %v5668_v41 = vpop.f32.mrb[178].mxu1 }
 0x645   : > { %v5753_v6 = vsel %vm594_vm1, %v5751_v26, %v5752_v52  ;;  %v5781_v11 = vsel %vm770_vm0, %v5779_v54, %v5780_v16  ;;  %v5702_v37 = vadd.f32 %v5668_v41, %v5553_v49  ;;  %v7321_v18 = vpop.f32.mrb[179].mxu1  ;;  %v5730_v56 = vmax.f32 %v5719_v30, 0.0 }
 0x646   : > { %v5771_v2 = vmax.f32 %v5728_v14, %v5753_v6 }
 0x647   : > { %v5720_v35 = vadd.f32 %v11152_v24, %v5702_v37  ;;  %v5754_v28 = vrot.slane %v5730_v56, 1  ;;  %v5782_v63 = vrot.slane %v5730_v56, 2 }
 0x648   : > { %v5799_v25 = vmax.f32 %v5771_v2, %v5781_v11  ;;  %v5673_v61 = vpop.f32.mrb[180].mxu1 }
 0x649   : > { %v5731_v46 = vmax.f32 %v5720_v35, 0.0  ;;  %v5703_v50 = vadd.f32 %v5673_v61, %v5554_v31  ;;  %v7324_v57 = vpop.f32.mrb[181].mxu1 }
 0x64a   : > { %v5804_v40 = vmax.f32 %v5798_v36, %v5799_v25 }
 0x64b   : > { %v5755_v5 = vrot.slane %v5731_v46, 1  ;;  %v5783_v13 = vrot.slane %v5731_v46, 2  ;;  %v5721_v22 = vadd.f32 %v11152_v24, %v5703_v50 }
 0x64c   : > { %v5678_v38 = vpop.f32.mrb[182].mxu1 }
 0x64d   : > { %v5756_v49 = vsel %vm594_vm1, %v5754_v28, %v5755_v5  ;;  %v5784_v33 = vsel %vm770_vm0, %v5782_v63, %v5783_v13  ;;  %v5704_v58 = vadd.f32 %v5678_v38, %v11141_v47  ;;  %v7327_v19 = vpop.f32.mrb[183].mxu1  ;;  %v5732_v23 = vmax.f32 %v5721_v22, 0.0 }
 0x64e   : > { %v5772_v62 = vmax.f32 %v5730_v56, %v5756_v49 }
 0x64f   : > { %v5722_v31 = vadd.f32 %v11152_v24, %v5704_v58  ;;  %v5757_v53 = vrot.slane %v5732_v23, 1  ;;  %v5785_v45 = vrot.slane %v5732_v23, 2 }
 0x650   : > { %v5800_v9 = vmax.f32 %v5772_v62, %v5784_v33  ;;  %v5683_v8 = vpop.f32.mrb[184].mxu1 }
 0x651   : > { %v5733_v0 = vmax.f32 %v5722_v31, 0.0  ;;  %v5705_v27 = vadd.f32 %v5683_v8, %v11143_v51  ;;  %v7330_v29 = vpop.f32.mrb[185].mxu1 }
 0x652   : > { %v5805_v42 = vmax.f32 %v5799_v25, %v5800_v9  ;;  %v5808_v32 = vmax.f32 %v5804_v40, %v5800_v9 }
 0x653   : > { %v5758_v3 = vrot.slane %v5733_v0, 1  ;;  %v5786_v4 = vrot.slane %v5733_v0, 2  ;;  %v5723_v47 = vadd.f32 %v11152_v24, %v5705_v27 }
 0x654   : > { %v5688_v1 = vpop.f32.mrb[186].mxu1 }
 0x655   : > { %v5759_v34 = vsel %vm594_vm1, %v5757_v53, %v5758_v3  ;;  %v5787_v21 = vsel %vm770_vm0, %v5785_v45, %v5786_v4  ;;  %v5706_v48 = vadd.f32 %v5688_v1, %v11145_v44  ;;  %v7333_v59 = vpop.f32.mrb[187].mxu1  ;;  %v5734_v39 = vmax.f32 %v5723_v47, 0.0 }
 0x656   : > { %v5773_v51 = vmax.f32 %v5732_v23, %v5759_v34 }
 0x657   : > { %v5724_v60 = vadd.f32 %v11152_v24, %v5706_v48  ;;  %v5760_v15 = vrot.slane %v5734_v39, 1  ;;  %v5788_v17 = vrot.slane %v5734_v39, 2 }
 0x658   : > { %v5801_v20 = vmax.f32 %v5773_v51, %v5787_v21  ;;  %v5693_v10 = vpop.f32.mrb[188].mxu1 }
 0x659   : > { %v5735_v14 = vmax.f32 %v5724_v60, 0.0  ;;  %v5707_v12 = vadd.f32 %v5693_v10, %v11147_v55  ;;  %v7336_v36 = vpop.f32.mrb[189].mxu1 }
 0x65a   : > { %v5809_v43 = vmax.f32 %v5805_v42, %v5801_v20  ;;  %v5806_v7 = vmax.f32 %v5800_v9, %v5801_v20 }
 0x65b   : > { %v5761_v44 = vrot.slane %v5735_v14, 1  ;;  %v5789_v26 = vrot.slane %v5735_v14, 2  ;;  %v5725_v54 = vadd.f32 %v11152_v24, %v5707_v12 }
 0x65c   : > { %v5813_v52 = vrot.slane %v5809_v43, 4 }
 0x65d   : > { %v5762_v16 = vsel %vm594_vm1, %v5760_v15, %v5761_v44  ;;  %v5790_v30 = vsel %vm770_vm0, %v5788_v17, %v5789_v26  ;;  %v5736_v41 = vmax.f32 %v5725_v54, 0.0 }
 0x65e   : > { %v5774_v55 = vmax.f32 %v5734_v39, %v5762_v16  ;;  %v5819_v6 = vsel %vm5818_vm6, %v5808_v32, %v5813_v52 }
 0x65f   : > { %v5763_v11 = vrot.slane %v5736_v41, 1  ;;  %5821 = vst.msk [vmem:[%s287_s9] sm:$0xff] %vm2159_vm4, %v5819_v6  ;;  %v5791_v2 = vrot.slane %v5736_v41, 2 }
 0x660   : > { %v5802_v37 = vmax.f32 %v5774_v55, %v5790_v30 }
 0x661   : > { %v5775_v18 = vmax.f32 %v5736_v41, %v5763_v11 }
 0x662   : > { %v5807_v24 = vmax.f32 %v5801_v20, %v5802_v37  ;;  %v5810_v56 = vmax.f32 %v5806_v7, %v5802_v37 }
 0x663   : > { %v5803_v35 = vmax.f32 %v5775_v18, %v5791_v2 }
 0x665   : > { %v5811_v25 = vmax.f32 %v5807_v24, %v5803_v35 }
 0x667   : > { %v5816_v61 = vrot.slane %v5811_v25, 4 }
 0x669   : > { %v5820_v46 = vsel %vm5818_vm6, %v5810_v56, %v5816_v61 }
 0x66a   : > { %5822 = vst.msk [vmem:[%s287_s9 + $0x8] sm:$0xff] %vm2159_vm4, %v5820_v46 }
 0x66b   : > { %7766 = shalt.err (!%p7763_p7)
}
 0x66c   : > { %s7767_s22 = scalar_lea.hbm %s11188_s19, 256  ;;  %s7771_s8 = scalar_lea.hbm %s11244_s7, 512 }
 0x66d   : > { %p7768_p8 = scmp.ne.s32.totalorder %s11188_s19, %s7767_s22  ;;  %p7772_p1 = scmp.lt.u32.totalorder %s11188_s19, %s11244_s7 }
 0x66e   : > { %p7773_p0 = scmp.lt.u32.totalorder %s7771_s8, %s7767_s22  ;;  %p7775_p6 = scmp.lt.u32.totalorder %s7767_s22, %s11188_s19 }
 0x66f   : > { %p7769_p11 = pnand %p7768_p8, %p11578_p9 }
 0x670   : > { %p7774_p5 = por %p7773_p0, %p7772_p1 }
 0x671   : > { %p7770_p13 = pneg %p7769_p11 }
 0x672   : > { %p7776_p10 = por %p7775_p6, %p7774_p5 }
 0x674   : > { %p7777_p12 = pnand %p7776_p10, %p7770_p13 }
 0x676   : > { %7780 = shalt.err (!%p7777_p12)
}
 0x677   : > { %s7830_s18 = smov 128   ;;  %s7831_s16 = smov 8  }
 0x678   : > { %7658 = dma.vmem_to_hbm [thread:$0]  (%p11578_p9), %s11190_s17, 256, %s11188_s19, %s11196_s20, %s7830_s18, %s7830_s18, %s7831_s16  }
 0x679 PF: > { %p7670_p2 = scmp.ge.s32.totalorder %s7819_s27, 2  ;;  %s5852_s28 = sand.u32 1, %s7807_s24  }
 0x67a   : > { %p11579_p3 = scmp.ne.s32.totalorder %s11331_s12, 0  ;;  %s5853_s15 = scalar_lea.sflag [#allocation4], %s5852_s28 }
 0x67c   : > { %p7665_p4 = pnand %p7670_p2, %p11579_p3 }
 0x67e   : > { %7802 = dma.done.wait (!%p7665_p4), %s5853_s15, 256  }
 0x67f   : > { %7804 = vsyncadd (!%p7665_p4), %s5853_s15, 4294967040  ;;  %p18_p7 = scmp.ge.s32.totalorder %s7897_s30, 4   ;;  %s11580_s24 = smov %s7811_s25 }
 0x680   : > { %s11581_s25 = smov %s7815_s26  ;;  %s11582_s26 = smov %s7908_s10 }
 0x681   : > { %s11583_s27 = smov %s7897_s30  ;;  %20 = sbr.rel (!%p18_p7) target bundleno = 4 (0x4), region = 112 }
 0x688   :  { %5858 = vsyncpa [#allocation3], 1 }
 0x689   :  { %5860 = vsyncpa [#allocation3 + $0x1], 1 }
 0x68a   :  { %5861 = vsyncpa [#allocation4], 1 }
 0x68b   :  { %5863 = vsyncpa [#allocation4 + $0x1], 1 }

</bundles_post_ra>
